<compile_context>
chip_gen: v7x
topology: tpu7x:2x2x1
jax: 0.10.0
libtpu: 0.0.40
codegen_flags: <defaults>
</compile_context>

<pallas_src>
import functools

import jax
import jax.numpy as jnp
from jax.experimental import pallas as pl
from jax.experimental.pallas import tpu as pltpu


# ----------------------------------------------------------------------------
# Fused kernel: one block of `Bb` images per grid step.
# ----------------------------------------------------------------------------
def _cnn150_kernel(x_ref, w1_ref, b1_ref, w2_ref, b2_ref, se_ref, so_ref,
                   wf1_ref, bf1_ref, wf2_ref, bf2_ref, wf3_ref, bf3_ref,
                   o_ref, p1_ref):
    f32 = jnp.float32
    Bb, oh1, W, K1 = x_ref.shape            # x: (Bb, H-2, W, 9*cin) im2col rows
    c1 = w1_ref.shape[1]
    ph1, _, pw1p, _ = p1_ref.shape          # pooled conv1 activations (padded W)
    c2 = w2_ref.shape[2]
    pw1 = (W - 2) // 2
    ph2 = (ph1 - 2) // 2
    pw2 = (pw1 - 2) // 2

    # ---- conv1 (im2col K=9*cin) + 2x2 max-pool + bias + ReLU ---------------
    w1 = w1_ref[...]                        # (K1, c1)   -- hoisted loads
    b1 = b1_ref[...]                        # (1, c1)
    se = se_ref[...]                        # (Bb*pw1p, Bb*W) even-col selector
    so = so_ref[...]                        # (Bb*pw1p, Bb*W) odd-col  selector
    for p in range(ph1):                    # one pooled row per iteration
        xs = x_ref[:, 2 * p:2 * p + 2]      # (Bb, 2, W, K1)
        y = jnp.dot(xs.reshape(Bb * 2 * W, K1), w1,
                    preferred_element_type=f32)           # (Bb*2*W, c1)
        y = y.reshape(Bb, 2, W, c1)
        m = jnp.maximum(y[:, 0], y[:, 1])                 # H-pool  (Bb, W, c1)
        mf = m.reshape(Bb * W, c1)
        pooled = jnp.maximum(                              # W-pool via 0/1 dots
            jnp.dot(se, mf, preferred_element_type=f32),
            jnp.dot(so, mf, preferred_element_type=f32))   # (Bb*pw1p, c1)
        pooled = pooled.reshape(Bb, pw1p, c1)
        p1_ref[p] = jnp.maximum(pooled + b1, 0.0)

    # ---- conv2 (kh-folded K=3*c1, kw shift-sum) on the pool-kept rows ------
    nrow = 2 * ph2                          # conv2 rows the 2x2 pool consumes
    rows = [jnp.concatenate([p1_ref[r + di] for di in range(3)], axis=-1)
            for r in range(nrow)]           # each (Bb, pw1p, 3*c1)
    lhs = jnp.concatenate(rows, axis=0)     # (nrow*Bb, pw1p, 3*c1)
    lhsf = lhs.reshape(nrow * Bb * pw1p, 3 * c1)
    acc = None
    for dj in range(3):
        t = jnp.dot(lhsf, w2_ref[dj], preferred_element_type=f32)
        t = t.reshape(nrow, Bb, pw1p, c2)[:, :, dj:dj + 2 * pw2, :]
        acc = t if acc is None else acc + t  # (nrow, Bb, 2*pw2, c2)

    # ---- 2x2 max-pool + flatten in the (h, w, c) order wf1 was prepared for -
    pieces = []
    for i in range(ph2):
        hm = jnp.maximum(acc[2 * i], acc[2 * i + 1])       # (Bb, 2*pw2, c2)
        for j in range(pw2):
            pieces.append(jnp.maximum(hm[:, 2 * j], hm[:, 2 * j + 1]))
    flat = jnp.concatenate(pieces, axis=-1)                 # (Bb, ph2*pw2*c2)
    a2 = jnp.maximum(flat + b2_ref[...], 0.0)               # tiled bias + ReLU

    # ---- fc1 / fc2 / fc3 (single dots, lane-dense padded logits) -----------
    h1 = jnp.maximum(jnp.dot(a2, wf1_ref[...], preferred_element_type=f32)
                     + bf1_ref[...], 0.0)                   # (Bb, 512)
    h2 = jnp.maximum(jnp.dot(h1, wf2_ref[...], preferred_element_type=f32)
                     + bf2_ref[...], 0.0)                   # (Bb, 256)
    o_ref[0] = (jnp.dot(h2, wf3_ref[...], preferred_element_type=f32)
                + bf3_ref[...])                             # (Bb, ncp)


# ----------------------------------------------------------------------------
# Host-side wrapper
# ----------------------------------------------------------------------------
def _build_pool_selectors(block_b, w_in, pw, pw_pad):
    """0/1 selectors mapping flattened (image, col) rows -> pooled even/odd cols."""
    r = jnp.arange(block_b * pw_pad)
    b, j = r // pw_pad, r % pw_pad
    tgt = b * w_in + 2 * j
    valid = j < pw                           # rows j >= pw stay zero (pad cols)
    c = jnp.arange(block_b * w_in)
    se = ((c[None, :] == tgt[:, None]) & valid[:, None]).astype(jnp.float32)
    so = ((c[None, :] == (tgt + 1)[:, None]) & valid[:, None]).astype(jnp.float32)
    return se, so


@functools.partial(jax.jit, static_argnames=("block_b",))
def cnn150_forward(weights, x, block_b=8):
    """x: (B, Cin, H, W) f32 (PyTorch NCHW).  weights: output of prepare_weights."""
    B, cin, H, W = x.shape
    assert W % 8 == 0, "kernel assumes input width is a multiple of 8"
    oh1 = H - 2
    ph1, pw1 = oh1 // 2, (W - 2) // 2
    pw1p = -(-pw1 // 8) * 8                  # sublane-pad pooled conv1 width
    ph2, pw2 = (ph1 - 2) // 2, (pw1 - 2) // 2
    c1 = weights["b1"].shape[1]
    c2 = weights["w2"].shape[2]
    nc = weights["wf3"].shape[1]
    ncp = -(-nc // 128) * 128                # lane-dense logits
    assert weights["w1"].shape[0] == 9 * cin
    assert weights["wf1"].shape[0] == ph2 * pw2 * c2, "fc1 layout mismatch"

    bb = max(1, min(block_b, B))
    b_pad = -(-B // bb) * bb
    n_blk = b_pad // bb

    # Cheap host prep on tiny tensors: NCHW->NHWC, batch pad, conv1 im2col
    # (K = 9*cin; width zero-padded by 2 so every row keeps full width W).
    x_nhwc = jnp.transpose(x, (0, 2, 3, 1)).astype(jnp.float32)
    xp = jnp.pad(x_nhwc, ((0, b_pad - B), (0, 0), (0, 2), (0, 0)))
    x_im = jnp.concatenate(
        [xp[:, di:di + oh1, dj:dj + W, :] for di in range(3) for dj in range(3)],
        axis=-1)                                             # (b_pad, oh1, W, 9*cin)

    se, so = _build_pool_selectors(bb, W, pw1, pw1p)
    wf3p = jnp.pad(weights["wf3"], ((0, 0), (0, ncp - nc)))
    bf3p = jnp.pad(weights["bf3"], ((0, 0), (0, ncp - nc)))

    warg = (weights["w1"], weights["b1"], weights["w2"], weights["b2t"],
            se, so, weights["wf1"], weights["bf1"], weights["wf2"],
            weights["bf2"], wf3p, bf3p)
    full = lambda a: pl.BlockSpec(a.shape, lambda i: (0,) * a.ndim)

    out = pl.pallas_call(
        _cnn150_kernel,
        out_shape=jax.ShapeDtypeStruct((n_blk, bb, ncp), jnp.float32),
        grid=(n_blk,),
        in_specs=[pl.BlockSpec((bb, oh1, W, 9 * cin), lambda i: (i, 0, 0, 0))]
                 + [full(a) for a in warg],
        out_specs=pl.BlockSpec((1, bb, ncp), lambda i: (i, 0, 0)),
        scratch_shapes=[pltpu.VMEM((ph1, bb, pw1p, c1), jnp.float32)],
        compiler_params=pltpu.CompilerParams(
            dimension_semantics=("parallel",)),
    )(x_im, *warg)
    return out.reshape(b_pad, ncp)[:B, :nc]


# ----------------------------------------------------------------------------
# Parameters (PyTorch layouts) and one-time relayout for the kernel
# ----------------------------------------------------------------------------
def init_params(key, num_classes=10, num_channels=3, hw=(16, 16)):
    H, W = hw
    ph2 = ((H - 2) // 2 - 2) // 2
    pw2 = ((W - 2) // 2 - 2) // 2
    fc1_in = 64 * ph2 * pw2                  # what nn.LazyLinear would infer
    ks = jax.random.split(key, 10)
    s = 0.05
    rnd = lambda k, shape: s * jax.random.normal(k, shape, jnp.float32)
    return {
        "conv1_w": rnd(ks[0], (32, num_channels, 3, 3)),
        "conv1_b": rnd(ks[1], (32,)),
        "conv2_w": rnd(ks[2], (64, 32, 3, 3)),
        "conv2_b": rnd(ks[3], (64,)),
        "fc1_w": rnd(ks[4], (512, fc1_in)),
        "fc1_b": rnd(ks[5], (512,)),
        "fc2_w": rnd(ks[6], (256, 512)),
        "fc2_b": rnd(ks[7], (256,)),
        "fc3_w": rnd(ks[8], (num_classes, 256)),
        "fc3_b": rnd(ks[9], (256,)),  # placeholder; replaced below
    } | {"fc3_b": rnd(ks[9], (num_classes,))}


def prepare_weights(p):
    """One-time host relayout of PyTorch-layout params into kernel layouts."""
    c1, cin = p["conv1_w"].shape[0], p["conv1_w"].shape[1]
    c2 = p["conv2_w"].shape[0]
    nh1, fc1_in = p["fc1_w"].shape
    hw = fc1_in // c2                        # spatial positions after pool2
    return {
        # conv1 (OC,IC,KH,KW) -> im2col matrix (KH*KW*IC, OC)
        "w1": jnp.transpose(p["conv1_w"], (2, 3, 1, 0)).reshape(9 * cin, c1),
        "b1": p["conv1_b"].reshape(1, c1),
        # conv2 (OC,IC,KH,KW) -> (KW, KH*IC, OC): one K=3*IC matrix per kw tap
        "w2": jnp.transpose(p["conv2_w"], (3, 2, 1, 0)).reshape(3, 3 * c1, c2),
        # conv2 bias tiled to the flattened (h*w, c) activation layout
        "b2t": jnp.tile(p["conv2_b"], (hw,)).reshape(1, hw * c2),
        # fc1 (out, C*H*W) -> (H*W*C, out): kernel HWC flatten order while
        # preserving PyTorch's NCHW flatten semantics exactly.
        "wf1": jnp.transpose(p["fc1_w"].reshape(nh1, c2, hw),
                             (2, 1, 0)).reshape(hw * c2, nh1),
        "bf1": p["fc1_b"].reshape(1, nh1),
        "wf2": p["fc2_w"].T,
        "bf2": p["fc2_b"].reshape(1, -1),
        "wf3": p["fc3_w"].T,
        "bf3": p["fc3_b"].reshape(1, -1),
    }


# ----------------------------------------------------------------------------
# Pure-JAX reference (mirrors the PyTorch module), for validation.
# ----------------------------------------------------------------------------
def cnn150_reference(p, x):
    hp = jax.lax.Precision.HIGHEST
    dn = ("NCHW", "OIHW", "NCHW")
    y = jax.lax.conv_general_dilated(x, p["conv1_w"], (1, 1), "VALID",
                                     dimension_numbers=dn, precision=hp)
    y = jnp.maximum(y + p["conv1_b"][None, :, None, None], 0.0)
    y = jax.lax.reduce_window(y, -jnp.inf, jax.lax.max,
                              (1, 1, 2, 2), (1, 1, 2, 2), "VALID")
    y = jax.lax.conv_general_dilated(y, p["conv2_w"], (1, 1), "VALID",
                                     dimension_numbers=dn, precision=hp)
    y = jnp.maximum(y + p["conv2_b"][None, :, None, None], 0.0)
    y = jax.lax.reduce_window(y, -jnp.inf, jax.lax.max,
                              (1, 1, 2, 2), (1, 1, 2, 2), "VALID")
    y = y.reshape(y.shape[0], -1)            # NCHW flatten
    y = jnp.maximum(jnp.dot(y, p["fc1_w"].T, precision=hp) + p["fc1_b"], 0.0)
    y = jnp.maximum(jnp.dot(y, p["fc2_w"].T, precision=hp) + p["fc2_b"], 0.0)
    return jnp.dot(y, p["fc3_w"].T, precision=hp) + p["fc3_b"]


if __name__ == "__main__":
    B, C, H, W = 8, 3, 16, 16
    key = jax.random.PRNGKey(0)
    kx, kp = jax.random.split(key)
    x = jax.random.normal(kx, (B, C, H, W), jnp.float32)

    params = init_params(kp, num_classes=10, num_channels=C, hw=(H, W))
    weights = prepare_weights(params)

    # block_b=4 -> grid of length 2 (v7x megacore gets both cores busy).
    out = jax.block_until_ready(cnn150_forward(weights, x, block_b=4))
    assert out.shape == (B, 10), out.shape

    ref = jax.block_until_ready(cnn150_reference(params, x))
    err = float(jnp.max(jnp.abs(out - ref)))
    assert err < 1e-3, f"mismatch vs reference: max abs err {err}"

    print("KERNEL_OK")
</pallas_src>

<mosaic_0001>
module attributes {stable_mosaic.version = 11 : i64} {
  func.func @_cnn150_kernel(%arg0: i32, %arg1: memref<4x14x16x27xf32, #tpu.memory_space<vmem>>, %arg2: memref<27x32xf32, #tpu.memory_space<vmem>>, %arg3: memref<1x32xf32, #tpu.memory_space<vmem>>, %arg4: memref<3x96x64xf32, #tpu.memory_space<vmem>>, %arg5: memref<1x256xf32, #tpu.memory_space<vmem>>, %arg6: memref<32x64xf32, #tpu.memory_space<vmem>>, %arg7: memref<32x64xf32, #tpu.memory_space<vmem>>, %arg8: memref<256x512xf32, #tpu.memory_space<vmem>>, %arg9: memref<1x512xf32, #tpu.memory_space<vmem>>, %arg10: memref<512x256xf32, #tpu.memory_space<vmem>>, %arg11: memref<1x256xf32, #tpu.memory_space<vmem>>, %arg12: memref<256x128xf32, #tpu.memory_space<vmem>>, %arg13: memref<1x128xf32, #tpu.memory_space<vmem>>, %arg14: memref<1x4x128xf32, #tpu.memory_space<vmem>>, %arg15: memref<7x4x8x32xf32, #tpu.memory_space<vmem>>) attributes {dimension_semantics = [#tpu.dimension_semantics<parallel>], iteration_bounds = array<i64: 2>, scalar_prefetch = 0 : i64, scratch_operands = 1 : i64, tpu.core_type = #tpu.core_type<tc>, window_params = [{transform_indices = @transform_0, window_bounds = array<i64: 4, 14, 16, 27>}, {pipeline_mode = #tpu.pipeline_mode<synchronous>, transform_indices = @transform_1, window_bounds = array<i64: 27, 32>}, {pipeline_mode = #tpu.pipeline_mode<synchronous>, transform_indices = @transform_2, window_bounds = array<i64: 1, 32>}, {pipeline_mode = #tpu.pipeline_mode<synchronous>, transform_indices = @transform_3, window_bounds = array<i64: 3, 96, 64>}, {pipeline_mode = #tpu.pipeline_mode<synchronous>, transform_indices = @transform_4, window_bounds = array<i64: 1, 256>}, {pipeline_mode = #tpu.pipeline_mode<synchronous>, transform_indices = @transform_5, window_bounds = array<i64: 32, 64>}, {pipeline_mode = #tpu.pipeline_mode<synchronous>, transform_indices = @transform_6, window_bounds = array<i64: 32, 64>}, {pipeline_mode = #tpu.pipeline_mode<synchronous>, transform_indices = @transform_7, window_bounds = array<i64: 256, 512>}, {pipeline_mode = #tpu.pipeline_mode<synchronous>, transform_indices = @transform_8, window_bounds = array<i64: 1, 512>}, {pipeline_mode = #tpu.pipeline_mode<synchronous>, transform_indices = @transform_9, window_bounds = array<i64: 512, 256>}, {pipeline_mode = #tpu.pipeline_mode<synchronous>, transform_indices = @transform_10, window_bounds = array<i64: 1, 256>}, {pipeline_mode = #tpu.pipeline_mode<synchronous>, transform_indices = @transform_11, window_bounds = array<i64: 256, 128>}, {pipeline_mode = #tpu.pipeline_mode<synchronous>, transform_indices = @transform_12, window_bounds = array<i64: 1, 128>}, {transform_indices = @transform_13, window_bounds = array<i64: 1, 4, 128>}]} {
    %c0 = arith.constant 0 : index
    %c0_0 = arith.constant 0 : index
    %0 = vector.load %arg2[%c0, %c0_0] : memref<27x32xf32, #tpu.memory_space<vmem>>, vector<27x32xf32>
    %c0_1 = arith.constant 0 : index
    %c0_2 = arith.constant 0 : index
    %1 = vector.load %arg3[%c0_1, %c0_2] : memref<1x32xf32, #tpu.memory_space<vmem>>, vector<1x32xf32>
    %c0_3 = arith.constant 0 : index
    %c0_4 = arith.constant 0 : index
    %2 = vector.load %arg6[%c0_3, %c0_4] : memref<32x64xf32, #tpu.memory_space<vmem>>, vector<32x64xf32>
    %c0_5 = arith.constant 0 : index
    %c0_6 = arith.constant 0 : index
    %3 = vector.load %arg7[%c0_5, %c0_6] : memref<32x64xf32, #tpu.memory_space<vmem>>, vector<32x64xf32>
    %c0_7 = arith.constant 0 : index
    %c0_8 = arith.constant 0 : index
    %c0_9 = arith.constant 0 : index
    %c0_10 = arith.constant 0 : index
    %4 = vector.load %arg1[%c0_7, %c0_8, %c0_9, %c0_10] : memref<4x14x16x27xf32, #tpu.memory_space<vmem>>, vector<4x2x16x27xf32>
    %5 = vector.shape_cast %4 : vector<4x2x16x27xf32> to vector<128x27xf32>
    %cst = arith.constant dense<0.000000e+00> : vector<128x32xf32>
    %6 = tpu.matmul %5, %0, %cst {dimension_numbers = #tpu.dot_dimension_numbers<[1], [0], [0], [1], [0, 0, 1, 1], [], []>} : vector<128x27xf32>, vector<27x32xf32>, vector<128x32xf32> -> vector<128x32xf32>
    %7 = vector.shape_cast %6 : vector<128x32xf32> to vector<4x2x16x32xf32>
    %8 = vector.extract_strided_slice %7 {offsets = [0, 0, 0, 0], sizes = [4, 1, 16, 32], strides = [1, 1, 1, 1]} : vector<4x2x16x32xf32> to vector<4x1x16x32xf32>
    %9 = vector.shape_cast %8 : vector<4x1x16x32xf32> to vector<4x16x32xf32>
    %10 = vector.extract_strided_slice %7 {offsets = [0, 1, 0, 0], sizes = [4, 1, 16, 32], strides = [1, 1, 1, 1]} : vector<4x2x16x32xf32> to vector<4x1x16x32xf32>
    %11 = vector.shape_cast %10 : vector<4x1x16x32xf32> to vector<4x16x32xf32>
    %12 = arith.maximumf %9, %11 : vector<4x16x32xf32>
    %13 = vector.shape_cast %12 : vector<4x16x32xf32> to vector<64x32xf32>
    %cst_11 = arith.constant dense<0.000000e+00> : vector<32x32xf32>
    %14 = tpu.matmul %2, %13, %cst_11 {dimension_numbers = #tpu.dot_dimension_numbers<[1], [0], [0], [1], [0, 0, 1, 1], [], []>} : vector<32x64xf32>, vector<64x32xf32>, vector<32x32xf32> -> vector<32x32xf32>
    %cst_12 = arith.constant dense<0.000000e+00> : vector<32x32xf32>
    %15 = tpu.matmul %3, %13, %cst_12 {dimension_numbers = #tpu.dot_dimension_numbers<[1], [0], [0], [1], [0, 0, 1, 1], [], []>} : vector<32x64xf32>, vector<64x32xf32>, vector<32x32xf32> -> vector<32x32xf32>
    %16 = arith.maximumf %14, %15 : vector<32x32xf32>
    %17 = vector.shape_cast %16 : vector<32x32xf32> to vector<4x8x32xf32>
    %18 = vector.shape_cast %1 : vector<1x32xf32> to vector<1x1x32xf32>
    %19 = vector.broadcast %18 : vector<1x1x32xf32> to vector<4x8x32xf32>
    %20 = arith.addf %17, %19 : vector<4x8x32xf32>
    %cst_13 = arith.constant 0.000000e+00 : f32
    %21 = vector.broadcast %cst_13 : f32 to vector<4x8x32xf32>
    %22 = arith.maximumf %20, %21 : vector<4x8x32xf32>
    %c0_14 = arith.constant 0 : index
    %c0_15 = arith.constant 0 : index
    %c0_16 = arith.constant 0 : index
    %c0_17 = arith.constant 0 : index
    %23 = vector.load %arg15[%c0_14, %c0_15, %c0_16, %c0_17] : memref<7x4x8x32xf32, #tpu.memory_space<vmem>>, vector<1x4x8x32xf32>
    %24 = vector.shape_cast %23 : vector<1x4x8x32xf32> to vector<4x8x32xf32>
    %25 = vector.shape_cast %22 : vector<4x8x32xf32> to vector<1x4x8x32xf32>
    tpu.vector_store %arg15[%c0_14, %c0_15, %c0_16, %c0_17], %25 {strides = array<i32>} : memref<7x4x8x32xf32, #tpu.memory_space<vmem>>, vector<1x4x8x32xf32>,
    %c0_18 = arith.constant 0 : index
    %c2 = arith.constant 2 : index
    %c0_19 = arith.constant 0 : index
    %c0_20 = arith.constant 0 : index
    %26 = vector.load %arg1[%c0_18, %c2, %c0_19, %c0_20] : memref<4x14x16x27xf32, #tpu.memory_space<vmem>>, vector<4x2x16x27xf32>
    %27 = vector.shape_cast %26 : vector<4x2x16x27xf32> to vector<128x27xf32>
    %cst_21 = arith.constant dense<0.000000e+00> : vector<128x32xf32>
    %28 = tpu.matmul %27, %0, %cst_21 {dimension_numbers = #tpu.dot_dimension_numbers<[1], [0], [0], [1], [0, 0, 1, 1], [], []>} : vector<128x27xf32>, vector<27x32xf32>, vector<128x32xf32> -> vector<128x32xf32>
    %29 = vector.shape_cast %28 : vector<128x32xf32> to vector<4x2x16x32xf32>
    %30 = vector.extract_strided_slice %29 {offsets = [0, 0, 0, 0], sizes = [4, 1, 16, 32], strides = [1, 1, 1, 1]} : vector<4x2x16x32xf32> to vector<4x1x16x32xf32>
    %31 = vector.shape_cast %30 : vector<4x1x16x32xf32> to vector<4x16x32xf32>
    %32 = vector.extract_strided_slice %29 {offsets = [0, 1, 0, 0], sizes = [4, 1, 16, 32], strides = [1, 1, 1, 1]} : vector<4x2x16x32xf32> to vector<4x1x16x32xf32>
    %33 = vector.shape_cast %32 : vector<4x1x16x32xf32> to vector<4x16x32xf32>
    %34 = arith.maximumf %31, %33 : vector<4x16x32xf32>
    %35 = vector.shape_cast %34 : vector<4x16x32xf32> to vector<64x32xf32>
    %cst_22 = arith.constant dense<0.000000e+00> : vector<32x32xf32>
    %36 = tpu.matmul %2, %35, %cst_22 {dimension_numbers = #tpu.dot_dimension_numbers<[1], [0], [0], [1], [0, 0, 1, 1], [], []>} : vector<32x64xf32>, vector<64x32xf32>, vector<32x32xf32> -> vector<32x32xf32>
    %cst_23 = arith.constant dense<0.000000e+00> : vector<32x32xf32>
    %37 = tpu.matmul %3, %35, %cst_23 {dimension_numbers = #tpu.dot_dimension_numbers<[1], [0], [0], [1], [0, 0, 1, 1], [], []>} : vector<32x64xf32>, vector<64x32xf32>, vector<32x32xf32> -> vector<32x32xf32>
    %38 = arith.maximumf %36, %37 : vector<32x32xf32>
    %39 = vector.shape_cast %38 : vector<32x32xf32> to vector<4x8x32xf32>
    %40 = vector.shape_cast %1 : vector<1x32xf32> to vector<1x1x32xf32>
    %41 = vector.broadcast %40 : vector<1x1x32xf32> to vector<4x8x32xf32>
    %42 = arith.addf %39, %41 : vector<4x8x32xf32>
    %cst_24 = arith.constant 0.000000e+00 : f32
    %43 = vector.broadcast %cst_24 : f32 to vector<4x8x32xf32>
    %44 = arith.maximumf %42, %43 : vector<4x8x32xf32>
    %c1 = arith.constant 1 : index
    %c0_25 = arith.constant 0 : index
    %c0_26 = arith.constant 0 : index
    %c0_27 = arith.constant 0 : index
    %45 = vector.load %arg15[%c1, %c0_25, %c0_26, %c0_27] : memref<7x4x8x32xf32, #tpu.memory_space<vmem>>, vector<1x4x8x32xf32>
    %46 = vector.shape_cast %45 : vector<1x4x8x32xf32> to vector<4x8x32xf32>
    %47 = vector.shape_cast %44 : vector<4x8x32xf32> to vector<1x4x8x32xf32>
    tpu.vector_store %arg15[%c1, %c0_25, %c0_26, %c0_27], %47 {strides = array<i32>} : memref<7x4x8x32xf32, #tpu.memory_space<vmem>>, vector<1x4x8x32xf32>,
    %c0_28 = arith.constant 0 : index
    %c4 = arith.constant 4 : index
    %c0_29 = arith.constant 0 : index
    %c0_30 = arith.constant 0 : index
    %48 = vector.load %arg1[%c0_28, %c4, %c0_29, %c0_30] : memref<4x14x16x27xf32, #tpu.memory_space<vmem>>, vector<4x2x16x27xf32>
    %49 = vector.shape_cast %48 : vector<4x2x16x27xf32> to vector<128x27xf32>
    %cst_31 = arith.constant dense<0.000000e+00> : vector<128x32xf32>
    %50 = tpu.matmul %49, %0, %cst_31 {dimension_numbers = #tpu.dot_dimension_numbers<[1], [0], [0], [1], [0, 0, 1, 1], [], []>} : vector<128x27xf32>, vector<27x32xf32>, vector<128x32xf32> -> vector<128x32xf32>
    %51 = vector.shape_cast %50 : vector<128x32xf32> to vector<4x2x16x32xf32>
    %52 = vector.extract_strided_slice %51 {offsets = [0, 0, 0, 0], sizes = [4, 1, 16, 32], strides = [1, 1, 1, 1]} : vector<4x2x16x32xf32> to vector<4x1x16x32xf32>
    %53 = vector.shape_cast %52 : vector<4x1x16x32xf32> to vector<4x16x32xf32>
    %54 = vector.extract_strided_slice %51 {offsets = [0, 1, 0, 0], sizes = [4, 1, 16, 32], strides = [1, 1, 1, 1]} : vector<4x2x16x32xf32> to vector<4x1x16x32xf32>
    %55 = vector.shape_cast %54 : vector<4x1x16x32xf32> to vector<4x16x32xf32>
    %56 = arith.maximumf %53, %55 : vector<4x16x32xf32>
    %57 = vector.shape_cast %56 : vector<4x16x32xf32> to vector<64x32xf32>
    %cst_32 = arith.constant dense<0.000000e+00> : vector<32x32xf32>
    %58 = tpu.matmul %2, %57, %cst_32 {dimension_numbers = #tpu.dot_dimension_numbers<[1], [0], [0], [1], [0, 0, 1, 1], [], []>} : vector<32x64xf32>, vector<64x32xf32>, vector<32x32xf32> -> vector<32x32xf32>
    %cst_33 = arith.constant dense<0.000000e+00> : vector<32x32xf32>
    %59 = tpu.matmul %3, %57, %cst_33 {dimension_numbers = #tpu.dot_dimension_numbers<[1], [0], [0], [1], [0, 0, 1, 1], [], []>} : vector<32x64xf32>, vector<64x32xf32>, vector<32x32xf32> -> vector<32x32xf32>
    %60 = arith.maximumf %58, %59 : vector<32x32xf32>
    %61 = vector.shape_cast %60 : vector<32x32xf32> to vector<4x8x32xf32>
    %62 = vector.shape_cast %1 : vector<1x32xf32> to vector<1x1x32xf32>
    %63 = vector.broadcast %62 : vector<1x1x32xf32> to vector<4x8x32xf32>
    %64 = arith.addf %61, %63 : vector<4x8x32xf32>
    %cst_34 = arith.constant 0.000000e+00 : f32
    %65 = vector.broadcast %cst_34 : f32 to vector<4x8x32xf32>
    %66 = arith.maximumf %64, %65 : vector<4x8x32xf32>
    %c2_35 = arith.constant 2 : index
    %c0_36 = arith.constant 0 : index
    %c0_37 = arith.constant 0 : index
    %c0_38 = arith.constant 0 : index
    %67 = vector.load %arg15[%c2_35, %c0_36, %c0_37, %c0_38] : memref<7x4x8x32xf32, #tpu.memory_space<vmem>>, vector<1x4x8x32xf32>
    %68 = vector.shape_cast %67 : vector<1x4x8x32xf32> to vector<4x8x32xf32>
    %69 = vector.shape_cast %66 : vector<4x8x32xf32> to vector<1x4x8x32xf32>
    tpu.vector_store %arg15[%c2_35, %c0_36, %c0_37, %c0_38], %69 {strides = array<i32>} : memref<7x4x8x32xf32, #tpu.memory_space<vmem>>, vector<1x4x8x32xf32>,
    %c0_39 = arith.constant 0 : index
    %c6 = arith.constant 6 : index
    %c0_40 = arith.constant 0 : index
    %c0_41 = arith.constant 0 : index
    %70 = vector.load %arg1[%c0_39, %c6, %c0_40, %c0_41] : memref<4x14x16x27xf32, #tpu.memory_space<vmem>>, vector<4x2x16x27xf32>
    %71 = vector.shape_cast %70 : vector<4x2x16x27xf32> to vector<128x27xf32>
    %cst_42 = arith.constant dense<0.000000e+00> : vector<128x32xf32>
    %72 = tpu.matmul %71, %0, %cst_42 {dimension_numbers = #tpu.dot_dimension_numbers<[1], [0], [0], [1], [0, 0, 1, 1], [], []>} : vector<128x27xf32>, vector<27x32xf32>, vector<128x32xf32> -> vector<128x32xf32>
    %73 = vector.shape_cast %72 : vector<128x32xf32> to vector<4x2x16x32xf32>
    %74 = vector.extract_strided_slice %73 {offsets = [0, 0, 0, 0], sizes = [4, 1, 16, 32], strides = [1, 1, 1, 1]} : vector<4x2x16x32xf32> to vector<4x1x16x32xf32>
    %75 = vector.shape_cast %74 : vector<4x1x16x32xf32> to vector<4x16x32xf32>
    %76 = vector.extract_strided_slice %73 {offsets = [0, 1, 0, 0], sizes = [4, 1, 16, 32], strides = [1, 1, 1, 1]} : vector<4x2x16x32xf32> to vector<4x1x16x32xf32>
    %77 = vector.shape_cast %76 : vector<4x1x16x32xf32> to vector<4x16x32xf32>
    %78 = arith.maximumf %75, %77 : vector<4x16x32xf32>
    %79 = vector.shape_cast %78 : vector<4x16x32xf32> to vector<64x32xf32>
    %cst_43 = arith.constant dense<0.000000e+00> : vector<32x32xf32>
    %80 = tpu.matmul %2, %79, %cst_43 {dimension_numbers = #tpu.dot_dimension_numbers<[1], [0], [0], [1], [0, 0, 1, 1], [], []>} : vector<32x64xf32>, vector<64x32xf32>, vector<32x32xf32> -> vector<32x32xf32>
    %cst_44 = arith.constant dense<0.000000e+00> : vector<32x32xf32>
    %81 = tpu.matmul %3, %79, %cst_44 {dimension_numbers = #tpu.dot_dimension_numbers<[1], [0], [0], [1], [0, 0, 1, 1], [], []>} : vector<32x64xf32>, vector<64x32xf32>, vector<32x32xf32> -> vector<32x32xf32>
    %82 = arith.maximumf %80, %81 : vector<32x32xf32>
    %83 = vector.shape_cast %82 : vector<32x32xf32> to vector<4x8x32xf32>
    %84 = vector.shape_cast %1 : vector<1x32xf32> to vector<1x1x32xf32>
    %85 = vector.broadcast %84 : vector<1x1x32xf32> to vector<4x8x32xf32>
    %86 = arith.addf %83, %85 : vector<4x8x32xf32>
    %cst_45 = arith.constant 0.000000e+00 : f32
    %87 = vector.broadcast %cst_45 : f32 to vector<4x8x32xf32>
    %88 = arith.maximumf %86, %87 : vector<4x8x32xf32>
    %c3 = arith.constant 3 : index
    %c0_46 = arith.constant 0 : index
    %c0_47 = arith.constant 0 : index
    %c0_48 = arith.constant 0 : index
    %89 = vector.load %arg15[%c3, %c0_46, %c0_47, %c0_48] : memref<7x4x8x32xf32, #tpu.memory_space<vmem>>, vector<1x4x8x32xf32>
    %90 = vector.shape_cast %89 : vector<1x4x8x32xf32> to vector<4x8x32xf32>
    %91 = vector.shape_cast %88 : vector<4x8x32xf32> to vector<1x4x8x32xf32>
    tpu.vector_store %arg15[%c3, %c0_46, %c0_47, %c0_48], %91 {strides = array<i32>} : memref<7x4x8x32xf32, #tpu.memory_space<vmem>>, vector<1x4x8x32xf32>,
    %c0_49 = arith.constant 0 : index
    %c8 = arith.constant 8 : index
    %c0_50 = arith.constant 0 : index
    %c0_51 = arith.constant 0 : index
    %92 = vector.load %arg1[%c0_49, %c8, %c0_50, %c0_51] : memref<4x14x16x27xf32, #tpu.memory_space<vmem>>, vector<4x2x16x27xf32>
    %93 = vector.shape_cast %92 : vector<4x2x16x27xf32> to vector<128x27xf32>
    %cst_52 = arith.constant dense<0.000000e+00> : vector<128x32xf32>
    %94 = tpu.matmul %93, %0, %cst_52 {dimension_numbers = #tpu.dot_dimension_numbers<[1], [0], [0], [1], [0, 0, 1, 1], [], []>} : vector<128x27xf32>, vector<27x32xf32>, vector<128x32xf32> -> vector<128x32xf32>
    %95 = vector.shape_cast %94 : vector<128x32xf32> to vector<4x2x16x32xf32>
    %96 = vector.extract_strided_slice %95 {offsets = [0, 0, 0, 0], sizes = [4, 1, 16, 32], strides = [1, 1, 1, 1]} : vector<4x2x16x32xf32> to vector<4x1x16x32xf32>
    %97 = vector.shape_cast %96 : vector<4x1x16x32xf32> to vector<4x16x32xf32>
    %98 = vector.extract_strided_slice %95 {offsets = [0, 1, 0, 0], sizes = [4, 1, 16, 32], strides = [1, 1, 1, 1]} : vector<4x2x16x32xf32> to vector<4x1x16x32xf32>
    %99 = vector.shape_cast %98 : vector<4x1x16x32xf32> to vector<4x16x32xf32>
    %100 = arith.maximumf %97, %99 : vector<4x16x32xf32>
    %101 = vector.shape_cast %100 : vector<4x16x32xf32> to vector<64x32xf32>
    %cst_53 = arith.constant dense<0.000000e+00> : vector<32x32xf32>
    %102 = tpu.matmul %2, %101, %cst_53 {dimension_numbers = #tpu.dot_dimension_numbers<[1], [0], [0], [1], [0, 0, 1, 1], [], []>} : vector<32x64xf32>, vector<64x32xf32>, vector<32x32xf32> -> vector<32x32xf32>
    %cst_54 = arith.constant dense<0.000000e+00> : vector<32x32xf32>
    %103 = tpu.matmul %3, %101, %cst_54 {dimension_numbers = #tpu.dot_dimension_numbers<[1], [0], [0], [1], [0, 0, 1, 1], [], []>} : vector<32x64xf32>, vector<64x32xf32>, vector<32x32xf32> -> vector<32x32xf32>
    %104 = arith.maximumf %102, %103 : vector<32x32xf32>
    %105 = vector.shape_cast %104 : vector<32x32xf32> to vector<4x8x32xf32>
    %106 = vector.shape_cast %1 : vector<1x32xf32> to vector<1x1x32xf32>
    %107 = vector.broadcast %106 : vector<1x1x32xf32> to vector<4x8x32xf32>
    %108 = arith.addf %105, %107 : vector<4x8x32xf32>
    %cst_55 = arith.constant 0.000000e+00 : f32
    %109 = vector.broadcast %cst_55 : f32 to vector<4x8x32xf32>
    %110 = arith.maximumf %108, %109 : vector<4x8x32xf32>
    %c4_56 = arith.constant 4 : index
    %c0_57 = arith.constant 0 : index
    %c0_58 = arith.constant 0 : index
    %c0_59 = arith.constant 0 : index
    %111 = vector.load %arg15[%c4_56, %c0_57, %c0_58, %c0_59] : memref<7x4x8x32xf32, #tpu.memory_space<vmem>>, vector<1x4x8x32xf32>
    %112 = vector.shape_cast %111 : vector<1x4x8x32xf32> to vector<4x8x32xf32>
    %113 = vector.shape_cast %110 : vector<4x8x32xf32> to vector<1x4x8x32xf32>
    tpu.vector_store %arg15[%c4_56, %c0_57, %c0_58, %c0_59], %113 {strides = array<i32>} : memref<7x4x8x32xf32, #tpu.memory_space<vmem>>, vector<1x4x8x32xf32>,
    %c0_60 = arith.constant 0 : index
    %c10 = arith.constant 10 : index
    %c0_61 = arith.constant 0 : index
    %c0_62 = arith.constant 0 : index
    %114 = vector.load %arg1[%c0_60, %c10, %c0_61, %c0_62] : memref<4x14x16x27xf32, #tpu.memory_space<vmem>>, vector<4x2x16x27xf32>
    %115 = vector.shape_cast %114 : vector<4x2x16x27xf32> to vector<128x27xf32>
    %cst_63 = arith.constant dense<0.000000e+00> : vector<128x32xf32>
    %116 = tpu.matmul %115, %0, %cst_63 {dimension_numbers = #tpu.dot_dimension_numbers<[1], [0], [0], [1], [0, 0, 1, 1], [], []>} : vector<128x27xf32>, vector<27x32xf32>, vector<128x32xf32> -> vector<128x32xf32>
    %117 = vector.shape_cast %116 : vector<128x32xf32> to vector<4x2x16x32xf32>
    %118 = vector.extract_strided_slice %117 {offsets = [0, 0, 0, 0], sizes = [4, 1, 16, 32], strides = [1, 1, 1, 1]} : vector<4x2x16x32xf32> to vector<4x1x16x32xf32>
    %119 = vector.shape_cast %118 : vector<4x1x16x32xf32> to vector<4x16x32xf32>
    %120 = vector.extract_strided_slice %117 {offsets = [0, 1, 0, 0], sizes = [4, 1, 16, 32], strides = [1, 1, 1, 1]} : vector<4x2x16x32xf32> to vector<4x1x16x32xf32>
    %121 = vector.shape_cast %120 : vector<4x1x16x32xf32> to vector<4x16x32xf32>
    %122 = arith.maximumf %119, %121 : vector<4x16x32xf32>
    %123 = vector.shape_cast %122 : vector<4x16x32xf32> to vector<64x32xf32>
    %cst_64 = arith.constant dense<0.000000e+00> : vector<32x32xf32>
    %124 = tpu.matmul %2, %123, %cst_64 {dimension_numbers = #tpu.dot_dimension_numbers<[1], [0], [0], [1], [0, 0, 1, 1], [], []>} : vector<32x64xf32>, vector<64x32xf32>, vector<32x32xf32> -> vector<32x32xf32>
    %cst_65 = arith.constant dense<0.000000e+00> : vector<32x32xf32>
    %125 = tpu.matmul %3, %123, %cst_65 {dimension_numbers = #tpu.dot_dimension_numbers<[1], [0], [0], [1], [0, 0, 1, 1], [], []>} : vector<32x64xf32>, vector<64x32xf32>, vector<32x32xf32> -> vector<32x32xf32>
    %126 = arith.maximumf %124, %125 : vector<32x32xf32>
    %127 = vector.shape_cast %126 : vector<32x32xf32> to vector<4x8x32xf32>
    %128 = vector.shape_cast %1 : vector<1x32xf32> to vector<1x1x32xf32>
    %129 = vector.broadcast %128 : vector<1x1x32xf32> to vector<4x8x32xf32>
    %130 = arith.addf %127, %129 : vector<4x8x32xf32>
    %cst_66 = arith.constant 0.000000e+00 : f32
    %131 = vector.broadcast %cst_66 : f32 to vector<4x8x32xf32>
    %132 = arith.maximumf %130, %131 : vector<4x8x32xf32>
    %c5 = arith.constant 5 : index
    %c0_67 = arith.constant 0 : index
    %c0_68 = arith.constant 0 : index
    %c0_69 = arith.constant 0 : index
    %133 = vector.load %arg15[%c5, %c0_67, %c0_68, %c0_69] : memref<7x4x8x32xf32, #tpu.memory_space<vmem>>, vector<1x4x8x32xf32>
    %134 = vector.shape_cast %133 : vector<1x4x8x32xf32> to vector<4x8x32xf32>
    %135 = vector.shape_cast %132 : vector<4x8x32xf32> to vector<1x4x8x32xf32>
    tpu.vector_store %arg15[%c5, %c0_67, %c0_68, %c0_69], %135 {strides = array<i32>} : memref<7x4x8x32xf32, #tpu.memory_space<vmem>>, vector<1x4x8x32xf32>,
    %c0_70 = arith.constant 0 : index
    %c12 = arith.constant 12 : index
    %c0_71 = arith.constant 0 : index
    %c0_72 = arith.constant 0 : index
    %136 = vector.load %arg1[%c0_70, %c12, %c0_71, %c0_72] : memref<4x14x16x27xf32, #tpu.memory_space<vmem>>, vector<4x2x16x27xf32>
    %137 = vector.shape_cast %136 : vector<4x2x16x27xf32> to vector<128x27xf32>
    %cst_73 = arith.constant dense<0.000000e+00> : vector<128x32xf32>
    %138 = tpu.matmul %137, %0, %cst_73 {dimension_numbers = #tpu.dot_dimension_numbers<[1], [0], [0], [1], [0, 0, 1, 1], [], []>} : vector<128x27xf32>, vector<27x32xf32>, vector<128x32xf32> -> vector<128x32xf32>
    %139 = vector.shape_cast %138 : vector<128x32xf32> to vector<4x2x16x32xf32>
    %140 = vector.extract_strided_slice %139 {offsets = [0, 0, 0, 0], sizes = [4, 1, 16, 32], strides = [1, 1, 1, 1]} : vector<4x2x16x32xf32> to vector<4x1x16x32xf32>
    %141 = vector.shape_cast %140 : vector<4x1x16x32xf32> to vector<4x16x32xf32>
    %142 = vector.extract_strided_slice %139 {offsets = [0, 1, 0, 0], sizes = [4, 1, 16, 32], strides = [1, 1, 1, 1]} : vector<4x2x16x32xf32> to vector<4x1x16x32xf32>
    %143 = vector.shape_cast %142 : vector<4x1x16x32xf32> to vector<4x16x32xf32>
    %144 = arith.maximumf %141, %143 : vector<4x16x32xf32>
    %145 = vector.shape_cast %144 : vector<4x16x32xf32> to vector<64x32xf32>
    %cst_74 = arith.constant dense<0.000000e+00> : vector<32x32xf32>
    %146 = tpu.matmul %2, %145, %cst_74 {dimension_numbers = #tpu.dot_dimension_numbers<[1], [0], [0], [1], [0, 0, 1, 1], [], []>} : vector<32x64xf32>, vector<64x32xf32>, vector<32x32xf32> -> vector<32x32xf32>
    %cst_75 = arith.constant dense<0.000000e+00> : vector<32x32xf32>
    %147 = tpu.matmul %3, %145, %cst_75 {dimension_numbers = #tpu.dot_dimension_numbers<[1], [0], [0], [1], [0, 0, 1, 1], [], []>} : vector<32x64xf32>, vector<64x32xf32>, vector<32x32xf32> -> vector<32x32xf32>
    %148 = arith.maximumf %146, %147 : vector<32x32xf32>
    %149 = vector.shape_cast %148 : vector<32x32xf32> to vector<4x8x32xf32>
    %150 = vector.shape_cast %1 : vector<1x32xf32> to vector<1x1x32xf32>
    %151 = vector.broadcast %150 : vector<1x1x32xf32> to vector<4x8x32xf32>
    %152 = arith.addf %149, %151 : vector<4x8x32xf32>
    %cst_76 = arith.constant 0.000000e+00 : f32
    %153 = vector.broadcast %cst_76 : f32 to vector<4x8x32xf32>
    %154 = arith.maximumf %152, %153 : vector<4x8x32xf32>
    %c6_77 = arith.constant 6 : index
    %c0_78 = arith.constant 0 : index
    %c0_79 = arith.constant 0 : index
    %c0_80 = arith.constant 0 : index
    %155 = vector.load %arg15[%c6_77, %c0_78, %c0_79, %c0_80] : memref<7x4x8x32xf32, #tpu.memory_space<vmem>>, vector<1x4x8x32xf32>
    %156 = vector.shape_cast %155 : vector<1x4x8x32xf32> to vector<4x8x32xf32>
    %157 = vector.shape_cast %154 : vector<4x8x32xf32> to vector<1x4x8x32xf32>
    tpu.vector_store %arg15[%c6_77, %c0_78, %c0_79, %c0_80], %157 {strides = array<i32>} : memref<7x4x8x32xf32, #tpu.memory_space<vmem>>, vector<1x4x8x32xf32>,
    %c0_81 = arith.constant 0 : index
    %c0_82 = arith.constant 0 : index
    %c0_83 = arith.constant 0 : index
    %c0_84 = arith.constant 0 : index
    %158 = vector.load %arg15[%c0_81, %c0_82, %c0_83, %c0_84] : memref<7x4x8x32xf32, #tpu.memory_space<vmem>>, vector<1x4x8x32xf32>
    %159 = vector.shape_cast %158 : vector<1x4x8x32xf32> to vector<4x8x32xf32>
    %c1_85 = arith.constant 1 : index
    %c0_86 = arith.constant 0 : index
    %c0_87 = arith.constant 0 : index
    %c0_88 = arith.constant 0 : index
    %160 = vector.load %arg15[%c1_85, %c0_86, %c0_87, %c0_88] : memref<7x4x8x32xf32, #tpu.memory_space<vmem>>, vector<1x4x8x32xf32>
    %161 = vector.shape_cast %160 : vector<1x4x8x32xf32> to vector<4x8x32xf32>
    %c2_89 = arith.constant 2 : index
    %c0_90 = arith.constant 0 : index
    %c0_91 = arith.constant 0 : index
    %c0_92 = arith.constant 0 : index
    %162 = vector.load %arg15[%c2_89, %c0_90, %c0_91, %c0_92] : memref<7x4x8x32xf32, #tpu.memory_space<vmem>>, vector<1x4x8x32xf32>
    %163 = vector.shape_cast %162 : vector<1x4x8x32xf32> to vector<4x8x32xf32>
    %164 = tpu.concatenate %159, %161, %163 in 2 : vector<4x8x32xf32>, vector<4x8x32xf32>, vector<4x8x32xf32> -> vector<4x8x96xf32>
    %c1_93 = arith.constant 1 : index
    %c0_94 = arith.constant 0 : index
    %c0_95 = arith.constant 0 : index
    %c0_96 = arith.constant 0 : index
    %165 = vector.load %arg15[%c1_93, %c0_94, %c0_95, %c0_96] : memref<7x4x8x32xf32, #tpu.memory_space<vmem>>, vector<1x4x8x32xf32>
    %166 = vector.shape_cast %165 : vector<1x4x8x32xf32> to vector<4x8x32xf32>
    %c2_97 = arith.constant 2 : index
    %c0_98 = arith.constant 0 : index
    %c0_99 = arith.constant 0 : index
    %c0_100 = arith.constant 0 : index
    %167 = vector.load %arg15[%c2_97, %c0_98, %c0_99, %c0_100] : memref<7x4x8x32xf32, #tpu.memory_space<vmem>>, vector<1x4x8x32xf32>
    %168 = vector.shape_cast %167 : vector<1x4x8x32xf32> to vector<4x8x32xf32>
    %c3_101 = arith.constant 3 : index
    %c0_102 = arith.constant 0 : index
    %c0_103 = arith.constant 0 : index
    %c0_104 = arith.constant 0 : index
    %169 = vector.load %arg15[%c3_101, %c0_102, %c0_103, %c0_104] : memref<7x4x8x32xf32, #tpu.memory_space<vmem>>, vector<1x4x8x32xf32>
    %170 = vector.shape_cast %169 : vector<1x4x8x32xf32> to vector<4x8x32xf32>
    %171 = tpu.concatenate %166, %168, %170 in 2 : vector<4x8x32xf32>, vector<4x8x32xf32>, vector<4x8x32xf32> -> vector<4x8x96xf32>
    %c2_105 = arith.constant 2 : index
    %c0_106 = arith.constant 0 : index
    %c0_107 = arith.constant 0 : index
    %c0_108 = arith.constant 0 : index
    %172 = vector.load %arg15[%c2_105, %c0_106, %c0_107, %c0_108] : memref<7x4x8x32xf32, #tpu.memory_space<vmem>>, vector<1x4x8x32xf32>
    %173 = vector.shape_cast %172 : vector<1x4x8x32xf32> to vector<4x8x32xf32>
    %c3_109 = arith.constant 3 : index
    %c0_110 = arith.constant 0 : index
    %c0_111 = arith.constant 0 : index
    %c0_112 = arith.constant 0 : index
    %174 = vector.load %arg15[%c3_109, %c0_110, %c0_111, %c0_112] : memref<7x4x8x32xf32, #tpu.memory_space<vmem>>, vector<1x4x8x32xf32>
    %175 = vector.shape_cast %174 : vector<1x4x8x32xf32> to vector<4x8x32xf32>
    %c4_113 = arith.constant 4 : index
    %c0_114 = arith.constant 0 : index
    %c0_115 = arith.constant 0 : index
    %c0_116 = arith.constant 0 : index
    %176 = vector.load %arg15[%c4_113, %c0_114, %c0_115, %c0_116] : memref<7x4x8x32xf32, #tpu.memory_space<vmem>>, vector<1x4x8x32xf32>
    %177 = vector.shape_cast %176 : vector<1x4x8x32xf32> to vector<4x8x32xf32>
    %178 = tpu.concatenate %173, %175, %177 in 2 : vector<4x8x32xf32>, vector<4x8x32xf32>, vector<4x8x32xf32> -> vector<4x8x96xf32>
    %c3_117 = arith.constant 3 : index
    %c0_118 = arith.constant 0 : index
    %c0_119 = arith.constant 0 : index
    %c0_120 = arith.constant 0 : index
    %179 = vector.load %arg15[%c3_117, %c0_118, %c0_119, %c0_120] : memref<7x4x8x32xf32, #tpu.memory_space<vmem>>, vector<1x4x8x32xf32>
    %180 = vector.shape_cast %179 : vector<1x4x8x32xf32> to vector<4x8x32xf32>
    %c4_121 = arith.constant 4 : index
    %c0_122 = arith.constant 0 : index
    %c0_123 = arith.constant 0 : index
    %c0_124 = arith.constant 0 : index
    %181 = vector.load %arg15[%c4_121, %c0_122, %c0_123, %c0_124] : memref<7x4x8x32xf32, #tpu.memory_space<vmem>>, vector<1x4x8x32xf32>
    %182 = vector.shape_cast %181 : vector<1x4x8x32xf32> to vector<4x8x32xf32>
    %c5_125 = arith.constant 5 : index
    %c0_126 = arith.constant 0 : index
    %c0_127 = arith.constant 0 : index
    %c0_128 = arith.constant 0 : index
    %183 = vector.load %arg15[%c5_125, %c0_126, %c0_127, %c0_128] : memref<7x4x8x32xf32, #tpu.memory_space<vmem>>, vector<1x4x8x32xf32>
    %184 = vector.shape_cast %183 : vector<1x4x8x32xf32> to vector<4x8x32xf32>
    %185 = tpu.concatenate %180, %182, %184 in 2 : vector<4x8x32xf32>, vector<4x8x32xf32>, vector<4x8x32xf32> -> vector<4x8x96xf32>
    %186 = tpu.concatenate %164, %171, %178, %185 in 0 : vector<4x8x96xf32>, vector<4x8x96xf32>, vector<4x8x96xf32>, vector<4x8x96xf32> -> vector<16x8x96xf32>
    %187 = vector.shape_cast %186 : vector<16x8x96xf32> to vector<128x96xf32>
    %c0_129 = arith.constant 0 : index
    %c0_130 = arith.constant 0 : index
    %c0_131 = arith.constant 0 : index
    %188 = vector.load %arg4[%c0_129, %c0_130, %c0_131] : memref<3x96x64xf32, #tpu.memory_space<vmem>>, vector<1x96x64xf32>
    %189 = vector.shape_cast %188 : vector<1x96x64xf32> to vector<96x64xf32>
    %cst_132 = arith.constant dense<0.000000e+00> : vector<128x64xf32>
    %190 = tpu.matmul %187, %189, %cst_132 {dimension_numbers = #tpu.dot_dimension_numbers<[1], [0], [0], [1], [0, 0, 1, 1], [], []>} : vector<128x96xf32>, vector<96x64xf32>, vector<128x64xf32> -> vector<128x64xf32>
    %191 = vector.shape_cast %190 : vector<128x64xf32> to vector<4x4x8x64xf32>
    %192 = vector.extract_strided_slice %191 {offsets = [0, 0, 0, 0], sizes = [4, 4, 4, 64], strides = [1, 1, 1, 1]} : vector<4x4x8x64xf32> to vector<4x4x4x64xf32>
    %c1_133 = arith.constant 1 : index
    %c0_134 = arith.constant 0 : index
    %c0_135 = arith.constant 0 : index
    %193 = vector.load %arg4[%c1_133, %c0_134, %c0_135] : memref<3x96x64xf32, #tpu.memory_space<vmem>>, vector<1x96x64xf32>
    %194 = vector.shape_cast %193 : vector<1x96x64xf32> to vector<96x64xf32>
    %cst_136 = arith.constant dense<0.000000e+00> : vector<128x64xf32>
    %195 = tpu.matmul %187, %194, %cst_136 {dimension_numbers = #tpu.dot_dimension_numbers<[1], [0], [0], [1], [0, 0, 1, 1], [], []>} : vector<128x96xf32>, vector<96x64xf32>, vector<128x64xf32> -> vector<128x64xf32>
    %196 = vector.shape_cast %195 : vector<128x64xf32> to vector<4x4x8x64xf32>
    %197 = vector.extract_strided_slice %196 {offsets = [0, 0, 1, 0], sizes = [4, 4, 4, 64], strides = [1, 1, 1, 1]} : vector<4x4x8x64xf32> to vector<4x4x4x64xf32>
    %198 = arith.addf %192, %197 : vector<4x4x4x64xf32>
    %c2_137 = arith.constant 2 : index
    %c0_138 = arith.constant 0 : index
    %c0_139 = arith.constant 0 : index
    %199 = vector.load %arg4[%c2_137, %c0_138, %c0_139] : memref<3x96x64xf32, #tpu.memory_space<vmem>>, vector<1x96x64xf32>
    %200 = vector.shape_cast %199 : vector<1x96x64xf32> to vector<96x64xf32>
    %cst_140 = arith.constant dense<0.000000e+00> : vector<128x64xf32>
    %201 = tpu.matmul %187, %200, %cst_140 {dimension_numbers = #tpu.dot_dimension_numbers<[1], [0], [0], [1], [0, 0, 1, 1], [], []>} : vector<128x96xf32>, vector<96x64xf32>, vector<128x64xf32> -> vector<128x64xf32>
    %202 = vector.shape_cast %201 : vector<128x64xf32> to vector<4x4x8x64xf32>
    %203 = vector.extract_strided_slice %202 {offsets = [0, 0, 2, 0], sizes = [4, 4, 4, 64], strides = [1, 1, 1, 1]} : vector<4x4x8x64xf32> to vector<4x4x4x64xf32>
    %204 = arith.addf %198, %203 : vector<4x4x4x64xf32>
    %205 = vector.extract_strided_slice %204 {offsets = [0, 0, 0, 0], sizes = [1, 4, 4, 64], strides = [1, 1, 1, 1]} : vector<4x4x4x64xf32> to vector<1x4x4x64xf32>
    %206 = vector.shape_cast %205 : vector<1x4x4x64xf32> to vector<4x4x64xf32>
    %207 = vector.extract_strided_slice %204 {offsets = [1, 0, 0, 0], sizes = [1, 4, 4, 64], strides = [1, 1, 1, 1]} : vector<4x4x4x64xf32> to vector<1x4x4x64xf32>
    %208 = vector.shape_cast %207 : vector<1x4x4x64xf32> to vector<4x4x64xf32>
    %209 = arith.maximumf %206, %208 : vector<4x4x64xf32>
    %210 = vector.extract_strided_slice %209 {offsets = [0, 0, 0], sizes = [4, 1, 64], strides = [1, 1, 1]} : vector<4x4x64xf32> to vector<4x1x64xf32>
    %211 = vector.shape_cast %210 : vector<4x1x64xf32> to vector<4x64xf32>
    %212 = vector.extract_strided_slice %209 {offsets = [0, 1, 0], sizes = [4, 1, 64], strides = [1, 1, 1]} : vector<4x4x64xf32> to vector<4x1x64xf32>
    %213 = vector.shape_cast %212 : vector<4x1x64xf32> to vector<4x64xf32>
    %214 = arith.maximumf %211, %213 : vector<4x64xf32>
    %215 = vector.extract_strided_slice %209 {offsets = [0, 2, 0], sizes = [4, 1, 64], strides = [1, 1, 1]} : vector<4x4x64xf32> to vector<4x1x64xf32>
    %216 = vector.shape_cast %215 : vector<4x1x64xf32> to vector<4x64xf32>
    %217 = vector.extract_strided_slice %209 {offsets = [0, 3, 0], sizes = [4, 1, 64], strides = [1, 1, 1]} : vector<4x4x64xf32> to vector<4x1x64xf32>
    %218 = vector.shape_cast %217 : vector<4x1x64xf32> to vector<4x64xf32>
    %219 = arith.maximumf %216, %218 : vector<4x64xf32>
    %220 = vector.extract_strided_slice %204 {offsets = [2, 0, 0, 0], sizes = [1, 4, 4, 64], strides = [1, 1, 1, 1]} : vector<4x4x4x64xf32> to vector<1x4x4x64xf32>
    %221 = vector.shape_cast %220 : vector<1x4x4x64xf32> to vector<4x4x64xf32>
    %222 = vector.extract_strided_slice %204 {offsets = [3, 0, 0, 0], sizes = [1, 4, 4, 64], strides = [1, 1, 1, 1]} : vector<4x4x4x64xf32> to vector<1x4x4x64xf32>
    %223 = vector.shape_cast %222 : vector<1x4x4x64xf32> to vector<4x4x64xf32>
    %224 = arith.maximumf %221, %223 : vector<4x4x64xf32>
    %225 = vector.extract_strided_slice %224 {offsets = [0, 0, 0], sizes = [4, 1, 64], strides = [1, 1, 1]} : vector<4x4x64xf32> to vector<4x1x64xf32>
    %226 = vector.shape_cast %225 : vector<4x1x64xf32> to vector<4x64xf32>
    %227 = vector.extract_strided_slice %224 {offsets = [0, 1, 0], sizes = [4, 1, 64], strides = [1, 1, 1]} : vector<4x4x64xf32> to vector<4x1x64xf32>
    %228 = vector.shape_cast %227 : vector<4x1x64xf32> to vector<4x64xf32>
    %229 = arith.maximumf %226, %228 : vector<4x64xf32>
    %230 = vector.extract_strided_slice %224 {offsets = [0, 2, 0], sizes = [4, 1, 64], strides = [1, 1, 1]} : vector<4x4x64xf32> to vector<4x1x64xf32>
    %231 = vector.shape_cast %230 : vector<4x1x64xf32> to vector<4x64xf32>
    %232 = vector.extract_strided_slice %224 {offsets = [0, 3, 0], sizes = [4, 1, 64], strides = [1, 1, 1]} : vector<4x4x64xf32> to vector<4x1x64xf32>
    %233 = vector.shape_cast %232 : vector<4x1x64xf32> to vector<4x64xf32>
    %234 = arith.maximumf %231, %233 : vector<4x64xf32>
    %235 = tpu.concatenate %214, %219, %229, %234 in 1 : vector<4x64xf32>, vector<4x64xf32>, vector<4x64xf32>, vector<4x64xf32> -> vector<4x256xf32>
    %c0_141 = arith.constant 0 : index
    %c0_142 = arith.constant 0 : index
    %236 = vector.load %arg5[%c0_141, %c0_142] : memref<1x256xf32, #tpu.memory_space<vmem>>, vector<1x256xf32>
    %237 = vector.broadcast %236 : vector<1x256xf32> to vector<4x256xf32>
    %238 = arith.addf %235, %237 : vector<4x256xf32>
    %cst_143 = arith.constant 0.000000e+00 : f32
    %239 = vector.broadcast %cst_143 : f32 to vector<4x256xf32>
    %240 = arith.maximumf %238, %239 : vector<4x256xf32>
    %c0_144 = arith.constant 0 : index
    %c0_145 = arith.constant 0 : index
    %241 = vector.load %arg8[%c0_144, %c0_145] : memref<256x512xf32, #tpu.memory_space<vmem>>, vector<256x512xf32>
    %cst_146 = arith.constant dense<0.000000e+00> : vector<4x512xf32>
    %242 = tpu.matmul %240, %241, %cst_146 {dimension_numbers = #tpu.dot_dimension_numbers<[1], [0], [0], [1], [0, 0, 1, 1], [], []>} : vector<4x256xf32>, vector<256x512xf32>, vector<4x512xf32> -> vector<4x512xf32>
    %c0_147 = arith.constant 0 : index
    %c0_148 = arith.constant 0 : index
    %243 = vector.load %arg9[%c0_147, %c0_148] : memref<1x512xf32, #tpu.memory_space<vmem>>, vector<1x512xf32>
    %244 = vector.broadcast %243 : vector<1x512xf32> to vector<4x512xf32>
    %245 = arith.addf %242, %244 : vector<4x512xf32>
    %cst_149 = arith.constant 0.000000e+00 : f32
    %246 = vector.broadcast %cst_149 : f32 to vector<4x512xf32>
    %247 = arith.maximumf %245, %246 : vector<4x512xf32>
    %c0_150 = arith.constant 0 : index
    %c0_151 = arith.constant 0 : index
    %248 = vector.load %arg10[%c0_150, %c0_151] : memref<512x256xf32, #tpu.memory_space<vmem>>, vector<512x256xf32>
    %cst_152 = arith.constant dense<0.000000e+00> : vector<4x256xf32>
    %249 = tpu.matmul %247, %248, %cst_152 {dimension_numbers = #tpu.dot_dimension_numbers<[1], [0], [0], [1], [0, 0, 1, 1], [], []>} : vector<4x512xf32>, vector<512x256xf32>, vector<4x256xf32> -> vector<4x256xf32>
    %c0_153 = arith.constant 0 : index
    %c0_154 = arith.constant 0 : index
    %250 = vector.load %arg11[%c0_153, %c0_154] : memref<1x256xf32, #tpu.memory_space<vmem>>, vector<1x256xf32>
    %251 = vector.broadcast %250 : vector<1x256xf32> to vector<4x256xf32>
    %252 = arith.addf %249, %251 : vector<4x256xf32>
    %cst_155 = arith.constant 0.000000e+00 : f32
    %253 = vector.broadcast %cst_155 : f32 to vector<4x256xf32>
    %254 = arith.maximumf %252, %253 : vector<4x256xf32>
    %c0_156 = arith.constant 0 : index
    %c0_157 = arith.constant 0 : index
    %255 = vector.load %arg12[%c0_156, %c0_157] : memref<256x128xf32, #tpu.memory_space<vmem>>, vector<256x128xf32>
    %cst_158 = arith.constant dense<0.000000e+00> : vector<4x128xf32>
    %256 = tpu.matmul %254, %255, %cst_158 {dimension_numbers = #tpu.dot_dimension_numbers<[1], [0], [0], [1], [0, 0, 1, 1], [], []>} : vector<4x256xf32>, vector<256x128xf32>, vector<4x128xf32> -> vector<4x128xf32>
    %c0_159 = arith.constant 0 : index
    %c0_160 = arith.constant 0 : index
    %257 = vector.load %arg13[%c0_159, %c0_160] : memref<1x128xf32, #tpu.memory_space<vmem>>, vector<1x128xf32>
    %258 = vector.broadcast %257 : vector<1x128xf32> to vector<4x128xf32>
    %259 = arith.addf %256, %258 : vector<4x128xf32>
    %c0_161 = arith.constant 0 : index
    %c0_162 = arith.constant 0 : index
    %c0_163 = arith.constant 0 : index
    %260 = vector.load %arg14[%c0_161, %c0_162, %c0_163] : memref<1x4x128xf32, #tpu.memory_space<vmem>>, vector<1x4x128xf32>
    %261 = vector.shape_cast %260 : vector<1x4x128xf32> to vector<4x128xf32>
    %262 = vector.shape_cast %259 : vector<4x128xf32> to vector<1x4x128xf32>
    tpu.vector_store %arg14[%c0_161, %c0_162, %c0_163], %262 {strides = array<i32>} : memref<1x4x128xf32, #tpu.memory_space<vmem>>, vector<1x4x128xf32>,
    return
  }
  func.func @transform_0(%arg0: i32) -> (i32, i32, i32, i32) {
    %c0_i32 = arith.constant 0 : i32
    %c0_i32_0 = arith.constant 0 : i32
    %c0_i32_1 = arith.constant 0 : i32
    %c0_i32_2 = arith.constant 0 : i32
    return %arg0, %c0_i32, %c0_i32_0, %c0_i32_1 : i32, i32, i32, i32
  }
  func.func @transform_1(%arg0: i32) -> (i32, i32) {
    %c0_i32 = arith.constant 0 : i32
    %c0_i32_0 = arith.constant 0 : i32
    %c0_i32_1 = arith.constant 0 : i32
    return %c0_i32, %c0_i32_0 : i32, i32
  }
  func.func @transform_2(%arg0: i32) -> (i32, i32) {
    %c0_i32 = arith.constant 0 : i32
    %c0_i32_0 = arith.constant 0 : i32
    %c0_i32_1 = arith.constant 0 : i32
    return %c0_i32, %c0_i32_0 : i32, i32
  }
  func.func @transform_3(%arg0: i32) -> (i32, i32, i32) {
    %c0_i32 = arith.constant 0 : i32
    %c0_i32_0 = arith.constant 0 : i32
    %c0_i32_1 = arith.constant 0 : i32
    %c0_i32_2 = arith.constant 0 : i32
    return %c0_i32, %c0_i32_0, %c0_i32_1 : i32, i32, i32
  }
  func.func @transform_4(%arg0: i32) -> (i32, i32) {
    %c0_i32 = arith.constant 0 : i32
    %c0_i32_0 = arith.constant 0 : i32
    %c0_i32_1 = arith.constant 0 : i32
    return %c0_i32, %c0_i32_0 : i32, i32
  }
  func.func @transform_5(%arg0: i32) -> (i32, i32) {
    %c0_i32 = arith.constant 0 : i32
    %c0_i32_0 = arith.constant 0 : i32
    %c0_i32_1 = arith.constant 0 : i32
    return %c0_i32, %c0_i32_0 : i32, i32
  }
  func.func @transform_6(%arg0: i32) -> (i32, i32) {
    %c0_i32 = arith.constant 0 : i32
    %c0_i32_0 = arith.constant 0 : i32
    %c0_i32_1 = arith.constant 0 : i32
    return %c0_i32, %c0_i32_0 : i32, i32
  }
  func.func @transform_7(%arg0: i32) -> (i32, i32) {
    %c0_i32 = arith.constant 0 : i32
    %c0_i32_0 = arith.constant 0 : i32
    %c0_i32_1 = arith.constant 0 : i32
    return %c0_i32, %c0_i32_0 : i32, i32
  }
  func.func @transform_8(%arg0: i32) -> (i32, i32) {
    %c0_i32 = arith.constant 0 : i32
    %c0_i32_0 = arith.constant 0 : i32
    %c0_i32_1 = arith.constant 0 : i32
    return %c0_i32, %c0_i32_0 : i32, i32
  }
  func.func @transform_9(%arg0: i32) -> (i32, i32) {
    %c0_i32 = arith.constant 0 : i32
    %c0_i32_0 = arith.constant 0 : i32
    %c0_i32_1 = arith.constant 0 : i32
    return %c0_i32, %c0_i32_0 : i32, i32
  }
  func.func @transform_10(%arg0: i32) -> (i32, i32) {
    %c0_i32 = arith.constant 0 : i32
    %c0_i32_0 = arith.constant 0 : i32
    %c0_i32_1 = arith.constant 0 : i32
    return %c0_i32, %c0_i32_0 : i32, i32
  }
  func.func @transform_11(%arg0: i32) -> (i32, i32) {
    %c0_i32 = arith.constant 0 : i32
    %c0_i32_0 = arith.constant 0 : i32
    %c0_i32_1 = arith.constant 0 : i32
    return %c0_i32, %c0_i32_0 : i32, i32
  }
  func.func @transform_12(%arg0: i32) -> (i32, i32) {
    %c0_i32 = arith.constant 0 : i32
    %c0_i32_0 = arith.constant 0 : i32
    %c0_i32_1 = arith.constant 0 : i32
    return %c0_i32, %c0_i32_0 : i32, i32
  }
  func.func @transform_13(%arg0: i32) -> (i32, i32, i32) {
    %c0_i32 = arith.constant 0 : i32
    %c0_i32_0 = arith.constant 0 : i32
    %c0_i32_1 = arith.constant 0 : i32
    return %arg0, %c0_i32, %c0_i32_0 : i32, i32, i32
  }
}

</mosaic_0001>

<bundles_post_ra>
// kernel: cnn150_forward.1
= control target key start
LH: loop header
LB: loop body
LE: loop exit
PB: predicated region body
PF: predicated region fallthrough
CT: control target
= control target key end

     0   :  { %s9307_s0 = inlined_call_operand.vmem [shape: f32[8,14,16,27], index: 0, kind: input, shape index: {}]   ;;  %s9308_s1 = inlined_call_operand.vmem [shape: f32[27,32], index: 1, kind: input, shape index: {}]   ;;  %s9309_s2 = inlined_call_operand.vmem [shape: f32[1,32], index: 2, kind: input, shape index: {}]   ;;  %s9310_s3 = inlined_call_operand.vmem [shape: f32[3,96,64], index: 3, kind: input, shape index: {}]   ;;  %s9311_s4 = inlined_call_operand.vmem [shape: f32[1,256], index: 4, kind: input, shape index: {}]   ;;  %s9312_s5 = inlined_call_operand.vmem [shape: f32[32,64], index: 5, kind: input, shape index: {}]   ;;  %s9313_s6 = inlined_call_operand.vmem [shape: f32[32,64], index: 6, kind: input, shape index: {}]   ;;  %s9314_s7 = inlined_call_operand.vmem [shape: f32[256,512], index: 7, kind: input, shape index: {}]   ;;  %s9315_s8 = inlined_call_operand.vmem [shape: f32[1,512], index: 8, kind: input, shape index: {}]   ;;  %s9316_s9 = inlined_call_operand.vmem [shape: f32[512,256], index: 9, kind: input, shape index: {}]   ;;  %s9317_s10 = inlined_call_operand.vmem [shape: f32[1,256], index: 10, kind: input, shape index: {}]   ;;  %s9318_s11 = inlined_call_operand.vmem [shape: f32[256,128], index: 11, kind: input, shape index: {}]   ;;  %s9319_s12 = inlined_call_operand.vmem [shape: f32[1,128], index: 12, kind: input, shape index: {}]   ;;  %s9320_s13 = inlined_call_operand.hbm [shape: f32[2,4,128], index: 13, kind: output, shape index: {}]  }
   0x1   :  { %9323 = sst [smem:[#allocation7_spill]] %s9307_s0 }
   0x2   :  { %9324 = sst [smem:[#allocation8_spill]] %s9308_s1 }
   0x3   :  { %9325 = sst [smem:[#allocation9_spill]] %s9309_s2 }
   0x4   :  { %18 = vsyncpa [#allocation4], 0 }
   0x5   :  { %20 = vsyncpa [#allocation4 + $0x1], 0  ;;  %s7321_s25 = smov 0   ;;  %s7323_s26 = smov 0  }
   0x6   :  { %s7325_s27 = smov 0   ;;  %s7327_s28 = smov 0  }
   0x7 LB: > { %s7342_s29 = sadd.s32 4294967295, %s7245_s28   ;;  %s5013_s30 = sadd.s32 4294967294, %s7245_s28   ;;  %s7245_s28 = sphi %s7327_s28, %s9339_s28   ;;  %s7241_s27 = sphi %s7325_s27, %s9338_s27   ;;  %s7237_s26 = sphi %s7323_s26, %s9337_s26   ;;  %s7233_s25 = sphi %s7321_s25, %s9336_s25  }
   0x8   : > { %s7346_s14 = sadd.s32 1, %s7245_s28   ;;  %s311_s15 = sadd.s32 1, %s7241_s27 }
   0x9   : > { %s308_s16 = ssub.s32 %s7245_s28, %s7346_s14  ;;  %p321_p0 = scmp.ne.s32.totalorder %s7241_s27, %s7237_s26 }
   0xa   : > { %p309_p1 = scmp.eq.s32.totalorder %s308_s16, 0  ;;  %p322_p2 = scmp.eq.s32.totalorder %s7342_s29, 1 }
   0xb   : > { %p327_p3 = scmp.ne.s32.totalorder %s7237_s26, %s7233_s25  ;;  %p328_p4 = scmp.eq.s32.totalorder %s5013_s30, 1 }
   0xc   : > { %s7357_s17 = scalar_select %p309_p1, %s7241_s27, %s311_s15  }
   0xd   : > { %p7359_p5 = por %p322_p2, %p321_p0  ;;  %p7363_p6 = por %p328_p4, %p327_p3 }
   0xe   : > { %9326 = sst [smem:[#allocation6_spill]] %s7357_s17  ;;  %p5016_p7 = scmp.ge.s32.totalorder %s7245_s28, 1 }
   0xf   : > { %p392_p8 = scmp.lt.s32.totalorder %s7245_s28, 3 }
  0x11   : > { %p393_p9 = pnand %p5016_p7, %p392_p8 }
  0x12   : > { %s9329_s1 = sld [smem:[#allocation8_spill]] (!%p393_p9)  ;;  %vm522_vm0 = vcmask (!%p393_p9), 1042432   ;;  %s5018_s15 = sshll.u32 (!%p393_p9), %s7342_s29, 2  ;;  %vm7247_vm1 = vmmov (!%p393_p9), 1   ;;  %vm473_vm3 = vcmask (!%p393_p9), 220160   ;;  %v7438_v23 = vld [vmem:[%s9312_s5] sm:$0xff] (!%p393_p9) }
  0x13   : > { %396 = sbr.rel (%p393_p9) target bundleno = 2174 (0x87e), region = 72  ;;  %p438_p10 = scmp.lt.s32.totalorder (!%p393_p9), %s5018_s15, 7  ;;  %vm7386_vm2 = vmpackc.low (!%p393_p9), %vm522_vm0, %vm7247_vm1  ;;  %vm679_vm4 = vcmask (!%p393_p9), 523264   ;;  %v7445_v24 = vld [vmem:[%s9313_s6] sm:$0xff] (!%p393_p9)  ;;  %v7452_v53 = vld [vmem:[%s9312_s5 + $0x8] sm:$0xff] (!%p393_p9)  ;;  %vm892_vm5 = vcmask (!%p393_p9), 261120  }
  0x14   : > { %s9332_s0 = sld [smem:[#allocation7_spill]] (!%p393_p9)  ;;  %5866 = vmatprep.mubr.msk.f32.mxu1 (!%p393_p9), %vm679_vm4, %v7445_v24  ;;  %v7457_v54 = vld [vmem:[%s9313_s6 + $0x8] sm:$0xff] (!%p393_p9)  ;;  %v7463_v55 = vld [vmem:[%s9312_s5 + $0x10] sm:$0xff] (!%p393_p9)  ;;  %v7480_v57 = vld [vmem:[%s9312_s5 + $0x18] sm:$0xff] (!%p393_p9)  ;;  %s9333_s2 = sld [smem:[#allocation9_spill]] (!%p393_p9)  ;;  %vm3511_vm6 = vcmask (!%p393_p9), 785408  }
  0x15   : > { %v7468_v56 = vld [vmem:[%s9313_s6 + $0x10] sm:$0xff] (!%p393_p9)  ;;  %v7485_v58 = vld [vmem:[%s9313_s6 + $0x18] sm:$0xff] (!%p393_p9)  ;;  %s7248_s17 = smov (!%p393_p9), 32   ;;  %vm4194_vm7 = vcmask (!%p393_p9), 1041409   ;;  %vm4197_vm8 = vcmask (!%p393_p9), 1042434   ;;  %vm4200_vm9 = vcmask (!%p393_p9), 1043459  }
  0x18   : > { %v444_v0 = vld [vmem:[%s9329_s1] sm:$0xff] (!%p393_p9)  ;;  %v445_v1 = vld [vmem:[%s9329_s1 + $0x8] sm:$0xff] (!%p393_p9)  ;;  %v446_v2 = vld [vmem:[%s9329_s1 + $0x10] sm:$0xff] (!%p393_p9) }
  0x19   : > { %v7379_v3 = vpack.c.bf16 (!%p393_p9), %v445_v1, %v444_v0  ;;  %v447_v4 = vld [vmem:[%s9329_s1 + $0x18] sm:$0x7] (!%p393_p9) }
  0x1a   : > { %v7384_v5 = vpack.c.bf16 %v447_v4, %v446_v2  ;;  %s9341_s15 = smov (!%p438_p10, %s5018_s15), 7 }
  0x1b   : > { %6473 = vmatprep.subr.bf16.mxu0 %v7379_v3  ;;  %s7130_s20 = smul.u32 224, %s9341_s15 }
  0x1c   : > { %6475 = vmatpush3.bf16.msra.mxu0 %v7379_v3 }
  0x1d   : > { %6478 = vmatprep.subr.msk.bf16.mxu0 %vm7386_vm2, %v7384_v5  ;;  %s7398_s22 = scalar_lea.vmem %s9332_s0, %s7130_s20  ;;  %s434_s0 = sand.u32 1, %s7237_s26  }
  0x1e   : > { %v457_v7 = vld [vmem:[%s7398_s22] sm:$0xff]  ;;  %v458_v8 = vld [vmem:[%s7398_s22 + $0x8] sm:$0xff]  ;;  %v459_v9 = vld [vmem:[%s7398_s22 + $0x10] sm:$0xff]  ;;  %s5017_s23 = sshll.u32 %s434_s0, 2 }
  0x1f   : > { %5804 = vmatprep.mubr.msk.f32.mxu0 %vm473_vm3, %v457_v7  ;;  %v460_v10 = vld [vmem:[%s7398_s22 + $0x18] sm:$0xff]  ;;  %v461_v11 = vld [vmem:[%s7398_s22 + $0xe0] sm:$0xff]  ;;  %v462_v12 = vld [vmem:[%s7398_s22 + $0xe8] sm:$0xff]  ;;  %s436_s15 = scalar_lea.vmem [#allocation3], %s5017_s23 }
  0x20   : > { %6481 = vmatpush3.bf16.msk.msra.mxu0 %vm7386_vm2, %v7384_v5  ;;  %v463_v13 = vld [vmem:[%s7398_s22 + $0xf0] sm:$0xff]  ;;  %v464_v14 = vld [vmem:[%s7398_s22 + $0xf8] sm:$0xff]  ;;  %v465_v15 = vld [vmem:[%s7398_s22 + $0x1c0] sm:$0xff] }
  0x21   : > { %v466_v16 = vld [vmem:[%s7398_s22 + $0x1c8] sm:$0xff]  ;;  %v467_v17 = vld [vmem:[%s7398_s22 + $0x1d0] sm:$0xff]  ;;  %v468_v18 = vld [vmem:[%s7398_s22 + $0x1d8] sm:$0xff] }
  0x22   : > { %v469_v19 = vld [vmem:[%s7398_s22 + $0x2a0] sm:$0xff]  ;;  %v470_v20 = vld [vmem:[%s7398_s22 + $0x2a8] sm:$0xff]  ;;  %v471_v21 = vld [vmem:[%s7398_s22 + $0x2b0] sm:$0xff] }
  0x23   : > { %5805 = vmatmul.mubr.msk.f32.vlgmr.msra.gmra.mrb[0].mxu0 %vm473_vm3, %v458_v8  ;;  %v472_v22 = vld [vmem:[%s7398_s22 + $0x2b8] sm:$0xff]  ;;  %v5046_v59 = vld [vmem:[%s7398_s22 + $0x20] sm:$0xff]  ;;  %v5047_v60 = vld [vmem:[%s7398_s22 + $0x28] sm:$0xff] }
  0x24   : > { %5807 = vmatprep.mubr.msk.f32.mxu0 %vm473_vm3, %v459_v9  ;;  %v5048_v61 = vld [vmem:[%s7398_s22 + $0x30] sm:$0xff]  ;;  %v5049_v62 = vld [vmem:[%s7398_s22 + $0x38] sm:$0xff]  ;;  %v5050_v63 = vld [vmem:[%s7398_s22 + $0x100] sm:$0xff] }
  0x25   : > { %v5051_v0 = vld [vmem:[%s7398_s22 + $0x108] sm:$0xff]  ;;  %v5052_v1 = vld [vmem:[%s7398_s22 + $0x110] sm:$0xff]  ;;  %v5053_v2 = vld [vmem:[%s7398_s22 + $0x118] sm:$0xff] }
  0x26   : > { %v5054_v4 = vld [vmem:[%s7398_s22 + $0x1e0] sm:$0xff]  ;;  %v5055_v7 = vld [vmem:[%s7398_s22 + $0x1e8] sm:$0xff]  ;;  %v5056_v8 = vld [vmem:[%s7398_s22 + $0x1f0] sm:$0xff] }
  0x27   : > { %5808 = vmatmul.mubr.msk.f32.gmra.mrb[2].mxu0 %vm473_vm3, %v460_v10  ;;  %v5057_v9 = vld [vmem:[%s7398_s22 + $0x1f8] sm:$0xff]  ;;  %v5058_v10 = vld [vmem:[%s7398_s22 + $0x2c0] sm:$0xff] }
  0x28   : > { %5810 = vmatprep.mubr.msk.f32.mxu0 %vm473_vm3, %v461_v11  ;;  %v5059_v11 = vld [vmem:[%s7398_s22 + $0x2c8] sm:$0xff]  ;;  %v5222_v6 = vld [vmem:[%s7398_s22 + $0x340] sm:$0xff] }
  0x2b   : > { %5811 = vmatmul.mubr.msk.f32.gmra.mrb[4].mxu0 %vm473_vm3, %v462_v12  ;;  %v5060_v12 = vld [vmem:[%s7398_s22 + $0x2d0] sm:$0xff] }
  0x2c   : > { %5813 = vmatprep.mubr.msk.f32.mxu0 %vm473_vm3, %v463_v13  ;;  %v5061_v13 = vld [vmem:[%s7398_s22 + $0x2d8] sm:$0xff] }
  0x2f   : > { %5814 = vmatmul.mubr.msk.f32.gmra.mrb[6].mxu0 %vm473_vm3, %v464_v14  ;;  %v5087_v14 = vld [vmem:[%s7398_s22 + $0x40] sm:$0xff] }
  0x30   : > { %5816 = vmatprep.mubr.msk.f32.mxu0 %vm473_vm3, %v465_v15  ;;  %v5088_v15 = vld [vmem:[%s7398_s22 + $0x48] sm:$0xff] }
  0x33   : > { %5817 = vmatmul.mubr.msk.f32.gmra.mrb[8].mxu0 %vm473_vm3, %v466_v16  ;;  %v5089_v16 = vld [vmem:[%s7398_s22 + $0x50] sm:$0xff] }
  0x34   : > { %5819 = vmatprep.mubr.msk.f32.mxu0 %vm473_vm3, %v467_v17  ;;  %v5090_v17 = vld [vmem:[%s7398_s22 + $0x58] sm:$0xff] }
  0x37   : > { %5820 = vmatmul.mubr.msk.f32.gmra.mrb[10].mxu0 %vm473_vm3, %v468_v18  ;;  %v5091_v18 = vld [vmem:[%s7398_s22 + $0x120] sm:$0xff] }
  0x38   : > { %5822 = vmatprep.mubr.msk.f32.mxu0 %vm473_vm3, %v469_v19  ;;  %v5092_v19 = vld [vmem:[%s7398_s22 + $0x128] sm:$0xff] }
  0x3b   : > { %5823 = vmatmul.mubr.msk.f32.gmra.mrb[12].mxu0 %vm473_vm3, %v470_v20  ;;  %v5093_v20 = vld [vmem:[%s7398_s22 + $0x130] sm:$0xff] }
  0x3c   : > { %5825 = vmatprep.mubr.msk.f32.mxu0 %vm473_vm3, %v471_v21  ;;  %v5094_v21 = vld [vmem:[%s7398_s22 + $0x138] sm:$0xff] }
  0x3f   : > { %5826 = vmatmul.mubr.msk.f32.gmra.mrb[14].mxu0 %vm473_vm3, %v472_v22  ;;  %v5095_v22 = vld [vmem:[%s7398_s22 + $0x200] sm:$0xff] }
  0x40   : > { %5844 = vmatprep.mubr.msk.f32.mxu0 %vm679_vm4, %v7438_v23 }
  0xf6   : > { %v5806_v25 = vpop.f32.mrb[0].mxu0 }
  0xf7   : > { %v592_v26 = vpop.f32.mrb[1].mxu0 }
  0xfa   : > { %v5809_v27 = vpop.f32.mrb[2].mxu0 }
  0xfb   : > { %v672_v28 = vmax.f32 %v5806_v25, %v5809_v27  ;;  %v602_v29 = vpop.f32.mrb[3].mxu0  ;;  %v5096_v25 = vld [vmem:[%s7398_s22 + $0x208] sm:$0xff]  ;;  %v5098_v27 = vld [vmem:[%s7398_s22 + $0x218] sm:$0xff] }
  0xfc   : > { %v671_v30 = vmax.f32 %v592_v26, %v602_v29  ;;  %v5097_v26 = vld [vmem:[%s7398_s22 + $0x210] sm:$0xff]  ;;  %v5100_v29 = vld [vmem:[%s7398_s22 + $0x2e8] sm:$0xff] }
  0xfe   : > { %v6482_v31 = vpack.c.bf16 %v672_v28, %v671_v30  ;;  %v5812_v32 = vpop.f32.mrb[4].mxu0  ;;  %v5099_v28 = vld [vmem:[%s7398_s22 + $0x2e0] sm:$0xff]  ;;  %v5101_v30 = vld [vmem:[%s7398_s22 + $0x2f0] sm:$0xff] }
  0xff   : > { %v612_v33 = vpop.f32.mrb[5].mxu0 }
 0x100   : > { %6483 = vmatprep.subr.bf16.mxu0 %v6482_v31  ;;  %6499 = vmatprep.subr.bf16.mxu1 %v6482_v31 }
 0x101   : > { %6485 = vmatpush3.bf16.msra.mxu0 %v6482_v31  ;;  %6501 = vmatpush3.bf16.msra.mxu1 %v6482_v31  ;;  %v5102_v31 = vld [vmem:[%s7398_s22 + $0x2f8] sm:$0xff] }
 0x102   : > { %v5815_v34 = vpop.f32.mrb[6].mxu0 }
 0x103   : > { %v674_v35 = vmax.f32 %v5812_v32, %v5815_v34  ;;  %v622_v36 = vpop.f32.mrb[7].mxu0  ;;  %v5128_v32 = vld [vmem:[%s7398_s22 + $0x60] sm:$0xff]  ;;  %v5130_v34 = vld [vmem:[%s7398_s22 + $0x70] sm:$0xff] }
 0x104   : > { %v673_v37 = vmax.f32 %v612_v33, %v622_v36  ;;  %v5129_v33 = vld [vmem:[%s7398_s22 + $0x68] sm:$0xff]  ;;  %v5132_v36 = vld [vmem:[%s7398_s22 + $0x140] sm:$0xff] }
 0x106   : > { %v6486_v38 = vpack.c.bf16 %v674_v35, %v673_v37  ;;  %v5818_v39 = vpop.f32.mrb[8].mxu0  ;;  %v5131_v35 = vld [vmem:[%s7398_s22 + $0x78] sm:$0xff]  ;;  %v5133_v37 = vld [vmem:[%s7398_s22 + $0x148] sm:$0xff] }
 0x107   : > { %v632_v40 = vpop.f32.mrb[9].mxu0 }
 0x108   : > { %6487 = vmatprep.subr.bf16.mxu0 %v6486_v38  ;;  %6503 = vmatprep.subr.bf16.mxu1 %v6486_v38 }
 0x109   : > { %6489 = vmatpush3.bf16.msra.mxu0 %v6486_v38  ;;  %6505 = vmatpush3.bf16.msra.mxu1 %v6486_v38  ;;  %v5134_v38 = vld [vmem:[%s7398_s22 + $0x150] sm:$0xff] }
 0x10a   : > { %v5821_v41 = vpop.f32.mrb[10].mxu0 }
 0x10b   : > { %v676_v42 = vmax.f32 %v5818_v39, %v5821_v41  ;;  %v642_v43 = vpop.f32.mrb[11].mxu0  ;;  %v5135_v39 = vld [vmem:[%s7398_s22 + $0x158] sm:$0xff]  ;;  %v5137_v41 = vld [vmem:[%s7398_s22 + $0x228] sm:$0xff] }
 0x10c   : > { %v675_v44 = vmax.f32 %v632_v40, %v642_v43  ;;  %v5136_v40 = vld [vmem:[%s7398_s22 + $0x220] sm:$0xff]  ;;  %v5139_v43 = vld [vmem:[%s7398_s22 + $0x238] sm:$0xff] }
 0x10e   : > { %v6490_v45 = vpack.c.bf16 %v676_v42, %v675_v44  ;;  %v5824_v46 = vpop.f32.mrb[12].mxu0  ;;  %v5138_v42 = vld [vmem:[%s7398_s22 + $0x230] sm:$0xff]  ;;  %v5140_v44 = vld [vmem:[%s7398_s22 + $0x300] sm:$0xff] }
 0x10f   : > { %v652_v47 = vpop.f32.mrb[13].mxu0 }
 0x110   : > { %6491 = vmatprep.subr.bf16.mxu0 %v6490_v45  ;;  %6507 = vmatprep.subr.bf16.mxu1 %v6490_v45 }
 0x111   : > { %6493 = vmatpush3.bf16.msra.mxu0 %v6490_v45  ;;  %6509 = vmatpush3.bf16.msra.mxu1 %v6490_v45  ;;  %v5141_v45 = vld [vmem:[%s7398_s22 + $0x308] sm:$0xff] }
 0x112   : > { %v5827_v48 = vpop.f32.mrb[14].mxu0 }
 0x113   : > { %v678_v49 = vmax.f32 %v5824_v46, %v5827_v48  ;;  %v662_v50 = vpop.f32.mrb[15].mxu0  ;;  %v5142_v46 = vld [vmem:[%s7398_s22 + $0x310] sm:$0xff]  ;;  %v5169_v48 = vld [vmem:[%s7398_s22 + $0x80] sm:$0xff] }
 0x114   : > { %v677_v51 = vmax.f32 %v652_v47, %v662_v50  ;;  %v5143_v47 = vld [vmem:[%s7398_s22 + $0x318] sm:$0xff]  ;;  %v5171_v50 = vld [vmem:[%s7398_s22 + $0x90] sm:$0xff] }
 0x116   : > { %v6494_v52 = vpack.c.bf16 %v678_v49, %v677_v51  ;;  %v5170_v49 = vld [vmem:[%s7398_s22 + $0x88] sm:$0xff]  ;;  %v5172_v51 = vld [vmem:[%s7398_s22 + $0x98] sm:$0xff] }
 0x118   : > { %6495 = vmatprep.subr.bf16.mxu0 %v6494_v52  ;;  %6511 = vmatprep.subr.bf16.mxu1 %v6494_v52 }
 0x119   : > { %6497 = vmatpush3.bf16.msra.mxu0 %v6494_v52  ;;  %6513 = vmatpush3.bf16.msra.mxu1 %v6494_v52  ;;  %v5173_v52 = vld [vmem:[%s7398_s22 + $0x160] sm:$0xff] }
 0x11a   : > { %6515 = vmatprep.subr.bf16.mxu0 %v7379_v3 }
 0x11c   : > { %5845 = vmatmul.mubr.msk.f32.vlgmr.msra.gmra.mrb[16].mxu0 %vm679_vm4, %v7452_v53  ;;  %5867 = vmatmul.mubr.msk.f32.vlgmr.msra.gmra.mrb[0].mxu1 %vm679_vm4, %v7457_v54 }
 0x11d   : > { %6517 = vmatpush3.bf16.msra.mxu0 %v7379_v3  ;;  %5847 = vmatprep.mubr.msk.f32.mxu0 %vm679_vm4, %v7463_v55 }
 0x11e   : > { %6520 = vmatprep.subr.msk.bf16.mxu0 %vm7386_vm2, %v7384_v5  ;;  %5869 = vmatprep.mubr.msk.f32.mxu1 %vm679_vm4, %v7468_v56 }
 0x120   : > { %5848 = vmatmul.mubr.msk.f32.gmra.mrb[18].mxu0 %vm679_vm4, %v7480_v57  ;;  %5870 = vmatmul.mubr.msk.f32.gmra.mrb[2].mxu1 %vm679_vm4, %v7485_v58 }
 0x121   : > { %6523 = vmatpush3.bf16.msk.msra.mxu0 %vm7386_vm2, %v7384_v5  ;;  %5880 = vmatprep.mubr.msk.f32.mxu0 %vm473_vm3, %v5046_v59  ;;  %v5174_v59 = vld [vmem:[%s7398_s22 + $0x168] sm:$0xff] }
 0x122   : > { %6557 = vmatprep.subr.bf16.mxu0 %v7379_v3  ;;  %5920 = vmatprep.mubr.msk.f32.mxu1 %vm679_vm4, %v7438_v23 }
 0x124   : > { %5881 = vmatmul.mubr.msk.f32.vlgmr.msra.gmra.mrb[20].mxu0 %vm473_vm3, %v5047_v60  ;;  %v5175_v60 = vld [vmem:[%s7398_s22 + $0x170] sm:$0xff] }
 0x125   : > { %5883 = vmatprep.mubr.msk.f32.mxu0 %vm473_vm3, %v5048_v61  ;;  %6559 = vmatpush3.bf16.msra.mxu0 %v7379_v3  ;;  %v5176_v61 = vld [vmem:[%s7398_s22 + $0x178] sm:$0xff] }
 0x126   : > { %6562 = vmatprep.subr.msk.bf16.mxu0 %vm7386_vm2, %v7384_v5 }
 0x128   : > { %5884 = vmatmul.mubr.msk.f32.gmra.mrb[22].mxu0 %vm473_vm3, %v5049_v62  ;;  %v5177_v62 = vld [vmem:[%s7398_s22 + $0x240] sm:$0xff] }
 0x129   : > { %5886 = vmatprep.mubr.msk.f32.mxu0 %vm473_vm3, %v5050_v63  ;;  %6565 = vmatpush3.bf16.msk.msra.mxu0 %vm7386_vm2, %v7384_v5  ;;  %v5178_v63 = vld [vmem:[%s7398_s22 + $0x248] sm:$0xff] }
 0x12a   : > { %6599 = vmatprep.subr.bf16.mxu0 %v7379_v3 }
 0x12c   : > { %5887 = vmatmul.mubr.msk.f32.gmra.mrb[24].mxu0 %vm473_vm3, %v5051_v0  ;;  %v5179_v0 = vld [vmem:[%s7398_s22 + $0x250] sm:$0xff] }
 0x12d   : > { %5889 = vmatprep.mubr.msk.f32.mxu0 %vm473_vm3, %v5052_v1  ;;  %v5180_v1 = vld [vmem:[%s7398_s22 + $0x258] sm:$0xff] }
 0x130   : > { %5890 = vmatmul.mubr.msk.f32.gmra.mrb[26].mxu0 %vm473_vm3, %v5053_v2  ;;  %v5181_v2 = vld [vmem:[%s7398_s22 + $0x320] sm:$0xff] }
 0x131   : > { %5892 = vmatprep.mubr.msk.f32.mxu0 %vm473_vm3, %v5054_v4  ;;  %v5182_v4 = vld [vmem:[%s7398_s22 + $0x328] sm:$0xff] }
 0x134   : > { %5893 = vmatmul.mubr.msk.f32.gmra.mrb[28].mxu0 %vm473_vm3, %v5055_v7  ;;  %v5183_v7 = vld [vmem:[%s7398_s22 + $0x330] sm:$0xff] }
 0x135   : > { %5895 = vmatprep.mubr.msk.f32.mxu0 %vm473_vm3, %v5056_v8  ;;  %v5184_v8 = vld [vmem:[%s7398_s22 + $0x338] sm:$0xff] }
 0x138   : > { %5896 = vmatmul.mubr.msk.f32.gmra.mrb[30].mxu0 %vm473_vm3, %v5057_v9  ;;  %v5210_v9 = vld [vmem:[%s7398_s22 + $0xa0] sm:$0xff] }
 0x139   : > { %5898 = vmatprep.mubr.msk.f32.mxu0 %vm473_vm3, %v5058_v10  ;;  %v5211_v10 = vld [vmem:[%s7398_s22 + $0xa8] sm:$0xff] }
 0x13c   : > { %5899 = vmatmul.mubr.msk.f32.gmra.mrb[32].mxu0 %vm473_vm3, %v5059_v11  ;;  %v5212_v11 = vld [vmem:[%s7398_s22 + $0xb0] sm:$0xff] }
 0x13d   : > { %5901 = vmatprep.mubr.msk.f32.mxu0 %vm473_vm3, %v5060_v12  ;;  %v5213_v12 = vld [vmem:[%s7398_s22 + $0xb8] sm:$0xff] }
 0x140   : > { %5902 = vmatmul.mubr.msk.f32.gmra.mrb[34].mxu0 %vm473_vm3, %v5061_v13  ;;  %v5214_v13 = vld [vmem:[%s7398_s22 + $0x180] sm:$0xff] }
 0x141   : > { %5956 = vmatprep.mubr.msk.f32.mxu0 %vm473_vm3, %v5087_v14  ;;  %v5215_v14 = vld [vmem:[%s7398_s22 + $0x188] sm:$0xff] }
 0x144   : > { %5957 = vmatmul.mubr.msk.f32.vlgmr.msra.gmra.mrb[36].mxu0 %vm473_vm3, %v5088_v15  ;;  %v5216_v15 = vld [vmem:[%s7398_s22 + $0x190] sm:$0xff] }
 0x145   : > { %5959 = vmatprep.mubr.msk.f32.mxu0 %vm473_vm3, %v5089_v16  ;;  %6601 = vmatpush3.bf16.msra.mxu0 %v7379_v3  ;;  %v5218_v16 = vld [vmem:[%s7398_s22 + $0x260] sm:$0xff] }
 0x146   : > { %6604 = vmatprep.subr.msk.bf16.mxu0 %vm7386_vm2, %v7384_v5 }
 0x148   : > { %5960 = vmatmul.mubr.msk.f32.gmra.mrb[38].mxu0 %vm473_vm3, %v5090_v17  ;;  %v5219_v17 = vld [vmem:[%s7398_s22 + $0x268] sm:$0xff] }
 0x149   : > { %5962 = vmatprep.mubr.msk.f32.mxu0 %vm473_vm3, %v5091_v18  ;;  %6607 = vmatpush3.bf16.msk.msra.mxu0 %vm7386_vm2, %v7384_v5  ;;  %v5220_v18 = vld [vmem:[%s7398_s22 + $0x270] sm:$0xff] }
 0x14a   : > { %6641 = vmatprep.subr.bf16.mxu0 %v7379_v3 }
 0x14c   : > { %5963 = vmatmul.mubr.msk.f32.gmra.mrb[40].mxu0 %vm473_vm3, %v5092_v19  ;;  %v5223_v19 = vld [vmem:[%s7398_s22 + $0x348] sm:$0xff] }
 0x14d   : > { %5965 = vmatprep.mubr.msk.f32.mxu0 %vm473_vm3, %v5093_v20  ;;  %v5224_v20 = vld [vmem:[%s7398_s22 + $0x350] sm:$0xff] }
 0x150   : > { %5966 = vmatmul.mubr.msk.f32.gmra.mrb[42].mxu0 %vm473_vm3, %v5094_v21  ;;  %v5225_v21 = vld [vmem:[%s7398_s22 + $0x358] sm:$0xff] }
 0x151   : > { %5968 = vmatprep.mubr.msk.f32.mxu0 %vm473_vm3, %v5095_v22 }
 0x154   : > { %5969 = vmatmul.mubr.msk.f32.gmra.mrb[44].mxu0 %vm473_vm3, %v5096_v25  ;;  %v7704_v25 = vld [vmem:[%s9333_s2] ss:$0 sm:$0xff] }
 0x155   : > { %5971 = vmatprep.mubr.msk.f32.mxu0 %vm473_vm3, %v5097_v26 }
 0x158   : > { %5972 = vmatmul.mubr.msk.f32.gmra.mrb[46].mxu0 %vm473_vm3, %v5098_v27 }
 0x159   : > { %5974 = vmatprep.mubr.msk.f32.mxu0 %vm473_vm3, %v5099_v28 }
 0x15c   : > { %5975 = vmatmul.mubr.msk.f32.gmra.mrb[48].mxu0 %vm473_vm3, %v5100_v29 }
 0x15d   : > { %5977 = vmatprep.mubr.msk.f32.mxu0 %vm473_vm3, %v5101_v30 }
 0x160   : > { %5978 = vmatmul.mubr.msk.f32.gmra.mrb[50].mxu0 %vm473_vm3, %v5102_v31 }
 0x161   : > { %6032 = vmatprep.mubr.msk.f32.mxu0 %vm473_vm3, %v5128_v32 }
 0x164   : > { %6033 = vmatmul.mubr.msk.f32.vlgmr.msra.gmra.mrb[52].mxu0 %vm473_vm3, %v5129_v33 }
 0x165   : > { %6035 = vmatprep.mubr.msk.f32.mxu0 %vm473_vm3, %v5130_v34  ;;  %6643 = vmatpush3.bf16.msra.mxu0 %v7379_v3 }
 0x166   : > { %6646 = vmatprep.subr.msk.bf16.mxu0 %vm7386_vm2, %v7384_v5 }
 0x168   : > { %6036 = vmatmul.mubr.msk.f32.gmra.mrb[54].mxu0 %vm473_vm3, %v5131_v35 }
 0x169   : > { %6038 = vmatprep.mubr.msk.f32.mxu0 %vm473_vm3, %v5132_v36  ;;  %6649 = vmatpush3.bf16.msk.msra.mxu0 %vm7386_vm2, %v7384_v5 }
 0x16a   : > { %6683 = vmatprep.subr.bf16.mxu0 %v7379_v3 }
 0x16c   : > { %6039 = vmatmul.mubr.msk.f32.gmra.mrb[56].mxu0 %vm473_vm3, %v5133_v37 }
 0x16d   : > { %6041 = vmatprep.mubr.msk.f32.mxu0 %vm473_vm3, %v5134_v38 }
 0x170   : > { %6042 = vmatmul.mubr.msk.f32.gmra.mrb[58].mxu0 %vm473_vm3, %v5135_v39 }
 0x171   : > { %6044 = vmatprep.mubr.msk.f32.mxu0 %vm473_vm3, %v5136_v40 }
 0x174   : > { %6045 = vmatmul.mubr.msk.f32.gmra.mrb[60].mxu0 %vm473_vm3, %v5137_v41 }
 0x175   : > { %6047 = vmatprep.mubr.msk.f32.mxu0 %vm473_vm3, %v5138_v42 }
 0x178   : > { %6048 = vmatmul.mubr.msk.f32.gmra.mrb[62].mxu0 %vm473_vm3, %v5139_v43 }
 0x179   : > { %6050 = vmatprep.mubr.msk.f32.mxu0 %vm473_vm3, %v5140_v44 }
 0x17c   : > { %6051 = vmatmul.mubr.msk.f32.gmra.mrb[64].mxu0 %vm473_vm3, %v5141_v45 }
 0x17d   : > { %6053 = vmatprep.mubr.msk.f32.mxu0 %vm473_vm3, %v5142_v46 }
 0x180   : > { %6054 = vmatmul.mubr.msk.f32.gmra.mrb[66].mxu0 %vm473_vm3, %v5143_v47 }
 0x181   : > { %6108 = vmatprep.mubr.msk.f32.mxu0 %vm473_vm3, %v5169_v48 }
 0x184   : > { %6109 = vmatmul.mubr.msk.f32.vlgmr.msra.gmra.mrb[68].mxu0 %vm473_vm3, %v5170_v49 }
 0x185   : > { %6111 = vmatprep.mubr.msk.f32.mxu0 %vm473_vm3, %v5171_v50  ;;  %6685 = vmatpush3.bf16.msra.mxu0 %v7379_v3 }
 0x186   : > { %6688 = vmatprep.subr.msk.bf16.mxu0 %vm7386_vm2, %v7384_v5 }
 0x188   : > { %6112 = vmatmul.mubr.msk.f32.gmra.mrb[70].mxu0 %vm473_vm3, %v5172_v51 }
 0x189   : > { %6114 = vmatprep.mubr.msk.f32.mxu0 %vm473_vm3, %v5173_v52  ;;  %6691 = vmatpush3.bf16.msk.msra.mxu0 %vm7386_vm2, %v7384_v5 }
 0x18a   : > { %6725 = vmatprep.subr.bf16.mxu0 %v7379_v3 }
 0x18c   : > { %6115 = vmatmul.mubr.msk.f32.gmra.mrb[72].mxu0 %vm473_vm3, %v5174_v59 }
 0x18d   : > { %6117 = vmatprep.mubr.msk.f32.mxu0 %vm473_vm3, %v5175_v60 }
 0x190   : > { %6118 = vmatmul.mubr.msk.f32.gmra.mrb[74].mxu0 %vm473_vm3, %v5176_v61 }
 0x191   : > { %6120 = vmatprep.mubr.msk.f32.mxu0 %vm473_vm3, %v5177_v62 }
 0x194   : > { %6121 = vmatmul.mubr.msk.f32.gmra.mrb[76].mxu0 %vm473_vm3, %v5178_v63 }
 0x195   : > { %6123 = vmatprep.mubr.msk.f32.mxu0 %vm473_vm3, %v5179_v0 }
 0x198   : > { %6124 = vmatmul.mubr.msk.f32.gmra.mrb[78].mxu0 %vm473_vm3, %v5180_v1 }
 0x199   : > { %6126 = vmatprep.mubr.msk.f32.mxu0 %vm473_vm3, %v5181_v2 }
 0x19c   : > { %6127 = vmatmul.mubr.msk.f32.gmra.mrb[80].mxu0 %vm473_vm3, %v5182_v4 }
 0x19d   : > { %6129 = vmatprep.mubr.msk.f32.mxu0 %vm473_vm3, %v5183_v7 }
 0x1a0   : > { %6130 = vmatmul.mubr.msk.f32.gmra.mrb[82].mxu0 %vm473_vm3, %v5184_v8 }
 0x1a1   : > { %6184 = vmatprep.mubr.msk.f32.mxu0 %vm473_vm3, %v5210_v9 }
 0x1a4   : > { %6185 = vmatmul.mubr.msk.f32.vlgmr.msra.gmra.mrb[84].mxu0 %vm473_vm3, %v5211_v10 }
 0x1a5   : > { %6187 = vmatprep.mubr.msk.f32.mxu0 %vm473_vm3, %v5212_v11  ;;  %6727 = vmatpush3.bf16.msra.mxu0 %v7379_v3  ;;  %v5217_v3 = vld [vmem:[%s7398_s22 + $0x198] sm:$0xff] }
 0x1a6   : > { %6730 = vmatprep.subr.msk.bf16.mxu0 %vm7386_vm2, %v7384_v5 }
 0x1a8   : > { %6188 = vmatmul.mubr.msk.f32.gmra.mrb[86].mxu0 %vm473_vm3, %v5213_v12 }
 0x1a9   : > { %6190 = vmatprep.mubr.msk.f32.mxu0 %vm473_vm3, %v5214_v13  ;;  %6733 = vmatpush3.bf16.msk.msra.mxu0 %vm7386_vm2, %v7384_v5  ;;  %v5221_v5 = vld [vmem:[%s7398_s22 + $0x278] sm:$0xff] }
 0x1ac   : > { %6191 = vmatmul.mubr.msk.f32.gmra.mrb[88].mxu0 %vm473_vm3, %v5215_v14 }
 0x1ad   : > { %6193 = vmatprep.mubr.msk.f32.mxu0 %vm473_vm3, %v5216_v15 }
 0x1b0   : > { %6194 = vmatmul.mubr.msk.f32.gmra.mrb[90].mxu0 %vm473_vm3, %v5217_v3 }
 0x1b1   : > { %6196 = vmatprep.mubr.msk.f32.mxu0 %vm473_vm3, %v5218_v16 }
 0x1b4   : > { %6197 = vmatmul.mubr.msk.f32.gmra.mrb[92].mxu0 %vm473_vm3, %v5219_v17 }
 0x1b5   : > { %6199 = vmatprep.mubr.msk.f32.mxu0 %vm473_vm3, %v5220_v18 }
 0x1b8   : > { %6200 = vmatmul.mubr.msk.f32.gmra.mrb[94].mxu0 %vm473_vm3, %v5221_v5 }
 0x1b9   : > { %6202 = vmatprep.mubr.msk.f32.mxu0 %vm473_vm3, %v5222_v6 }
 0x1bc   : > { %6203 = vmatmul.mubr.msk.f32.gmra.mrb[96].mxu0 %vm473_vm3, %v5223_v19 }
 0x1bd   : > { %6205 = vmatprep.mubr.msk.f32.mxu0 %vm473_vm3, %v5224_v20 }
 0x1c0   : > { %6206 = vmatmul.mubr.msk.f32.gmra.mrb[98].mxu0 %vm473_vm3, %v5225_v21 }
 0x1ef   : > { %v5846_v22 = vpop.f32.mrb[16].mxu0  ;;  %v5868_v26 = vpop.f32.mrb[0].mxu1 }
 0x1f0   : > { %v875_v27 = vmax.f32 %v5846_v22, %v5868_v26  ;;  %v758_v28 = vpop.f32.mrb[17].mxu0  ;;  %v855_v29 = vpop.f32.mrb[1].mxu1 }
 0x1f1   : > { %v874_v30 = vmax.f32 %v758_v28, %v855_v29 }
 0x1f2   : > { %v885_v31 = vadd.f32 %v7704_v25, %v875_v27 }
 0x1f3   : > { %v884_v32 = vadd.f32 %v7704_v25, %v874_v30  ;;  %v5849_v33 = vpop.f32.mrb[18].mxu0  ;;  %v5871_v34 = vpop.f32.mrb[2].mxu1 }
 0x1f4   : > { %v889_v35 = vmax.f32 %v885_v31, 0.0  ;;  %v877_v36 = vmax.f32 %v5849_v33, %v5871_v34  ;;  %v768_v37 = vpop.f32.mrb[19].mxu0  ;;  %v865_v38 = vpop.f32.mrb[3].mxu1 }
 0x1f5   : > { %v888_v39 = vmax.f32 %v884_v32, 0.0  ;;  %v876_v40 = vmax.f32 %v768_v37, %v865_v38 }
 0x1f6   : > { %894 = vst.msk [vmem:[#allocation2 + $0x8] sm:$0xff] %vm892_vm5, %v889_v35  ;;  %v887_v41 = vadd.f32 %v7704_v25, %v877_v36 }
 0x1f7   : > { %893 = vst.msk [vmem:[#allocation2] sm:$0xff] %vm892_vm5, %v888_v39  ;;  %v886_v42 = vadd.f32 %v7704_v25, %v876_v40  ;;  %v5882_v43 = vpop.f32.mrb[20].mxu0 }
 0x1f8   : > { %v891_v44 = vmax.f32 %v887_v41, 0.0  ;;  %v1028_v45 = vpop.f32.mrb[21].mxu0 }
 0x1f9   : > { %v890_v46 = vmax.f32 %v886_v42, 0.0 }
 0x1fa   : > { %896 = vst.msk [vmem:[#allocation2 + $0x18] sm:$0xff] %vm892_vm5, %v891_v44 }
 0x1fb   : > { %895 = vst.msk [vmem:[#allocation2 + $0x10] sm:$0xff] %vm892_vm5, %v890_v46  ;;  %v5885_v47 = vpop.f32.mrb[22].mxu0 }
 0x1fc   : > { %v1108_v48 = vmax.f32 %v5882_v43, %v5885_v47  ;;  %v1038_v49 = vpop.f32.mrb[23].mxu0 }
 0x1fd   : > { %v1107_v50 = vmax.f32 %v1028_v45, %v1038_v49 }
 0x1ff   : > { %v6524_v51 = vpack.c.bf16 %v1108_v48, %v1107_v50  ;;  %v5888_v52 = vpop.f32.mrb[24].mxu0 }
 0x200   : > { %v1048_v59 = vpop.f32.mrb[25].mxu0 }
 0x201   : > { %6525 = vmatprep.subr.bf16.mxu1 %v6524_v51 }
 0x202   : > { %6527 = vmatpush3.bf16.msra.mxu1 %v6524_v51 }
 0x203   : > { %v5891_v60 = vpop.f32.mrb[26].mxu0 }
 0x204   : > { %v1110_v61 = vmax.f32 %v5888_v52, %v5891_v60  ;;  %v1058_v62 = vpop.f32.mrb[27].mxu0 }
 0x205   : > { %v1109_v63 = vmax.f32 %v1048_v59, %v1058_v62 }
 0x207   : > { %v6528_v0 = vpack.c.bf16 %v1110_v61, %v1109_v63  ;;  %v5894_v1 = vpop.f32.mrb[28].mxu0 }
 0x208   : > { %v1068_v2 = vpop.f32.mrb[29].mxu0 }
 0x209   : > { %6529 = vmatprep.subr.bf16.mxu1 %v6528_v0 }
 0x20a   : > { %6531 = vmatpush3.bf16.msra.mxu1 %v6528_v0 }
 0x20b   : > { %v5897_v4 = vpop.f32.mrb[30].mxu0 }
 0x20c   : > { %v1112_v7 = vmax.f32 %v5894_v1, %v5897_v4  ;;  %v1078_v8 = vpop.f32.mrb[31].mxu0 }
 0x20d   : > { %v1111_v9 = vmax.f32 %v1068_v2, %v1078_v8 }
 0x20f   : > { %v6532_v10 = vpack.c.bf16 %v1112_v7, %v1111_v9  ;;  %v5900_v11 = vpop.f32.mrb[32].mxu0 }
 0x210   : > { %v1088_v12 = vpop.f32.mrb[33].mxu0 }
 0x211   : > { %6533 = vmatprep.subr.bf16.mxu1 %v6532_v10 }
 0x212   : > { %6535 = vmatpush3.bf16.msra.mxu1 %v6532_v10 }
 0x213   : > { %v5903_v13 = vpop.f32.mrb[34].mxu0 }
 0x214   : > { %v1114_v14 = vmax.f32 %v5900_v11, %v5903_v13  ;;  %v1098_v15 = vpop.f32.mrb[35].mxu0 }
 0x215   : > { %v1113_v3 = vmax.f32 %v1088_v12, %v1098_v15 }
 0x217   : > { %v6536_v16 = vpack.c.bf16 %v1114_v14, %v1113_v3  ;;  %v5958_v17 = vpop.f32.mrb[36].mxu0 }
 0x218   : > { %v1433_v18 = vpop.f32.mrb[37].mxu0 }
 0x219   : > { %6537 = vmatprep.subr.bf16.mxu1 %v6536_v16 }
 0x21a   : > { %6539 = vmatpush3.bf16.msra.mxu1 %v6536_v16 }
 0x21b   : > { %6541 = vmatprep.subr.bf16.mxu1 %v6524_v51  ;;  %v5961_v5 = vpop.f32.mrb[38].mxu0 }
 0x21c   : > { %v1513_v6 = vmax.f32 %v5958_v17, %v5961_v5  ;;  %v1443_v19 = vpop.f32.mrb[39].mxu0 }
 0x21d   : > { %v1512_v20 = vmax.f32 %v1433_v18, %v1443_v19  ;;  %5921 = vmatmul.mubr.msk.f32.vlgmr.msra.gmra.mrb[4].mxu1 %vm679_vm4, %v7452_v53 }
 0x21e   : > { %6543 = vmatpush3.bf16.msra.mxu1 %v6524_v51  ;;  %5923 = vmatprep.mubr.msk.f32.mxu1 %vm679_vm4, %v7463_v55 }
 0x21f   : > { %v6566_v21 = vpack.c.bf16 %v1513_v6, %v1512_v20  ;;  %6545 = vmatprep.subr.bf16.mxu1 %v6528_v0  ;;  %v5964_v22 = vpop.f32.mrb[40].mxu0 }
 0x220   : > { %v1453_v26 = vpop.f32.mrb[41].mxu0 }
 0x221   : > { %5924 = vmatmul.mubr.msk.f32.gmra.mrb[6].mxu1 %vm679_vm4, %v7480_v57 }
 0x222   : > { %6547 = vmatpush3.bf16.msra.mxu1 %v6528_v0  ;;  %5942 = vmatprep.mubr.msk.f32.mxu1 %vm679_vm4, %v7445_v24 }
 0x223   : > { %6549 = vmatprep.subr.bf16.mxu1 %v6532_v10  ;;  %v5967_v27 = vpop.f32.mrb[42].mxu0 }
 0x224   : > { %v1515_v28 = vmax.f32 %v5964_v22, %v5967_v27  ;;  %v1463_v29 = vpop.f32.mrb[43].mxu0 }
 0x225   : > { %v1514_v30 = vmax.f32 %v1453_v26, %v1463_v29 }
 0x226   : > { %6551 = vmatpush3.bf16.msra.mxu1 %v6532_v10 }
 0x227   : > { %v6570_v31 = vpack.c.bf16 %v1515_v28, %v1514_v30  ;;  %6553 = vmatprep.subr.bf16.mxu1 %v6536_v16  ;;  %v5970_v32 = vpop.f32.mrb[44].mxu0 }
 0x228   : > { %v1473_v33 = vpop.f32.mrb[45].mxu0 }
 0x22a   : > { %6555 = vmatpush3.bf16.msra.mxu1 %v6536_v16 }
 0x22b   : > { %v5973_v34 = vpop.f32.mrb[46].mxu0  ;;  %6567 = vmatprep.subr.bf16.mxu1 %v6566_v21 }
 0x22c   : > { %v1517_v35 = vmax.f32 %v5970_v32, %v5973_v34  ;;  %v1483_v36 = vpop.f32.mrb[47].mxu0 }
 0x22d   : > { %v1516_v37 = vmax.f32 %v1473_v33, %v1483_v36  ;;  %5943 = vmatmul.mubr.msk.f32.vlgmr.msra.gmra.mrb[8].mxu1 %vm679_vm4, %v7457_v54 }
 0x22e   : > { %6569 = vmatpush3.bf16.msra.mxu1 %v6566_v21  ;;  %5945 = vmatprep.mubr.msk.f32.mxu1 %vm679_vm4, %v7468_v56 }
 0x22f   : > { %v6574_v38 = vpack.c.bf16 %v1517_v35, %v1516_v37  ;;  %6571 = vmatprep.subr.bf16.mxu1 %v6570_v31  ;;  %v5976_v39 = vpop.f32.mrb[48].mxu0 }
 0x230   : > { %v1493_v40 = vpop.f32.mrb[49].mxu0 }
 0x231   : > { %5946 = vmatmul.mubr.msk.f32.gmra.mrb[10].mxu1 %vm679_vm4, %v7485_v58 }
 0x232   : > { %6573 = vmatpush3.bf16.msra.mxu1 %v6570_v31  ;;  %5996 = vmatprep.mubr.msk.f32.mxu1 %vm679_vm4, %v7438_v23 }
 0x233   : > { %v5979_v41 = vpop.f32.mrb[50].mxu0  ;;  %6575 = vmatprep.subr.bf16.mxu1 %v6574_v38 }
 0x234   : > { %v1519_v42 = vmax.f32 %v5976_v39, %v5979_v41  ;;  %v1503_v43 = vpop.f32.mrb[51].mxu0 }
 0x235   : > { %v1518_v44 = vmax.f32 %v1493_v40, %v1503_v43 }
 0x236   : > { %6577 = vmatpush3.bf16.msra.mxu1 %v6574_v38 }
 0x237   : > { %v6578_v45 = vpack.c.bf16 %v1519_v42, %v1518_v44  ;;  %v6034_v46 = vpop.f32.mrb[52].mxu0 }
 0x238   : > { %v1838_v47 = vpop.f32.mrb[53].mxu0 }
 0x239   : > { %6579 = vmatprep.subr.bf16.mxu1 %v6578_v45 }
 0x23a   : > { %6581 = vmatpush3.bf16.msra.mxu1 %v6578_v45 }
 0x23b   : > { %6583 = vmatprep.subr.bf16.mxu1 %v6566_v21  ;;  %v6037_v48 = vpop.f32.mrb[54].mxu0 }
 0x23c   : > { %v1918_v49 = vmax.f32 %v6034_v46, %v6037_v48  ;;  %v1848_v50 = vpop.f32.mrb[55].mxu0 }
 0x23d   : > { %v1917_v51 = vmax.f32 %v1838_v47, %v1848_v50  ;;  %5997 = vmatmul.mubr.msk.f32.vlgmr.msra.gmra.mrb[12].mxu1 %vm679_vm4, %v7452_v53 }
 0x23e   : > { %6585 = vmatpush3.bf16.msra.mxu1 %v6566_v21  ;;  %5999 = vmatprep.mubr.msk.f32.mxu1 %vm679_vm4, %v7463_v55 }
 0x23f   : > { %v6608_v52 = vpack.c.bf16 %v1918_v49, %v1917_v51  ;;  %6587 = vmatprep.subr.bf16.mxu1 %v6570_v31  ;;  %v6040_v59 = vpop.f32.mrb[56].mxu0 }
 0x240   : > { %v1858_v60 = vpop.f32.mrb[57].mxu0 }
 0x241   : > { %6000 = vmatmul.mubr.msk.f32.gmra.mrb[14].mxu1 %vm679_vm4, %v7480_v57 }
 0x242   : > { %6589 = vmatpush3.bf16.msra.mxu1 %v6570_v31  ;;  %6018 = vmatprep.mubr.msk.f32.mxu1 %vm679_vm4, %v7445_v24 }
 0x243   : > { %6591 = vmatprep.subr.bf16.mxu1 %v6574_v38  ;;  %v6043_v61 = vpop.f32.mrb[58].mxu0 }
 0x244   : > { %v1920_v62 = vmax.f32 %v6040_v59, %v6043_v61  ;;  %v1868_v63 = vpop.f32.mrb[59].mxu0 }
 0x245   : > { %v1919_v0 = vmax.f32 %v1858_v60, %v1868_v63 }
 0x246   : > { %6593 = vmatpush3.bf16.msra.mxu1 %v6574_v38 }
 0x247   : > { %v6612_v1 = vpack.c.bf16 %v1920_v62, %v1919_v0  ;;  %6595 = vmatprep.subr.bf16.mxu1 %v6578_v45  ;;  %v6046_v2 = vpop.f32.mrb[60].mxu0 }
 0x248   : > { %v1878_v4 = vpop.f32.mrb[61].mxu0 }
 0x24a   : > { %6597 = vmatpush3.bf16.msra.mxu1 %v6578_v45 }
 0x24b   : > { %v6049_v7 = vpop.f32.mrb[62].mxu0  ;;  %6609 = vmatprep.subr.bf16.mxu1 %v6608_v52 }
 0x24c   : > { %v1922_v8 = vmax.f32 %v6046_v2, %v6049_v7  ;;  %v1888_v9 = vpop.f32.mrb[63].mxu0 }
 0x24d   : > { %v1921_v10 = vmax.f32 %v1878_v4, %v1888_v9  ;;  %6019 = vmatmul.mubr.msk.f32.vlgmr.msra.gmra.mrb[16].mxu1 %vm679_vm4, %v7457_v54 }
 0x24e   : > { %6611 = vmatpush3.bf16.msra.mxu1 %v6608_v52  ;;  %6021 = vmatprep.mubr.msk.f32.mxu1 %vm679_vm4, %v7468_v56 }
 0x24f   : > { %v6616_v11 = vpack.c.bf16 %v1922_v8, %v1921_v10  ;;  %6613 = vmatprep.subr.bf16.mxu1 %v6612_v1  ;;  %v6052_v12 = vpop.f32.mrb[64].mxu0 }
 0x250   : > { %v1898_v13 = vpop.f32.mrb[65].mxu0 }
 0x251   : > { %6022 = vmatmul.mubr.msk.f32.gmra.mrb[18].mxu1 %vm679_vm4, %v7485_v58 }
 0x252   : > { %6615 = vmatpush3.bf16.msra.mxu1 %v6612_v1  ;;  %6072 = vmatprep.mubr.msk.f32.mxu1 %vm679_vm4, %v7438_v23 }
 0x253   : > { %v6055_v14 = vpop.f32.mrb[66].mxu0  ;;  %6617 = vmatprep.subr.bf16.mxu1 %v6616_v11 }
 0x254   : > { %v1924_v15 = vmax.f32 %v6052_v12, %v6055_v14  ;;  %v1908_v3 = vpop.f32.mrb[67].mxu0 }
 0x255   : > { %v1923_v16 = vmax.f32 %v1898_v13, %v1908_v3 }
 0x256   : > { %6619 = vmatpush3.bf16.msra.mxu1 %v6616_v11 }
 0x257   : > { %v6620_v17 = vpack.c.bf16 %v1924_v15, %v1923_v16  ;;  %v6110_v18 = vpop.f32.mrb[68].mxu0 }
 0x258   : > { %v2243_v5 = vpop.f32.mrb[69].mxu0 }
 0x259   : > { %6621 = vmatprep.subr.bf16.mxu1 %v6620_v17 }
 0x25a   : > { %6623 = vmatpush3.bf16.msra.mxu1 %v6620_v17 }
 0x25b   : > { %6625 = vmatprep.subr.bf16.mxu1 %v6608_v52  ;;  %v6113_v6 = vpop.f32.mrb[70].mxu0 }
 0x25c   : > { %v2323_v19 = vmax.f32 %v6110_v18, %v6113_v6  ;;  %v2253_v20 = vpop.f32.mrb[71].mxu0 }
 0x25d   : > { %v2322_v21 = vmax.f32 %v2243_v5, %v2253_v20  ;;  %6073 = vmatmul.mubr.msk.f32.vlgmr.msra.gmra.mrb[20].mxu1 %vm679_vm4, %v7452_v53 }
 0x25e   : > { %6627 = vmatpush3.bf16.msra.mxu1 %v6608_v52  ;;  %6075 = vmatprep.mubr.msk.f32.mxu1 %vm679_vm4, %v7463_v55 }
 0x25f   : > { %v6650_v22 = vpack.c.bf16 %v2323_v19, %v2322_v21  ;;  %6629 = vmatprep.subr.bf16.mxu1 %v6612_v1  ;;  %v6116_v26 = vpop.f32.mrb[72].mxu0 }
 0x260   : > { %v2263_v27 = vpop.f32.mrb[73].mxu0 }
 0x261   : > { %6076 = vmatmul.mubr.msk.f32.gmra.mrb[22].mxu1 %vm679_vm4, %v7480_v57 }
 0x262   : > { %6631 = vmatpush3.bf16.msra.mxu1 %v6612_v1  ;;  %6094 = vmatprep.mubr.msk.f32.mxu1 %vm679_vm4, %v7445_v24 }
 0x263   : > { %6633 = vmatprep.subr.bf16.mxu1 %v6616_v11  ;;  %v6119_v28 = vpop.f32.mrb[74].mxu0 }
 0x264   : > { %v2325_v29 = vmax.f32 %v6116_v26, %v6119_v28  ;;  %v2273_v30 = vpop.f32.mrb[75].mxu0 }
 0x265   : > { %v2324_v31 = vmax.f32 %v2263_v27, %v2273_v30 }
 0x266   : > { %6635 = vmatpush3.bf16.msra.mxu1 %v6616_v11 }
 0x267   : > { %v6654_v32 = vpack.c.bf16 %v2325_v29, %v2324_v31  ;;  %6637 = vmatprep.subr.bf16.mxu1 %v6620_v17  ;;  %v6122_v33 = vpop.f32.mrb[76].mxu0 }
 0x268   : > { %v2283_v34 = vpop.f32.mrb[77].mxu0 }
 0x26a   : > { %6639 = vmatpush3.bf16.msra.mxu1 %v6620_v17 }
 0x26b   : > { %v6125_v35 = vpop.f32.mrb[78].mxu0  ;;  %6651 = vmatprep.subr.bf16.mxu1 %v6650_v22 }
 0x26c   : > { %v2327_v36 = vmax.f32 %v6122_v33, %v6125_v35  ;;  %v2293_v37 = vpop.f32.mrb[79].mxu0  ;;  %v5252_v35 = vld [vmem:[%s7398_s22 + $0xc8] sm:$0xff] }
 0x26d   : > { %v2326_v38 = vmax.f32 %v2283_v34, %v2293_v37  ;;  %6095 = vmatmul.mubr.msk.f32.vlgmr.msra.gmra.mrb[24].mxu1 %vm679_vm4, %v7457_v54  ;;  %v5251_v34 = vld [vmem:[%s7398_s22 + $0xc0] sm:$0xff] }
 0x26e   : > { %6653 = vmatpush3.bf16.msra.mxu1 %v6650_v22  ;;  %6097 = vmatprep.mubr.msk.f32.mxu1 %vm679_vm4, %v7468_v56 }
 0x26f   : > { %v6658_v39 = vpack.c.bf16 %v2327_v36, %v2326_v38  ;;  %6655 = vmatprep.subr.bf16.mxu1 %v6654_v32  ;;  %v6128_v40 = vpop.f32.mrb[80].mxu0  ;;  %6260 = vmatprep.mubr.msk.f32.mxu0 %vm473_vm3, %v5251_v34  ;;  %v5253_v36 = vld [vmem:[%s7398_s22 + $0xd0] sm:$0xff]  ;;  %v5254_v38 = vld [vmem:[%s7398_s22 + $0xd8] sm:$0xff] }
 0x270   : > { %v2303_v41 = vpop.f32.mrb[81].mxu0  ;;  %6261 = vmatmul.mubr.msk.f32.vlgmr.msra.gmra.mrb[100].mxu0 %vm473_vm3, %v5252_v35 }
 0x271   : > { %6098 = vmatmul.mubr.msk.f32.gmra.mrb[26].mxu1 %vm679_vm4, %v7485_v58  ;;  %6263 = vmatprep.mubr.msk.f32.mxu0 %vm473_vm3, %v5253_v36 }
 0x272   : > { %6657 = vmatpush3.bf16.msra.mxu1 %v6654_v32  ;;  %6148 = vmatprep.mubr.msk.f32.mxu1 %vm679_vm4, %v7438_v23 }
 0x273   : > { %v6131_v42 = vpop.f32.mrb[82].mxu0  ;;  %6659 = vmatprep.subr.bf16.mxu1 %v6658_v39 }
 0x274   : > { %v2329_v43 = vmax.f32 %v6128_v40, %v6131_v42  ;;  %v2313_v44 = vpop.f32.mrb[83].mxu0  ;;  %v5255_v40 = vld [vmem:[%s7398_s22 + $0x1a0] sm:$0xff]  ;;  %6264 = vmatmul.mubr.msk.f32.gmra.mrb[102].mxu0 %vm473_vm3, %v5254_v38 }
 0x275   : > { %v2328_v45 = vmax.f32 %v2303_v41, %v2313_v44  ;;  %6266 = vmatprep.mubr.msk.f32.mxu0 %vm473_vm3, %v5255_v40  ;;  %v3499_v44 = vld [vmem:[%s9310_s3] sm:$0xff] }
 0x276   : > { %6661 = vmatpush3.bf16.msra.mxu1 %v6658_v39 }
 0x277   : > { %v6662_v46 = vpack.c.bf16 %v2329_v43, %v2328_v45  ;;  %v6186_v47 = vpop.f32.mrb[84].mxu0  ;;  %v3500_v45 = vld [vmem:[%s9310_s3 + $0x8] sm:$0xff] }
 0x278   : > { %v2648_v48 = vpop.f32.mrb[85].mxu0 }
 0x279   : > { %6663 = vmatprep.subr.bf16.mxu1 %v6662_v46 }
 0x27a   : > { %6665 = vmatpush3.bf16.msra.mxu1 %v6662_v46 }
 0x27b   : > { %6667 = vmatprep.subr.bf16.mxu1 %v6650_v22  ;;  %v6189_v49 = vpop.f32.mrb[86].mxu0 }
 0x27c   : > { %v2728_v50 = vmax.f32 %v6186_v47, %v6189_v49  ;;  %v2658_v51 = vpop.f32.mrb[87].mxu0  ;;  %v6766_v47 = vpack.c.bf16 %v3500_v45, %v3499_v44 }
 0x27d   : > { %v2727_v52 = vmax.f32 %v2648_v48, %v2658_v51  ;;  %6149 = vmatmul.mubr.msk.f32.vlgmr.msra.gmra.mrb[28].mxu1 %vm679_vm4, %v7452_v53  ;;  %v3501_v51 = vld [vmem:[%s9310_s3 + $0x10] sm:$0xff] }
 0x27e   : > { %6669 = vmatpush3.bf16.msra.mxu1 %v6650_v22  ;;  %6151 = vmatprep.mubr.msk.f32.mxu1 %vm679_vm4, %v7463_v55 }
 0x27f   : > { %v6692_v59 = vpack.c.bf16 %v2728_v50, %v2727_v52  ;;  %6671 = vmatprep.subr.bf16.mxu1 %v6654_v32  ;;  %v6192_v60 = vpop.f32.mrb[88].mxu0  ;;  %6767 = vmatprep.subr.bf16.mxu0 %v6766_v47  ;;  %v5257_v50 = vld [vmem:[%s7398_s22 + $0x1b0] sm:$0xff] }
 0x280   : > { %v2668_v61 = vpop.f32.mrb[89].mxu0  ;;  %6769 = vmatpush3.bf16.msra.mxu0 %v6766_v47 }
 0x281   : > { %6152 = vmatmul.mubr.msk.f32.gmra.mrb[30].mxu1 %vm679_vm4, %v7480_v57 }
 0x282   : > { %6673 = vmatpush3.bf16.msra.mxu1 %v6654_v32  ;;  %6170 = vmatprep.mubr.msk.f32.mxu1 %vm679_vm4, %v7445_v24 }
 0x283   : > { %6675 = vmatprep.subr.bf16.mxu1 %v6658_v39  ;;  %v6195_v62 = vpop.f32.mrb[90].mxu0 }
 0x284   : > { %v2730_v63 = vmax.f32 %v6192_v60, %v6195_v62  ;;  %v2678_v0 = vpop.f32.mrb[91].mxu0  ;;  %v3502_v60 = vld [vmem:[%s9310_s3 + $0x18] sm:$0xff]  ;;  %v5259_v62 = vld [vmem:[%s7398_s22 + $0x280] sm:$0xff] }
 0x285   : > { %v2729_v1 = vmax.f32 %v2668_v61, %v2678_v0  ;;  %v6770_v61 = vpack.c.bf16 %v3502_v60, %v3501_v51  ;;  %v3504_v0 = vld [vmem:[%s9310_s3 + $0x28] sm:$0xff] }
 0x286   : > { %6677 = vmatpush3.bf16.msra.mxu1 %v6658_v39 }
 0x287   : > { %v6696_v2 = vpack.c.bf16 %v2730_v63, %v2729_v1  ;;  %6679 = vmatprep.subr.bf16.mxu1 %v6662_v46  ;;  %v6198_v4 = vpop.f32.mrb[92].mxu0  ;;  %v3503_v63 = vld [vmem:[%s9310_s3 + $0x20] sm:$0xff]  ;;  %6771 = vmatprep.subr.bf16.mxu0 %v6770_v61 }
 0x288   : > { %v2688_v7 = vpop.f32.mrb[93].mxu0  ;;  %v6774_v1 = vpack.c.bf16 %v3504_v0, %v3503_v63  ;;  %6773 = vmatpush3.bf16.msra.mxu0 %v6770_v61 }
 0x28a   : > { %6681 = vmatpush3.bf16.msra.mxu1 %v6662_v46  ;;  %v5256_v46 = vld [vmem:[%s7398_s22 + $0x1a8] sm:$0xff]  ;;  %6775 = vmatprep.subr.bf16.mxu0 %v6774_v1 }
 0x28b   : > { %v6201_v8 = vpop.f32.mrb[94].mxu0  ;;  %6693 = vmatprep.subr.bf16.mxu1 %v6692_v59  ;;  %6267 = vmatmul.mubr.msk.f32.gmra.mrb[104].mxu0 %vm473_vm3, %v5256_v46 }
 0x28c   : > { %v2732_v9 = vmax.f32 %v6198_v4, %v6201_v8  ;;  %v2698_v10 = vpop.f32.mrb[95].mxu0  ;;  %6269 = vmatprep.mubr.msk.f32.mxu0 %vm473_vm3, %v5257_v50  ;;  %v3506_v4 = vld [vmem:[%s9310_s3 + $0x38] sm:$0xff]  ;;  %v5261_v8 = vld [vmem:[%s7398_s22 + $0x290] sm:$0xff]  ;;  %6777 = vmatpush3.bf16.msra.mxu0 %v6774_v1 }
 0x28d   : > { %v2731_v11 = vmax.f32 %v2688_v7, %v2698_v10  ;;  %6171 = vmatmul.mubr.msk.f32.vlgmr.msra.gmra.mrb[32].mxu1 %vm679_vm4, %v7457_v54  ;;  %v5260_v7 = vld [vmem:[%s7398_s22 + $0x288] sm:$0xff]  ;;  %v5262_v10 = vld [vmem:[%s7398_s22 + $0x298] sm:$0xff] }
 0x28e   : > { %6695 = vmatpush3.bf16.msra.mxu1 %v6692_v59  ;;  %6173 = vmatprep.mubr.msk.f32.mxu1 %vm679_vm4, %v7468_v56 }
 0x28f   : > { %v6700_v24 = vpack.c.bf16 %v2732_v9, %v2731_v11  ;;  %6697 = vmatprep.subr.bf16.mxu1 %v6696_v2  ;;  %v6204_v12 = vpop.f32.mrb[96].mxu0 }
 0x290   : > { %v2708_v13 = vpop.f32.mrb[97].mxu0 }
 0x291   : > { %6174 = vmatmul.mubr.msk.f32.gmra.mrb[34].mxu1 %vm679_vm4, %v7485_v58 }
 0x292   : > { %6699 = vmatpush3.bf16.msra.mxu1 %v6696_v2  ;;  %6224 = vmatprep.mubr.msk.f32.mxu1 %vm679_vm4, %v7438_v23  ;;  %v7787_v23 = vld [vmem:[%s9313_s6] sm:$0xff] }
 0x293   : > { %v6207_v14 = vpop.f32.mrb[98].mxu0  ;;  %6701 = vmatprep.subr.bf16.mxu1 %v6700_v24 }
 0x294   : > { %v2734_v15 = vmax.f32 %v6204_v12, %v6207_v14  ;;  %v2718_v3 = vpop.f32.mrb[99].mxu0  ;;  %v3507_v14 = vld [vmem:[%s9310_s3 + $0x40] sm:$0xff] }
 0x295   : > { %v2733_v16 = vmax.f32 %v2708_v13, %v2718_v3 }
 0x296   : > { %6703 = vmatpush3.bf16.msra.mxu1 %v6700_v24 }
 0x297   : > { %v6704_v17 = vpack.c.bf16 %v2734_v15, %v2733_v16  ;;  %v3508_v15 = vld [vmem:[%s9310_s3 + $0x48] sm:$0xff]  ;;  %v5263_v16 = vld [vmem:[%s7398_s22 + $0x360] sm:$0xff] }
 0x299   : > { %6705 = vmatprep.subr.bf16.mxu1 %v6704_v17 }
 0x29a   : > { %6707 = vmatpush3.bf16.msra.mxu1 %v6704_v17 }
 0x29b   : > { %6709 = vmatprep.subr.bf16.mxu1 %v6692_v59 }
 0x29d   : > { %6225 = vmatmul.mubr.msk.f32.vlgmr.msra.gmra.mrb[36].mxu1 %vm679_vm4, %v7452_v53  ;;  %v7174_v53 = vld [vmem:[%s9312_s5] sm:$0xff] }
 0x29e   : > { %6711 = vmatpush3.bf16.msra.mxu1 %v6692_v59  ;;  %6227 = vmatprep.mubr.msk.f32.mxu1 %vm679_vm4, %v7463_v55  ;;  %v5258_v59 = vld [vmem:[%s7398_s22 + $0x1b8] sm:$0xff] }
 0x29f   : > { %6713 = vmatprep.subr.bf16.mxu1 %v6696_v2  ;;  %6270 = vmatmul.mubr.msk.f32.gmra.mrb[106].mxu0 %vm473_vm3, %v5258_v59 }
 0x2a0   : > { %6272 = vmatprep.mubr.msk.f32.mxu0 %vm473_vm3, %v5259_v62 }
 0x2a1   : > { %6228 = vmatmul.mubr.msk.f32.gmra.mrb[38].mxu1 %vm679_vm4, %v7480_v57 }
 0x2a2   : > { %6715 = vmatpush3.bf16.msra.mxu1 %v6696_v2  ;;  %6246 = vmatprep.mubr.msk.f32.mxu1 %vm679_vm4, %v7787_v23  ;;  %v3505_v2 = vld [vmem:[%s9310_s3 + $0x30] sm:$0xff] }
 0x2a3   : > { %6717 = vmatprep.subr.bf16.mxu1 %v6700_v24  ;;  %v6778_v9 = vpack.c.bf16 %v3506_v4, %v3505_v2  ;;  %6273 = vmatmul.mubr.msk.f32.gmra.mrb[108].mxu0 %vm473_vm3, %v5260_v7 }
 0x2a4   : > { %6275 = vmatprep.mubr.msk.f32.mxu0 %vm473_vm3, %v5261_v8 }
 0x2a5   : > { %6779 = vmatprep.subr.bf16.mxu0 %v6778_v9 }
 0x2a6   : > { %6719 = vmatpush3.bf16.msra.mxu1 %v6700_v24  ;;  %6781 = vmatpush3.bf16.msra.mxu0 %v6778_v9 }
 0x2a7   : > { %6721 = vmatprep.subr.bf16.mxu1 %v6704_v17  ;;  %6276 = vmatmul.mubr.msk.f32.gmra.mrb[110].mxu0 %vm473_vm3, %v5262_v10 }
 0x2a8   : > { %6278 = vmatprep.mubr.msk.f32.mxu0 %vm473_vm3, %v5263_v16 }
 0x2aa   : > { %6723 = vmatpush3.bf16.msra.mxu1 %v6704_v17  ;;  %v5264_v17 = vld [vmem:[%s7398_s22 + $0x368] sm:$0xff] }
 0x2ab   : > { %6279 = vmatmul.mubr.msk.f32.gmra.mrb[112].mxu0 %vm473_vm3, %v5264_v17 }
 0x2ad   : > { %6247 = vmatmul.mubr.msk.f32.vlgmr.msra.gmra.mrb[40].mxu1 %vm679_vm4, %v7457_v54 }
 0x2ae   : > { %6249 = vmatprep.mubr.msk.f32.mxu1 %vm679_vm4, %v7468_v56 }
 0x2b1   : > { %6250 = vmatmul.mubr.msk.f32.gmra.mrb[42].mxu1 %vm679_vm4, %v7485_v58 }
 0x2b2   : > { %6300 = vmatprep.mubr.msk.f32.mxu1 %vm679_vm4, %v7174_v53  ;;  %v6782_v53 = vpack.c.bf16 %v3508_v15, %v3507_v14 }
 0x2b4   : > { %6783 = vmatprep.subr.bf16.mxu0 %v6782_v53 }
 0x2b5   : > { %6785 = vmatpush3.bf16.msra.mxu0 %v6782_v53 }
 0x2f0   : > { %v5922_v55 = vpop.f32.mrb[4].mxu1 }
 0x2f1   : > { %v1181_v57 = vpop.f32.mrb[5].mxu1 }
 0x2f4   : > { %v5925_v18 = vpop.f32.mrb[6].mxu1 }
 0x2f5   : > { %v1191_v5 = vpop.f32.mrb[7].mxu1 }
 0x300   : > { %v5944_v6 = vpop.f32.mrb[8].mxu1 }
 0x301   : > { %v1286_v19 = vmax.f32 %v5922_v55, %v5944_v6  ;;  %v1266_v20 = vpop.f32.mrb[9].mxu1 }
 0x302   : > { %v1285_v54 = vmax.f32 %v1181_v57, %v1266_v20 }
 0x303   : > { %v1290_v56 = vadd.f32 %v7704_v25, %v1286_v19 }
 0x304   : > { %v1289_v21 = vadd.f32 %v7704_v25, %v1285_v54  ;;  %v5947_v58 = vpop.f32.mrb[10].mxu1  ;;  %v3509_v54 = vld [vmem:[%s9310_s3 + $0x50] sm:$0xff] }
 0x305   : > { %v1294_v22 = vmax.f32 %v1290_v56, 0.0  ;;  %v1288_v26 = vmax.f32 %v5925_v18, %v5947_v58  ;;  %v1276_v27 = vpop.f32.mrb[11].mxu1  ;;  %v3510_v56 = vld [vmem:[%s9310_s3 + $0x58] sm:$0xff]  ;;  %v5265_v58 = vld [vmem:[%s7398_s22 + $0x370] sm:$0xff] }
 0x306   : > { %v1293_v28 = vmax.f32 %v1289_v21, 0.0  ;;  %v1287_v29 = vmax.f32 %v1191_v5, %v1276_v27  ;;  %6281 = vmatprep.mubr.msk.f32.mxu0 %vm473_vm3, %v5265_v58 }
 0x307   : > { %1299 = vst.msk [vmem:[#allocation2 + $0x28] sm:$0xff] %vm892_vm5, %v1294_v22  ;;  %v1292_v30 = vadd.f32 %v7704_v25, %v1288_v26  ;;  %v5266_v22 = vld [vmem:[%s7398_s22 + $0x378] sm:$0xff]  ;;  %v6786_v26 = vpack.c.bf16 %v3510_v56, %v3509_v54  ;;  %s9321_s22 = smov 64   ;;  %v5308_v56 = vld [vmem:[%s9310_s3 + $0x60] sm:$0xff] }
 0x308   : > { %1298 = vst.msk [vmem:[#allocation2 + $0x20] sm:$0xff] %vm892_vm5, %v1293_v28  ;;  %v1291_v31 = vadd.f32 %v7704_v25, %v1287_v29  ;;  %6282 = vmatmul.mubr.msk.f32.gmra.mrb[114].mxu0 %vm473_vm3, %v5266_v22 }
 0x309   : > { %v1296_v32 = vmax.f32 %v1292_v30, 0.0  ;;  %6787 = vmatprep.subr.bf16.mxu0 %v6786_v26 }
 0x30a   : > { %v1295_v33 = vmax.f32 %v1291_v31, 0.0  ;;  %6789 = vmatpush3.bf16.msra.mxu0 %v6786_v26 }
 0x30b   : > { %1301 = vst.msk [vmem:[#allocation2 + $0x38] sm:$0xff] %vm892_vm5, %v1296_v32 }
 0x30c   : > { %1300 = vst.msk [vmem:[#allocation2 + $0x30] sm:$0xff] %vm892_vm5, %v1295_v33 }
 0x30e   : > { %v7814_v37 = vld [vmem:[#allocation2 + $0x28] sm:$0xff] }
 0x30f   : > { %3345 = vrot.lane.b32.xlu0 %v7814_v37, %s7248_s17  ;;  %v7821_v41 = vld [vmem:[#allocation2 + $0x20] sm:$0xff] }
 0x310   : > { %v5998_v39 = vpop.f32.mrb[12].mxu1 }
 0x311   : > { %v1586_v42 = vpop.f32.mrb[13].mxu1 }
 0x312   : > { %v7824_v43 = vld [vmem:[#allocation2 + $0x38] sm:$0xff] }
 0x313   : > { %3343 = vrot.lane.b32.xlu0 %v7821_v41, %s7248_s17  ;;  %3349 = vrot.lane.b32.xlu1 %v7824_v43, %s7248_s17  ;;  %v7845_v52 = vld [vmem:[#allocation2 + $0x30] sm:$0xff] }
 0x314   : > { %v6001_v48 = vpop.f32.mrb[14].mxu1 }
 0x315   : > { %v7838_v49 = vpop.f32.mrb[15].mxu1 }
 0x317   : > { %3347 = vrot.lane.b32.xlu0 %v7845_v52, %s7248_s17 }
 0x320   : > { %v6020_v11 = vpop.f32.mrb[16].mxu1 }
 0x321   : > { %v1691_v24 = vmax.f32 %v5998_v39, %v6020_v11  ;;  %v1671_v12 = vpop.f32.mrb[17].mxu1 }
 0x322   : > { %v1690_v13 = vmax.f32 %v1586_v42, %v1671_v12 }
 0x323   : > { %v1695_v3 = vadd.f32 %v7704_v25, %v1691_v24 }
 0x324   : > { %v1694_v55 = vadd.f32 %v7704_v25, %v1690_v13  ;;  %v6023_v57 = vpop.f32.mrb[18].mxu1 }
 0x325   : > { %v1699_v18 = vmax.f32 %v1695_v3, 0.0  ;;  %v1693_v5 = vmax.f32 %v6001_v48, %v6023_v57  ;;  %v1681_v6 = vpop.f32.mrb[19].mxu1 }
 0x326   : > { %v1698_v19 = vmax.f32 %v1694_v55, 0.0  ;;  %v1692_v20 = vmax.f32 %v7838_v49, %v1681_v6 }
 0x327   : > { %1704 = vst.msk [vmem:[#allocation2 + $0x48] sm:$0xff] %vm892_vm5, %v1699_v18  ;;  %v1697_v21 = vadd.f32 %v7704_v25, %v1693_v5 }
 0x328   : > { %1703 = vst.msk [vmem:[#allocation2 + $0x40] sm:$0xff] %vm892_vm5, %v1698_v19  ;;  %v1696_v27 = vadd.f32 %v7704_v25, %v1692_v20 }
 0x329   : > { %v1701_v28 = vmax.f32 %v1697_v21, 0.0  ;;  %v5309_v21 = vld [vmem:[%s9310_s3 + $0x68] sm:$0xff] }
 0x32a   : > { %v1700_v29 = vmax.f32 %v1696_v27, 0.0  ;;  %v7976_v22 = vpack.c.bf16 %v5309_v21, %v5308_v56  ;;  %v5313_v56 = vld [vmem:[%s9310_s3 + $0x88] sm:$0xff]  ;;  %v3330_v21 = vld [vmem:[#allocation2 + $0x18] sm:$0xff] }
 0x32b   : > { %1706 = vst.msk [vmem:[#allocation2 + $0x58] sm:$0xff] %vm892_vm5, %v1701_v28 }
 0x32c   : > { %1705 = vst.msk [vmem:[#allocation2 + $0x50] sm:$0xff] %vm892_vm5, %v1700_v29  ;;  %6791 = vmatprep.subr.bf16.mxu0 %v7976_v22 }
 0x32e   : > { %v7904_v30 = vld [vmem:[#allocation2 + $0x48] sm:$0xff] }
 0x32f   : > { %3361 = vrot.lane.b32.xlu1 %v7904_v30, %s9321_s22  ;;  %v7908_v31 = vld [vmem:[#allocation2 + $0x40] sm:$0xff] }
 0x330   : > { %3383 = vrot.lane.b32.xlu0 %v7908_v31, %s7248_s17  ;;  %v6074_v32 = vpop.f32.mrb[20].mxu1 }
 0x331   : > { %v1991_v33 = vpop.f32.mrb[21].mxu1 }
 0x332   : > { %v7922_v38 = vld [vmem:[#allocation2 + $0x58] sm:$0xff] }
 0x333   : > { %3385 = vrot.lane.b32.xlu1 %v7904_v30, %s7248_s17  ;;  %v7914_v34 = vld [vmem:[#allocation2 + $0x50] sm:$0xff] }
 0x334   : > { %3363 = vrot.lane.b32.xlu0 %v7914_v34, %s9321_s22  ;;  %v6077_v35 = vpop.f32.mrb[22].mxu1 }
 0x335   : > { %v2001_v36 = vpop.f32.mrb[23].mxu1 }
 0x337   : > { %3359 = vrot.lane.b32.xlu1 %v7908_v31, %s9321_s22 }
 0x338   : > { %3387 = vrot.lane.b32.xlu0 %v7914_v34, %s7248_s17 }
 0x33b   : > { %3365 = vrot.lane.b32.xlu1 %v7922_v38, %s9321_s22 }
 0x33f   : > { %3389 = vrot.lane.b32.xlu1 %v7922_v38, %s7248_s17 }
 0x340   : > { %v6096_v39 = vpop.f32.mrb[24].mxu1 }
 0x341   : > { %v2096_v40 = vmax.f32 %v6074_v32, %v6096_v39  ;;  %v2076_v42 = vpop.f32.mrb[25].mxu1 }
 0x342   : > { %v2095_v44 = vmax.f32 %v1991_v33, %v2076_v42 }
 0x343   : > { %v2100_v45 = vadd.f32 %v7704_v25, %v2096_v40 }
 0x344   : > { %v2099_v46 = vadd.f32 %v7704_v25, %v2095_v44  ;;  %v6099_v47 = vpop.f32.mrb[26].mxu1 }
 0x345   : > { %v2104_v48 = vmax.f32 %v2100_v45, 0.0  ;;  %v2098_v49 = vmax.f32 %v6077_v35, %v6099_v47  ;;  %v2086_v50 = vpop.f32.mrb[27].mxu1 }
 0x346   : > { %v2103_v51 = vmax.f32 %v2099_v46, 0.0  ;;  %v2097_v59 = vmax.f32 %v2001_v36, %v2086_v50 }
 0x347   : > { %2109 = vst.msk [vmem:[#allocation2 + $0x68] sm:$0xff] %vm892_vm5, %v2104_v48  ;;  %v2102_v60 = vadd.f32 %v7704_v25, %v2098_v49 }
 0x348   : > { %2108 = vst.msk [vmem:[#allocation2 + $0x60] sm:$0xff] %vm892_vm5, %v2103_v51  ;;  %v2101_v61 = vadd.f32 %v7704_v25, %v2097_v59  ;;  %v7175_v59 = vld [vmem:[%s9333_s2] ss:$0 sm:$0xff]  ;;  %s4941_s2 = scalar_lea.sflag [#allocation4], %s434_s0 }
 0x349   : > { %v2106_v62 = vmax.f32 %v2102_v60, 0.0 }
 0x34a   : > { %v2105_v63 = vmax.f32 %v2101_v61, 0.0 }
 0x34b   : > { %2111 = vst.msk [vmem:[#allocation2 + $0x78] sm:$0xff] %vm892_vm5, %v2106_v62 }
 0x34c   : > { %2110 = vst.msk [vmem:[#allocation2 + $0x70] sm:$0xff] %vm892_vm5, %v2105_v63 }
 0x34e   : > { %v7936_v0 = vld [vmem:[#allocation2 + $0x68] sm:$0xff] }
 0x34f   : > { %3401 = vrot.lane.b32.xlu1 %v7936_v0, %s9321_s22  ;;  %v7940_v1 = vld [vmem:[#allocation2 + $0x60] sm:$0xff] }
 0x350   : > { %3399 = vrot.lane.b32.xlu0 %v7940_v1, %s9321_s22  ;;  %v6150_v2 = vpop.f32.mrb[28].mxu1 }
 0x351   : > { %v2396_v4 = vpop.f32.mrb[29].mxu1 }
 0x352   : > { %v7948_v9 = vld [vmem:[#allocation2 + $0x78] sm:$0xff] }
 0x353   : > { %3425 = vrot.lane.b32.xlu1 %v7936_v0, %s7248_s17  ;;  %v7952_v10 = vld [vmem:[#allocation2 + $0x70] sm:$0xff] }
 0x354   : > { %3423 = vrot.lane.b32.xlu0 %v7940_v1, %s7248_s17  ;;  %v6153_v7 = vpop.f32.mrb[30].mxu1 }
 0x355   : > { %v2406_v8 = vpop.f32.mrb[31].mxu1 }
 0x357   : > { %3405 = vrot.lane.b32.xlu1 %v7948_v9, %s9321_s22 }
 0x358   : > { %3403 = vrot.lane.b32.xlu0 %v7952_v10, %s9321_s22 }
 0x35b   : > { %3429 = vrot.lane.b32.xlu1 %v7948_v9, %s7248_s17 }
 0x35c   : > { %3427 = vrot.lane.b32.xlu0 %v7952_v10, %s7248_s17 }
 0x360   : > { %v6172_v11 = vpop.f32.mrb[32].mxu1 }
 0x361   : > { %v2501_v24 = vmax.f32 %v6150_v2, %v6172_v11  ;;  %v2481_v12 = vpop.f32.mrb[33].mxu1 }
 0x362   : > { %v2500_v13 = vmax.f32 %v2396_v4, %v2481_v12 }
 0x363   : > { %v2505_v14 = vadd.f32 %v7704_v25, %v2501_v24 }
 0x364   : > { %v2504_v15 = vadd.f32 %v7704_v25, %v2500_v13  ;;  %v6175_v3 = vpop.f32.mrb[34].mxu1 }
 0x365   : > { %v2509_v16 = vmax.f32 %v2505_v14, 0.0  ;;  %v2503_v17 = vmax.f32 %v6153_v7, %v6175_v3  ;;  %v2491_v53 = vpop.f32.mrb[35].mxu1  ;;  %v5310_v14 = vld [vmem:[%s9310_s3 + $0x70] sm:$0xff]  ;;  %v3327_v3 = vld [vmem:[#allocation2] sm:$0xff] }
 0x366   : > { %v2508_v55 = vmax.f32 %v2504_v15, 0.0  ;;  %v2502_v57 = vmax.f32 %v2406_v8, %v2491_v53  ;;  %v5311_v15 = vld [vmem:[%s9310_s3 + $0x78] sm:$0xff] }
 0x367   : > { %2514 = vst.msk [vmem:[#allocation2 + $0x88] sm:$0xff] %vm892_vm5, %v2509_v16  ;;  %v2507_v18 = vadd.f32 %v7704_v25, %v2503_v17  ;;  %v3328_v16 = vld [vmem:[#allocation2 + $0x8] sm:$0xff] }
 0x368   : > { %2513 = vst.msk [vmem:[#allocation2 + $0x80] sm:$0xff] %vm892_vm5, %v2508_v55  ;;  %v2506_v5 = vadd.f32 %v7704_v25, %v2502_v57 }
 0x369   : > { %v2511_v6 = vmax.f32 %v2507_v18, 0.0  ;;  %v3329_v18 = vld [vmem:[#allocation2 + $0x10] sm:$0xff] }
 0x36a   : > { %v2510_v19 = vmax.f32 %v2506_v5, 0.0 }
 0x36b   : > { %2516 = vst.msk [vmem:[#allocation2 + $0x98] sm:$0xff] %vm892_vm5, %v2511_v6  ;;  %v6794_v6 = vpack.c.bf16 %v5311_v15, %v5310_v14 }
 0x36c   : > { %2515 = vst.msk [vmem:[#allocation2 + $0x90] sm:$0xff] %vm892_vm5, %v2510_v19 }
 0x36e   : > { %v3420_v20 = vld [vmem:[#allocation2 + $0x88] sm:$0xff] }
 0x36f   : > { %3441 = vrot.lane.b32.xlu1 %v3420_v20, %s9321_s22  ;;  %v3419_v54 = vld [vmem:[#allocation2 + $0x80] sm:$0xff] }
 0x370   : > { %3439 = vrot.lane.b32.xlu0 %v3419_v54, %s9321_s22  ;;  %v6226_v58 = vpop.f32.mrb[36].mxu1 }
 0x371   : > { %v2801_v26 = vpop.f32.mrb[37].mxu1 }
 0x372   : > { %v3422_v29 = vld [vmem:[#allocation2 + $0x98] sm:$0xff] }
 0x373   : > { %3465 = vrot.lane.b32.xlu1 %v3420_v20, %s7248_s17  ;;  %v3421_v32 = vld [vmem:[#allocation2 + $0x90] sm:$0xff] }
 0x374   : > { %3463 = vrot.lane.b32.xlu0 %v3419_v54, %s7248_s17  ;;  %v6229_v27 = vpop.f32.mrb[38].mxu1  ;;  %v5312_v54 = vld [vmem:[%s9310_s3 + $0x80] sm:$0xff] }
 0x375   : > { %v2811_v28 = vpop.f32.mrb[39].mxu1 }
 0x377   : > { %3445 = vrot.lane.b32.xlu1 %v3422_v29, %s9321_s22 }
 0x378   : > { %3443 = vrot.lane.b32.xlu0 %v3421_v32, %s9321_s22 }
 0x37b   : > { %3469 = vrot.lane.b32.xlu1 %v3422_v29, %s7248_s17  ;;  %v6798_v29 = vpack.c.bf16 %v5313_v56, %v5312_v54 }
 0x37c   : > { %3467 = vrot.lane.b32.xlu0 %v3421_v32, %s7248_s17  ;;  %v5314_v32 = vld [vmem:[%s9310_s3 + $0x90] sm:$0xff]  ;;  %s9334_s17 = smov 64  }
 0x380   : > { %v6248_v33 = vpop.f32.mrb[40].mxu1 }
 0x381   : > { %v2906_v35 = vmax.f32 %v6226_v58, %v6248_v33  ;;  %v2886_v36 = vpop.f32.mrb[41].mxu1  ;;  %v3346_v2 = vpop.permute.xlu0 %3345  ;;  %v5315_v33 = vld [vmem:[%s9310_s3 + $0x98] sm:$0xff] }
 0x382   : > { %v2905_v39 = vmax.f32 %v2801_v26, %v2886_v36  ;;  %v3372_v57 = vsel %vm892_vm5, %v3328_v16, %v3346_v2  ;;  %v5317_v36 = vld [vmem:[%s9310_s3 + $0xa8] sm:$0xff] }
 0x383   : > { %v2910_v40 = vadd.f32 %v7704_v25, %v2906_v35  ;;  %v6802_v35 = vpack.c.bf16 %v5315_v33, %v5314_v32 }
 0x384   : > { %v2909_v42 = vadd.f32 %v7704_v25, %v2905_v39  ;;  %v6251_v44 = vpop.f32.mrb[42].mxu1 }
 0x385   : > { %v2914_v45 = vmax.f32 %v2910_v40, 0.0  ;;  %v2908_v46 = vmax.f32 %v6229_v27, %v6251_v44  ;;  %v2896_v48 = vpop.f32.mrb[43].mxu1  ;;  %v3344_v7 = vpop.permute.xlu0 %3343  ;;  %v5318_v40 = vld [vmem:[%s9310_s3 + $0xb0] sm:$0xff] }
 0x386   : > { %v2913_v47 = vmax.f32 %v2909_v42, 0.0  ;;  %v2907_v50 = vmax.f32 %v2811_v28, %v2896_v48  ;;  %v3350_v8 = vpop.permute.xlu1 %3349  ;;  %v3371_v17 = vsel %vm892_vm5, %v3327_v3, %v3344_v7  ;;  %v5319_v42 = vld [vmem:[%s9310_s3 + $0xb8] sm:$0xff] }
 0x387   : > { %2919 = vst.msk [vmem:[#allocation2 + $0xa8] sm:$0xff] %vm892_vm5, %v2914_v45  ;;  %v2912_v49 = vadd.f32 %v7704_v25, %v2908_v46  ;;  %v3374_v26 = vsel %vm892_vm5, %v3330_v21, %v3350_v8  ;;  %v6810_v44 = vpack.c.bf16 %v5319_v42, %v5318_v40  ;;  %v5336_v45 = vld [vmem:[%s9310_s3 + $0xc0] sm:$0xff]  ;;  %v5337_v46 = vld [vmem:[%s9310_s3 + $0xc8] sm:$0xff] }
 0x388   : > { %2918 = vst.msk [vmem:[#allocation2 + $0xa0] sm:$0xff] %vm892_vm5, %v2913_v47  ;;  %v2911_v60 = vadd.f32 %v7175_v59, %v2907_v50 }
 0x389   : > { %v2916_v51 = vmax.f32 %v2912_v49, 0.0  ;;  %v3348_v11 = vpop.permute.xlu0 %3347  ;;  %v8060_v49 = vpack.c.bf16 %v5337_v46, %v5336_v45 }
 0x38a   : > { %v2915_v61 = vmax.f32 %v2911_v60, 0.0  ;;  %v3373_v19 = vsel %vm892_vm5, %v3329_v18, %v3348_v11 }
 0x38b   : > { %2921 = vst.msk [vmem:[#allocation2 + $0xb8] sm:$0xff] %vm892_vm5, %v2916_v51 }
 0x38c   : > { %2920 = vst.msk [vmem:[#allocation2 + $0xb0] sm:$0xff] %vm892_vm5, %v2915_v61 }
 0x38e   : > { %v3460_v62 = vld [vmem:[#allocation2 + $0xa8] sm:$0xff] }
 0x38f   : > { %3481 = vrot.lane.b32.xlu1 %v3460_v62, %s9321_s22  ;;  %v3459_v63 = vld [vmem:[#allocation2 + $0xa0] sm:$0xff] }
 0x390   : > { %3479 = vrot.lane.b32.xlu0 %v3459_v63, %s9321_s22 }
 0x392   : > { %v3462_v25 = vld [vmem:[#allocation2 + $0xb8] sm:$0xff] }
 0x393   : > { %3485 = vrot.lane.b32.xlu1 %v3462_v25, %s9321_s22  ;;  %v3461_v4 = vld [vmem:[#allocation2 + $0xb0] sm:$0xff] }
 0x394   : > { %3483 = vrot.lane.b32.xlu0 %v3461_v4, %s9321_s22  ;;  %s4954_s22 = sshll.u32 %s436_s15, 4  ;;  %s9267_s22 = int_to_ptr.vmem [resolvable:$true] %s4954_s22 }
 0x395   : > { %s7183_s21 = scalar_lea.vmem %s9267_s22, 64 }
 0x396   : > { %p7184_p11 = scmp.ne.s32.totalorder %s9267_s22, %s7183_s21 }
 0x398   : > { %p7185_p12 = pnand %p7184_p11, %p7359_p5 }
 0x39a   : > { %p7186_p13 = pneg %p7185_p12 }
 0x3a1   : > { %v3362_v24 = vpop.permute.xlu1 %3361 }
 0x3a2   : > { %v3384_v12 = vpop.permute.xlu0 %3383  ;;  %v8012_v20 = vsel %vm679_vm4, %v3372_v57, %v3362_v24 }
 0x3a3   : > { %v3411_v51 = vsel %vm892_vm5, %v7821_v41, %v3384_v12  ;;  %v6262_v12 = vpop.f32.mrb[100].mxu0 }
 0x3a5   : > { %v3386_v13 = vpop.permute.xlu1 %3385 }
 0x3a6   : > { %v3364_v53 = vpop.permute.xlu0 %3363  ;;  %v3412_v60 = vsel %vm892_vm5, %v7814_v37, %v3386_v13  ;;  %v3053_v13 = vpop.f32.mrb[101].mxu0 }
 0x3a7   : > { %v8023_v58 = vsel %vm679_vm4, %v3373_v19, %v3364_v53 }
 0x3a9   : > { %v3360_v55 = vpop.permute.xlu1 %3359 }
 0x3aa   : > { %v8008_v5 = vsel %vm679_vm4, %v3371_v17, %v3360_v55  ;;  %v3388_v48 = vpop.permute.xlu0 %3387  ;;  %v6265_v17 = vpop.f32.mrb[102].mxu0 }
 0x3ab   : > { %6352 = vmatprep.mubr.msk.f32.mxu0 %vm3511_vm6, %v8008_v5  ;;  %v3413_v2 = vsel %vm892_vm5, %v7845_v52, %v3388_v48  ;;  %v3133_v55 = vmax.f32 %v6262_v12, %v6265_v17  ;;  %v7176_v12 = vld [vmem:[%s9312_s5 + $0x8] sm:$0xff]  ;;  %v5339_v17 = vld [vmem:[%s9310_s3 + $0xd8] sm:$0xff] }
 0x3ac   : > { %6353 = vmatmul.mubr.msk.f32.vlgmr.msra.gmra.mrb[116].mxu0 %vm3511_vm6, %v8012_v20 }
 0x3ad   : > { %v3366_v27 = vpop.permute.xlu1 %3365  ;;  %6355 = vmatprep.mubr.msk.f32.mxu0 %vm3511_vm6, %v8023_v58  ;;  %6793 = vmatpush3.bf16.msra.mxu0 %v7976_v22  ;;  %v5316_v22 = vld [vmem:[%s9310_s3 + $0xa0] sm:$0xff] }
 0x3ae   : > { %v8032_v28 = vsel %vm679_vm4, %v3374_v26, %v3366_v27  ;;  %6795 = vmatprep.subr.bf16.mxu0 %v6794_v6  ;;  %v6806_v39 = vpack.c.bf16 %v5317_v36, %v5316_v22 }
 0x3b0   : > { %6356 = vmatmul.mubr.msk.f32.gmra.mrb[118].mxu0 %vm3511_vm6, %v8032_v28 }
 0x3b1   : > { %6797 = vmatpush3.bf16.msra.mxu0 %v6794_v6  ;;  %v3390_v47 = vpop.permute.xlu1 %3389 }
 0x3b2   : > { %6799 = vmatprep.subr.bf16.mxu0 %v6798_v29  ;;  %v3414_v37 = vsel %vm892_vm5, %v7824_v43, %v3390_v47 }
 0x3b5   : > { %6801 = vmatpush3.bf16.msra.mxu0 %v6798_v29 }
 0x3b6   : > { %6803 = vmatprep.subr.bf16.mxu0 %v6802_v35 }
 0x3b9   : > { %6805 = vmatpush3.bf16.msra.mxu0 %v6802_v35 }
 0x3ba   : > { %6807 = vmatprep.subr.bf16.mxu0 %v6806_v39 }
 0x3bd   : > { %6809 = vmatpush3.bf16.msra.mxu0 %v6806_v39 }
 0x3be   : > { %6811 = vmatprep.subr.bf16.mxu0 %v6810_v44 }
 0x3c1   : > { %v3402_v50 = vpop.permute.xlu1 %3401  ;;  %6813 = vmatpush3.bf16.msra.mxu0 %v6810_v44 }
 0x3c2   : > { %v3400_v59 = vpop.permute.xlu0 %3399  ;;  %6815 = vmatprep.subr.bf16.mxu0 %v8060_v49  ;;  %v8071_v62 = vsel %vm679_vm4, %v3412_v60, %v3402_v50 }
 0x3c3   : > { %v8068_v61 = vsel %vm679_vm4, %v3411_v51, %v3400_v59 }
 0x3c4   : > { %6358 = vmatprep.mubr.msk.f32.mxu0 %vm3511_vm6, %v8068_v61 }
 0x3c5   : > { %v3426_v63 = vpop.permute.xlu1 %3425  ;;  %6359 = vmatmul.mubr.msk.f32.gmra.mrb[120].mxu0 %vm3511_vm6, %v8071_v62 }
 0x3c6   : > { %v3424_v41 = vpop.permute.xlu0 %3423  ;;  %v3452_v15 = vsel %vm892_vm5, %v7904_v30, %v3426_v63 }
 0x3c7   : > { %v3451_v43 = vsel %vm892_vm5, %v7908_v31, %v3424_v41  ;;  %v3063_v31 = vpop.f32.mrb[103].mxu0 }
 0x3c8   : > { %v3132_v18 = vmax.f32 %v3053_v13, %v3063_v31  ;;  %v6268_v30 = vpop.f32.mrb[104].mxu0  ;;  %v7177_v13 = vld [vmem:[%s9312_s5 + $0x10] sm:$0xff]  ;;  %v5341_v31 = vld [vmem:[%s9310_s3 + $0xe8] sm:$0xff] }
 0x3c9   : > { %v3406_v25 = vpop.permute.xlu1 %3405  ;;  %v3073_v54 = vpop.f32.mrb[105].mxu0 }
 0x3ca   : > { %v3404_v4 = vpop.permute.xlu0 %3403  ;;  %v8085_v8 = vsel %vm679_vm4, %v3414_v37, %v3406_v25  ;;  %v6734_v6 = vpack.c.bf16 %v3133_v55, %v3132_v18  ;;  %v6271_v32 = vpop.f32.mrb[106].mxu0  ;;  %v5340_v55 = vld [vmem:[%s9310_s3 + $0xe0] sm:$0xff]  ;;  %v5343_v18 = vld [vmem:[%s9310_s3 + $0xf8] sm:$0xff] }
 0x3cb   : > { %v8082_v7 = vsel %vm679_vm4, %v3413_v2, %v3404_v4  ;;  %v3083_v33 = vpop.f32.mrb[107].mxu0 }
 0x3cc   : > { %6361 = vmatprep.mubr.msk.f32.mxu0 %vm3511_vm6, %v8082_v7  ;;  %6735 = vmatprep.subr.bf16.mxu1 %v6734_v6  ;;  %v3134_v35 = vmax.f32 %v3073_v54, %v3083_v33  ;;  %v6274_v36 = vpop.f32.mrb[108].mxu0  ;;  %v7179_v54 = vld [vmem:[%s9313_s6 + $0x8] sm:$0xff]  ;;  %v4257_v33 = vld [vmem:[%s9314_s7 + $0x38] sm:$0xff] }
 0x3cd   : > { %6362 = vmatmul.mubr.msk.f32.gmra.mrb[122].mxu0 %vm3511_vm6, %v8085_v8  ;;  %v3430_v11 = vpop.permute.xlu1 %3429  ;;  %6737 = vmatpush3.bf16.msra.mxu1 %v6734_v6 }
 0x3ce   : > { %v3428_v24 = vpop.permute.xlu0 %3427  ;;  %v3454_v26 = vsel %vm892_vm5, %v7922_v38, %v3430_v11  ;;  %v3093_v38 = vpop.f32.mrb[109].mxu0 }
 0x3cf   : > { %v3453_v56 = vsel %vm892_vm5, %v7914_v34, %v3428_v24  ;;  %v3135_v34 = vmax.f32 %v6268_v30, %v6271_v32  ;;  %v6277_v39 = vpop.f32.mrb[110].mxu0  ;;  %v5345_v30 = vld [vmem:[%s9310_s3 + $0x108] sm:$0xff] }
 0x3d0   : > { %v3137_v40 = vmax.f32 %v6274_v36, %v6277_v39  ;;  %v3103_v42 = vpop.f32.mrb[111].mxu0  ;;  %v4252_v39 = vld [vmem:[%s9314_s7 + $0x10] sm:$0xff] }
 0x3d1   : > { %v6738_v22 = vpack.c.bf16 %v3135_v34, %v3134_v35  ;;  %v3136_v44 = vmax.f32 %v3093_v38, %v3103_v42  ;;  %v6280_v46 = vpop.f32.mrb[112].mxu0  ;;  %v7181_v34 = vld [vmem:[%s9313_s6 + $0x18] sm:$0xff]  ;;  %v4250_v35 = vld [vmem:[%s9314_s7] sm:$0xff]  ;;  %v4259_v42 = vld [vmem:[%s9314_s7 + $0x48] sm:$0xff] }
 0x3d2   : > { %v3113_v47 = vpop.f32.mrb[113].mxu0 }
 0x3d3   : > { %6739 = vmatprep.subr.bf16.mxu1 %v6738_v22  ;;  %v6742_v45 = vpack.c.bf16 %v3137_v40, %v3136_v44  ;;  %v4256_v40 = vld [vmem:[%s9314_s7 + $0x30] sm:$0xff] }
 0x3d4   : > { %6741 = vmatpush3.bf16.msra.mxu1 %v6738_v22  ;;  %v6904_v44 = vpack.c.bf16 %v4256_v40, %v4252_v39 }
 0x3d5   : > { %6743 = vmatprep.subr.bf16.mxu1 %v6742_v45 }
 0x3d8   : > { %6745 = vmatpush3.bf16.msra.mxu1 %v6742_v45 }
 0x3db   : > { %v6283_v48 = vpop.f32.mrb[114].mxu0 }
 0x3dc   : > { %v3139_v51 = vmax.f32 %v6280_v46, %v6283_v48  ;;  %v3123_v59 = vpop.f32.mrb[115].mxu0  ;;  %v4261_v46 = vld [vmem:[%s9314_s7 + $0x58] sm:$0xff] }
 0x3dd   : > { %v3138_v63 = vmax.f32 %v3113_v47, %v3123_v59  ;;  %v4265_v47 = vld [vmem:[%s9314_s7 + $0x78] sm:$0xff]  ;;  %v4262_v59 = vld [vmem:[%s9314_s7 + $0x60] sm:$0xff] }
 0x3df   : > { %v6746_v41 = vpack.c.bf16 %v3139_v51, %v3138_v63  ;;  %v4258_v51 = vld [vmem:[%s9314_s7 + $0x40] sm:$0xff] }
 0x3e0   : > { %v6844_v63 = vpack.c.bf16 %v4262_v59, %v4258_v51  ;;  %v4301_v51 = vld [vmem:[%s9314_s7 + $0x198] sm:$0xff] }
 0x3e1   : > { %v3442_v52 = vpop.permute.xlu1 %3441  ;;  %6747 = vmatprep.subr.bf16.mxu1 %v6746_v41  ;;  %v4305_v59 = vld [vmem:[%s9314_s7 + $0x1b8] sm:$0xff] }
 0x3e2   : > { %v3440_v14 = vpop.permute.xlu0 %3439  ;;  %v8099_v16 = vsel %vm679_vm4, %v3452_v15, %v3442_v52  ;;  %6749 = vmatpush3.bf16.msra.mxu1 %v6746_v41 }
 0x3e3   : > { %v8096_v3 = vsel %vm679_vm4, %v3451_v43, %v3440_v14  ;;  %6751 = vmatprep.subr.bf16.mxu1 %v6734_v6 }
 0x3e4   : > { %6364 = vmatprep.mubr.msk.f32.mxu0 %vm3511_vm6, %v8096_v3 }
 0x3e5   : > { %v3466_v53 = vpop.permute.xlu1 %3465  ;;  %6365 = vmatmul.mubr.msk.f32.gmra.mrb[124].mxu0 %vm3511_vm6, %v8099_v16  ;;  %6301 = vmatmul.mubr.msk.f32.vlgmr.msra.gmra.mrb[44].mxu1 %vm679_vm4, %v7176_v12 }
 0x3e6   : > { %v3464_v57 = vpop.permute.xlu0 %3463  ;;  %v3492_v37 = vsel %vm892_vm5, %v7936_v0, %v3466_v53  ;;  %6753 = vmatpush3.bf16.msra.mxu1 %v6734_v6  ;;  %6303 = vmatprep.mubr.msk.f32.mxu1 %vm679_vm4, %v7177_v13  ;;  %v5344_v6 = vld [vmem:[%s9310_s3 + $0x100] sm:$0xff]  ;;  %v4272_v13 = vld [vmem:[%s9314_s7 + $0xb0] sm:$0xff] }
 0x3e7   : > { %v3491_v2 = vsel %vm892_vm5, %v7940_v1, %v3464_v57  ;;  %6755 = vmatprep.subr.bf16.mxu1 %v6738_v22  ;;  %v6822_v57 = vpack.c.bf16 %v5341_v31, %v5340_v55  ;;  %v4274_v55 = vld [vmem:[%s9314_s7 + $0xc0] sm:$0xff] }
 0x3e8   : > { %v4278_v31 = vld [vmem:[%s9314_s7 + $0xe0] sm:$0xff] }
 0x3e9   : > { %v3446_v19 = vpop.permute.xlu1 %3445 }
 0x3ea   : > { %v3444_v21 = vpop.permute.xlu0 %3443  ;;  %v8113_v29 = vsel %vm679_vm4, %v3454_v26, %v3446_v19  ;;  %6757 = vmatpush3.bf16.msra.mxu1 %v6738_v22  ;;  %v6830_v19 = vpack.c.bf16 %v5345_v30, %v5344_v6  ;;  %v7180_v26 = vld [vmem:[%s9313_s6 + $0x10] sm:$0xff]  ;;  %v4254_v22 = vld [vmem:[%s9314_s7 + $0x20] sm:$0xff]  ;;  %v4287_v6 = vld [vmem:[%s9314_s7 + $0x128] sm:$0xff] }
 0x3eb   : > { %v8110_v27 = vsel %vm679_vm4, %v3453_v56, %v3444_v21  ;;  %6759 = vmatprep.subr.bf16.mxu1 %v6742_v45  ;;  %v5346_v56 = vld [vmem:[%s9310_s3 + $0x110] sm:$0xff]  ;;  %v5347_v21 = vld [vmem:[%s9310_s3 + $0x118] sm:$0xff]  ;;  %v6840_v38 = vpack.c.bf16 %v4254_v22, %v4250_v35  ;;  %v4295_v35 = vld [vmem:[%s9314_s7 + $0x168] sm:$0xff] }
 0x3ec   : > { %6367 = vmatprep.mubr.msk.f32.mxu0 %vm3511_vm6, %v8110_v27  ;;  %v6834_v32 = vpack.c.bf16 %v5347_v21, %v5346_v56  ;;  %v4285_v30 = vld [vmem:[%s9314_s7 + $0x118] sm:$0xff] }
 0x3ed   : > { %6368 = vmatmul.mubr.msk.f32.gmra.mrb[126].mxu0 %vm3511_vm6, %v8113_v29  ;;  %v3470_v50 = vpop.permute.xlu1 %3469  ;;  %v4293_v22 = vld [vmem:[%s9314_s7 + $0x158] sm:$0xff] }
 0x3ee   : > { %v3468_v60 = vpop.permute.xlu0 %3467  ;;  %v3494_v43 = vsel %vm892_vm5, %v7948_v9, %v3470_v50  ;;  %v7178_v9 = vld [vmem:[%s9312_s5 + $0x18] sm:$0xff]  ;;  %6761 = vmatpush3.bf16.msra.mxu1 %v6742_v45  ;;  %v4263_v45 = vld [vmem:[%s9314_s7 + $0x68] sm:$0xff]  ;;  %v6906_v50 = vpack.c.bf16 %v4265_v47, %v4261_v46  ;;  %v4296_v47 = vld [vmem:[%s9314_s7 + $0x170] sm:$0xff] }
 0x3ef   : > { %v3493_v0 = vsel %vm892_vm5, %v7952_v10, %v3468_v60  ;;  %v5338_v10 = vld [vmem:[%s9310_s3 + $0xd0] sm:$0xff]  ;;  %6304 = vmatmul.mubr.msk.f32.gmra.mrb[46].mxu1 %vm679_vm4, %v7178_v9  ;;  %6763 = vmatprep.subr.bf16.mxu1 %v6746_v41  ;;  %v6842_v48 = vpack.c.bf16 %v4263_v45, %v4259_v42  ;;  %v4290_v42 = vld [vmem:[%s9314_s7 + $0x140] sm:$0xff] }
 0x3f0   : > { %v6818_v53 = vpack.c.bf16 %v5339_v17, %v5338_v10  ;;  %6322 = vmatprep.mubr.msk.f32.mxu1 %vm679_vm4, %v7787_v23  ;;  %v5342_v23 = vld [vmem:[%s9310_s3 + $0xf0] sm:$0xff]  ;;  %v4277_v10 = vld [vmem:[%s9314_s7 + $0xd8] sm:$0xff] }
 0x3f1   : > { %v4260_v60 = vld [vmem:[%s9314_s7 + $0x50] sm:$0xff] }
 0x3f2   : > { %6765 = vmatpush3.bf16.msra.mxu1 %v6746_v41  ;;  %v4264_v41 = vld [vmem:[%s9314_s7 + $0x70] sm:$0xff] }
 0x3f3   : > { %v4292_v45 = vld [vmem:[%s9314_s7 + $0x150] sm:$0xff] }
 0x3f5   : > { %6323 = vmatmul.mubr.msk.f32.vlgmr.msra.gmra.mrb[48].mxu1 %vm679_vm4, %v7179_v54  ;;  %v6852_v54 = vpack.c.bf16 %v4278_v31, %v4274_v55  ;;  %v4312_v55 = vld [vmem:[%s9314_s7 + $0x1f0] sm:$0xff]  ;;  %v4315_v31 = vld [vmem:[%s9314_s7 + $0x208] sm:$0xff] }
 0x3f6   : > { %6325 = vmatprep.mubr.msk.f32.mxu1 %vm679_vm4, %v7180_v26 }
 0x3f9   : > { %6326 = vmatmul.mubr.msk.f32.gmra.mrb[50].mxu1 %vm679_vm4, %v7181_v34  ;;  %v4286_v34 = vld [vmem:[%s9314_s7 + $0x120] sm:$0xff] }
 0x401   : > { %v3482_v25 = vpop.permute.xlu1 %3481 }
 0x402   : > { %v3480_v4 = vpop.permute.xlu0 %3479  ;;  %v8127_v24 = vsel %vm679_vm4, %v3492_v37, %v3482_v25  ;;  %v4267_v25 = vld [vmem:[%s9314_s7 + $0x88] sm:$0xff] }
 0x403   : > { %v8124_v11 = vsel %vm679_vm4, %v3491_v2, %v3480_v4  ;;  %v4271_v2 = vld [vmem:[%s9314_s7 + $0xa8] sm:$0xff]  ;;  %v6908_v4 = vpack.c.bf16 %v4264_v41, %v4260_v60  ;;  %v6924_v41 = vpack.c.bf16 %v4296_v47, %v4292_v45  ;;  %v4337_v47 = vld [vmem:[%s9314_s7 + $0x2b8] sm:$0xff] }
 0x404   : > { %6370 = vmatprep.mubr.msk.f32.mxu0 %vm3511_vm6, %v8124_v11  ;;  %v6846_v37 = vpack.c.bf16 %v4271_v2, %v4267_v25  ;;  %v4298_v2 = vld [vmem:[%s9314_s7 + $0x180] sm:$0xff]  ;;  %v4335_v45 = vld [vmem:[%s9314_s7 + $0x2a8] sm:$0xff] }
 0x405   : > { %6371 = vmatmul.mubr.msk.f32.gmra.mrb[128].mxu0 %vm3511_vm6, %v8127_v24  ;;  %v3486_v1 = vpop.permute.xlu1 %3485 }
 0x406   : > { %v3484_v52 = vpop.permute.xlu0 %3483  ;;  %v8149_v15 = vsel %vm679_vm4, %v3494_v43, %v3486_v1  ;;  %v4266_v1 = vld [vmem:[%s9314_s7 + $0x80] sm:$0xff] }
 0x407   : > { %v8146_v14 = vsel %vm679_vm4, %v3493_v0, %v3484_v52  ;;  %v4270_v0 = vld [vmem:[%s9314_s7 + $0xa0] sm:$0xff]  ;;  %v4268_v52 = vld [vmem:[%s9314_s7 + $0x90] sm:$0xff] }
 0x408   : > { %6373 = vmatprep.mubr.msk.f32.mxu0 %vm3511_vm6, %v8146_v14  ;;  %v6848_v43 = vpack.c.bf16 %v4270_v0, %v4266_v1  ;;  %v6912_v17 = vpack.c.bf16 %v4272_v13, %v4268_v52  ;;  %v4304_v1 = vld [vmem:[%s9314_s7 + $0x1b0] sm:$0xff]  ;;  %v4311_v0 = vld [vmem:[%s9314_s7 + $0x1e8] sm:$0xff]  ;;  %v4309_v52 = vld [vmem:[%s9314_s7 + $0x1d8] sm:$0xff] }
 0x409   : > { %6374 = vmatmul.mubr.msk.f32.gmra.mrb[130].mxu0 %vm3511_vm6, %v8149_v15  ;;  %v4313_v13 = vld [vmem:[%s9314_s7 + $0x1f8] sm:$0xff] }
 0x40a   : > { %6400 = vmatprep.mubr.msk.f32.mxu0 %vm3511_vm6, %v8008_v5 }
 0x40d   : > { %6401 = vmatmul.mubr.msk.f32.vlgmr.msra.gmra.mrb[132].mxu0 %vm3511_vm6, %v8012_v20 }
 0x40e   : > { %6403 = vmatprep.mubr.msk.f32.mxu0 %vm3511_vm6, %v8023_v58  ;;  %6817 = vmatpush3.bf16.msra.mxu0 %v8060_v49  ;;  %v6826_v49 = vpack.c.bf16 %v5343_v18, %v5342_v23  ;;  %v4276_v23 = vld [vmem:[%s9314_s7 + $0xd0] sm:$0xff] }
 0x40f   : > { %6819 = vmatprep.subr.bf16.mxu0 %v6818_v53  ;;  %v4280_v18 = vld [vmem:[%s9314_s7 + $0xf0] sm:$0xff] }
 0x410   : > { %v6916_v21 = vpack.c.bf16 %v4280_v18, %v4276_v23  ;;  %v4317_v23 = vld [vmem:[%s9314_s7 + $0x218] sm:$0xff] }
 0x411   : > { %6404 = vmatmul.mubr.msk.f32.gmra.mrb[134].mxu0 %vm3511_vm6, %v8032_v28  ;;  %v4321_v18 = vld [vmem:[%s9314_s7 + $0x238] sm:$0xff] }
 0x412   : > { %6406 = vmatprep.mubr.msk.f32.mxu0 %vm3511_vm6, %v8068_v61  ;;  %6821 = vmatpush3.bf16.msra.mxu0 %v6818_v53  ;;  %v4281_v53 = vld [vmem:[%s9314_s7 + $0xf8] sm:$0xff] }
 0x413   : > { %6823 = vmatprep.subr.bf16.mxu0 %v6822_v57 }
 0x415   : > { %6407 = vmatmul.mubr.msk.f32.gmra.mrb[136].mxu0 %vm3511_vm6, %v8071_v62 }
 0x416   : > { %6409 = vmatprep.mubr.msk.f32.mxu0 %vm3511_vm6, %v8082_v7  ;;  %6825 = vmatpush3.bf16.msra.mxu0 %v6822_v57  ;;  %v6914_v57 = vpack.c.bf16 %v4281_v53, %v4277_v10  ;;  %v4306_v10 = vld [vmem:[%s9314_s7 + $0x1c0] sm:$0xff]  ;;  %v6930_v53 = vpack.c.bf16 %v4313_v13, %v4309_v52 }
 0x417   : > { %6827 = vmatprep.subr.bf16.mxu0 %v6826_v49 }
 0x419   : > { %6410 = vmatmul.mubr.msk.f32.gmra.mrb[138].mxu0 %vm3511_vm6, %v8085_v8 }
 0x41a   : > { %6412 = vmatprep.mubr.msk.f32.mxu0 %vm3511_vm6, %v8096_v3  ;;  %6829 = vmatpush3.bf16.msra.mxu0 %v6826_v49  ;;  %v4283_v49 = vld [vmem:[%s9314_s7 + $0x108] sm:$0xff] }
 0x41b   : > { %6831 = vmatprep.subr.bf16.mxu0 %v6830_v19  ;;  %v6854_v26 = vpack.c.bf16 %v4287_v6, %v4283_v49 }
 0x41d   : > { %6413 = vmatmul.mubr.msk.f32.gmra.mrb[140].mxu0 %vm3511_vm6, %v8099_v16 }
 0x41e   : > { %6415 = vmatprep.mubr.msk.f32.mxu0 %vm3511_vm6, %v8110_v27  ;;  %6833 = vmatpush3.bf16.msra.mxu0 %v6830_v19  ;;  %v4289_v19 = vld [vmem:[%s9314_s7 + $0x138] sm:$0xff] }
 0x41f   : > { %6835 = vmatprep.subr.bf16.mxu0 %v6834_v32 }
 0x421   : > { %6416 = vmatmul.mubr.msk.f32.gmra.mrb[142].mxu0 %vm3511_vm6, %v8113_v29 }
 0x422   : > { %6418 = vmatprep.mubr.msk.f32.mxu0 %vm3511_vm6, %v8124_v11  ;;  %6837 = vmatpush3.bf16.msra.mxu0 %v6834_v32  ;;  %v4282_v32 = vld [vmem:[%s9314_s7 + $0x100] sm:$0xff] }
 0x425   : > { %6419 = vmatmul.mubr.msk.f32.gmra.mrb[144].mxu0 %vm3511_vm6, %v8127_v24 }
 0x426   : > { %6421 = vmatprep.mubr.msk.f32.mxu0 %vm3511_vm6, %v8146_v14 }
 0x429   : > { %6422 = vmatmul.mubr.msk.f32.gmra.mrb[146].mxu0 %vm3511_vm6, %v8149_v15 }
 0x42a   : > { %6448 = vmatprep.mubr.msk.f32.mxu0 %vm3511_vm6, %v8008_v5 }
 0x42d   : > { %6449 = vmatmul.mubr.msk.f32.vlgmr.msra.gmra.mrb[148].mxu0 %vm3511_vm6, %v8012_v20 }
 0x42e   : > { %6451 = vmatprep.mubr.msk.f32.mxu0 %vm3511_vm6, %v8023_v58 }
 0x431   : > { %6452 = vmatmul.mubr.msk.f32.gmra.mrb[150].mxu0 %vm3511_vm6, %v8032_v28 }
 0x432   : > { %6454 = vmatprep.mubr.msk.f32.mxu0 %vm3511_vm6, %v8068_v61 }
 0x435   : > { %6455 = vmatmul.mubr.msk.f32.gmra.mrb[152].mxu0 %vm3511_vm6, %v8071_v62 }
 0x436   : > { %6457 = vmatprep.mubr.msk.f32.mxu0 %vm3511_vm6, %v8082_v7 }
 0x439   : > { %6458 = vmatmul.mubr.msk.f32.gmra.mrb[154].mxu0 %vm3511_vm6, %v8085_v8 }
 0x43a   : > { %6460 = vmatprep.mubr.msk.f32.mxu0 %vm3511_vm6, %v8096_v3  ;;  %v4251_v3 = vld [vmem:[%s9314_s7 + $0x8] sm:$0xff] }
 0x43d   : > { %6461 = vmatmul.mubr.msk.f32.gmra.mrb[156].mxu0 %vm3511_vm6, %v8099_v16  ;;  %v4255_v16 = vld [vmem:[%s9314_s7 + $0x28] sm:$0xff] }
 0x43e   : > { %6463 = vmatprep.mubr.msk.f32.mxu0 %vm3511_vm6, %v8110_v27  ;;  %v4253_v27 = vld [vmem:[%s9314_s7 + $0x18] sm:$0xff] }
 0x43f   : > { %v6902_v36 = vpack.c.bf16 %v4257_v33, %v4253_v27  ;;  %v6918_v27 = vpack.c.bf16 %v4289_v19, %v4285_v30  ;;  %v4291_v33 = vld [vmem:[%s9314_s7 + $0x148] sm:$0xff]  ;;  %v4314_v19 = vld [vmem:[%s9314_s7 + $0x200] sm:$0xff] }
 0x440   : > { %v6858_v40 = vpack.c.bf16 %v4295_v35, %v4291_v33 }
 0x441   : > { %6464 = vmatmul.mubr.msk.f32.gmra.mrb[158].mxu0 %vm3511_vm6, %v8113_v29  ;;  %v6838_v29 = vpack.c.bf16 %v4255_v16, %v4251_v3  ;;  %6903 = vmatprep.subr.bf16.mxu0 %v6902_v36  ;;  %v4284_v3 = vld [vmem:[%s9314_s7 + $0x110] sm:$0xff]  ;;  %v4297_v36 = vld [vmem:[%s9314_s7 + $0x178] sm:$0xff] }
 0x442   : > { %6466 = vmatprep.mubr.msk.f32.mxu0 %vm3511_vm6, %v8124_v11  ;;  %6905 = vmatpush1.bf16.msra.mxu0 %v6904_v44  ;;  %v4269_v11 = vld [vmem:[%s9314_s7 + $0x98] sm:$0xff]  ;;  %v4294_v44 = vld [vmem:[%s9314_s7 + $0x160] sm:$0xff]  ;;  %v6922_v46 = vpack.c.bf16 %v4297_v36, %v4293_v22 }
 0x443   : > { %6839 = vmatprep.subr.bf16.mxu1 %v6838_v29  ;;  %6907 = vmatprep.subr.bf16.mxu0 %v6906_v50  ;;  %v4288_v29 = vld [vmem:[%s9314_s7 + $0x130] sm:$0xff]  ;;  %v4303_v50 = vld [vmem:[%s9314_s7 + $0x1a8] sm:$0xff]  ;;  %v6860_v60 = vpack.c.bf16 %v4294_v44, %v4290_v42  ;;  %v4322_v36 = vld [vmem:[%s9314_s7 + $0x240] sm:$0xff] }
 0x444   : > { %6841 = vmatpush1.bf16.msra.mxu1 %v6840_v38  ;;  %v6856_v38 = vpack.c.bf16 %v4286_v34, %v4282_v32  ;;  %v6920_v39 = vpack.c.bf16 %v4288_v29, %v4284_v3  ;;  %v4320_v32 = vld [vmem:[%s9314_s7 + $0x230] sm:$0xff]  ;;  %v4323_v34 = vld [vmem:[%s9314_s7 + $0x248] sm:$0xff]  ;;  %v4329_v29 = vld [vmem:[%s9314_s7 + $0x278] sm:$0xff] }
 0x445   : > { %6467 = vmatmul.mubr.msk.f32.gmra.mrb[160].mxu0 %vm3511_vm6, %v8127_v24  ;;  %6843 = vmatprep.subr.bf16.mxu1 %v6842_v48  ;;  %v4273_v24 = vld [vmem:[%s9314_s7 + $0xb8] sm:$0xff]  ;;  %v4299_v48 = vld [vmem:[%s9314_s7 + $0x188] sm:$0xff]  ;;  %v4328_v42 = vld [vmem:[%s9314_s7 + $0x270] sm:$0xff] }
 0x446   : > { %6469 = vmatprep.mubr.msk.f32.mxu0 %vm3511_vm6, %v8146_v14  ;;  %v6910_v12 = vpack.c.bf16 %v4273_v24, %v4269_v11  ;;  %v4275_v14 = vld [vmem:[%s9314_s7 + $0xc8] sm:$0xff]  ;;  %6909 = vmatpush1.bf16.msra.mxu0 %v6908_v4  ;;  %v6862_v25 = vpack.c.bf16 %v4303_v50, %v4299_v48  ;;  %v4302_v4 = vld [vmem:[%s9314_s7 + $0x1a0] sm:$0xff]  ;;  %v6926_v24 = vpack.c.bf16 %v4305_v59, %v4301_v51 }
 0x447   : > { %v4327_v3 = vld [vmem:[%s9314_s7 + $0x268] sm:$0xff]  ;;  %v4330_v59 = vld [vmem:[%s9314_s7 + $0x280] sm:$0xff] }
 0x448   : > { %6845 = vmatpush1.bf16.msra.mxu1 %v6844_v63  ;;  %6911 = vmatprep.subr.bf16.mxu0 %v6910_v12  ;;  %v4307_v12 = vld [vmem:[%s9314_s7 + $0x1c8] sm:$0xff]  ;;  %v6874_v22 = vpack.c.bf16 %v4327_v3, %v4323_v34 }
 0x449   : > { %6470 = vmatmul.mubr.msk.f32.gmra.mrb[162].mxu0 %vm3511_vm6, %v8149_v15  ;;  %v4279_v15 = vld [vmem:[%s9314_s7 + $0xe8] sm:$0xff]  ;;  %6847 = vmatprep.subr.bf16.mxu1 %v6846_v37  ;;  %v4300_v37 = vld [vmem:[%s9314_s7 + $0x190] sm:$0xff] }
 0x44a   : > { %v6850_v9 = vpack.c.bf16 %v4279_v15, %v4275_v14  ;;  %6913 = vmatpush1.bf16.msra.mxu0 %v6912_v17  ;;  %v6928_v14 = vpack.c.bf16 %v4304_v1, %v4300_v37  ;;  %v6866_v15 = vpack.c.bf16 %v4311_v0, %v4307_v12  ;;  %v4310_v17 = vld [vmem:[%s9314_s7 + $0x1e0] sm:$0xff]  ;;  %v4331_v44 = vld [vmem:[%s9314_s7 + $0x288] sm:$0xff] }
 0x44b   : > { %6915 = vmatprep.subr.bf16.mxu0 %v6914_v57  ;;  %v4319_v57 = vld [vmem:[%s9314_s7 + $0x228] sm:$0xff]  ;;  %v6868_v49 = vpack.c.bf16 %v4310_v17, %v4306_v10  ;;  %v6878_v51 = vpack.c.bf16 %v4335_v45, %v4331_v44 }
 0x44c   : > { %6849 = vmatpush1.bf16.msra.mxu1 %v6848_v43  ;;  %v6864_v43 = vpack.c.bf16 %v4302_v4, %v4298_v2  ;;  %v6870_v30 = vpack.c.bf16 %v4319_v57, %v4315_v31  ;;  %v4336_v2 = vld [vmem:[%s9314_s7 + $0x2b0] sm:$0xff] }
 0x44d   : > { %6851 = vmatprep.subr.bf16.mxu1 %v6850_v9  ;;  %v4308_v9 = vld [vmem:[%s9314_s7 + $0x1d0] sm:$0xff] }
 0x44e   : > { %6917 = vmatpush1.bf16.msra.mxu0 %v6916_v21  ;;  %v6932_v6 = vpack.c.bf16 %v4312_v55, %v4308_v9  ;;  %v4316_v21 = vld [vmem:[%s9314_s7 + $0x210] sm:$0xff] }
 0x44f   : > { %6919 = vmatprep.subr.bf16.mxu0 %v6918_v27  ;;  %v4325_v27 = vld [vmem:[%s9314_s7 + $0x258] sm:$0xff]  ;;  %v6936_v35 = vpack.c.bf16 %v4320_v32, %v4316_v21 }
 0x450   : > { %6853 = vmatpush1.bf16.msra.mxu1 %v6852_v54  ;;  %v4318_v54 = vld [vmem:[%s9314_s7 + $0x220] sm:$0xff] }
 0x451   : > { %6855 = vmatprep.subr.bf16.mxu1 %v6854_v26  ;;  %v6934_v26 = vpack.c.bf16 %v4321_v18, %v4317_v23  ;;  %v6872_v33 = vpack.c.bf16 %v4318_v54, %v4314_v19 }
 0x452   : > { %6921 = vmatpush1.bf16.msra.mxu0 %v6920_v39  ;;  %v4324_v39 = vld [vmem:[%s9314_s7 + $0x250] sm:$0xff] }
 0x453   : > { %6923 = vmatprep.subr.bf16.mxu0 %v6922_v46  ;;  %v4333_v46 = vld [vmem:[%s9314_s7 + $0x298] sm:$0xff]  ;;  %v6940_v50 = vpack.c.bf16 %v4328_v42, %v4324_v39 }
 0x454   : > { %6857 = vmatpush1.bf16.msra.mxu1 %v6856_v38  ;;  %v4326_v38 = vld [vmem:[%s9314_s7 + $0x260] sm:$0xff] }
 0x455   : > { %6859 = vmatprep.subr.bf16.mxu1 %v6858_v40  ;;  %v6938_v40 = vpack.c.bf16 %v4329_v29, %v4325_v27  ;;  %v6876_v48 = vpack.c.bf16 %v4326_v38, %v4322_v36 }
 0x456   : > { %6925 = vmatpush1.bf16.msra.mxu0 %v6924_v41  ;;  %v6942_v41 = vpack.c.bf16 %v4337_v47, %v4333_v46 }
 0x457   : > { %6927 = vmatprep.subr.bf16.mxu0 %v6926_v24 }
 0x458   : > { %6861 = vmatpush1.bf16.msra.mxu1 %v6860_v60  ;;  %v4334_v60 = vld [vmem:[%s9314_s7 + $0x2a0] sm:$0xff] }
 0x459   : > { %6863 = vmatprep.subr.bf16.mxu1 %v6862_v25  ;;  %v4332_v25 = vld [vmem:[%s9314_s7 + $0x290] sm:$0xff]  ;;  %v6880_v4 = vpack.c.bf16 %v4334_v60, %v4330_v59 }
 0x45a   : > { %6929 = vmatpush1.bf16.msra.mxu0 %v6928_v14  ;;  %v6944_v37 = vpack.c.bf16 %v4336_v2, %v4332_v25 }
 0x45b   : > { %6931 = vmatprep.subr.bf16.mxu0 %v6930_v53 }
 0x45c   : > { %6865 = vmatpush1.bf16.msra.mxu1 %v6864_v43 }
 0x45d   : > { %6867 = vmatprep.subr.bf16.mxu1 %v6866_v15 }
 0x45e   : > { %6933 = vmatpush1.bf16.msra.mxu0 %v6932_v6 }
 0x45f   : > { %6935 = vmatprep.subr.bf16.mxu0 %v6934_v26 }
 0x460   : > { %6869 = vmatpush1.bf16.msra.mxu1 %v6868_v49 }
 0x461   : > { %6871 = vmatprep.subr.bf16.mxu1 %v6870_v30 }
 0x462   : > { %6937 = vmatpush1.bf16.msra.mxu0 %v6936_v35 }
 0x463   : > { %6939 = vmatprep.subr.bf16.mxu0 %v6938_v40 }
 0x464   : > { %6873 = vmatpush1.bf16.msra.mxu1 %v6872_v33 }
 0x465   : > { %6875 = vmatprep.subr.bf16.mxu1 %v6874_v22 }
 0x466   : > { %6941 = vmatpush1.bf16.msra.mxu0 %v6940_v50 }
 0x467   : > { %6943 = vmatprep.subr.bf16.mxu0 %v6942_v41 }
 0x468   : > { %6877 = vmatpush1.bf16.msra.mxu1 %v6876_v48 }
 0x469   : > { %6879 = vmatprep.subr.bf16.mxu1 %v6878_v51 }
 0x46a   : > { %6945 = vmatpush1.bf16.msra.mxu0 %v6944_v37 }
 0x46c   : > { %6881 = vmatpush1.bf16.msra.mxu1 %v6880_v4 }
 0x47f   : > { %v8268_v5 = vpop.f32.mrb[116].mxu0 }
 0x480   : > { %v8270_v20 = vpop.f32.mrb[117].mxu0 }
 0x483   : > { %v8272_v58 = vpop.f32.mrb[118].mxu0 }
 0x484   : > { %v8274_v28 = vpop.f32.mrb[119].mxu0 }
 0x498   : > { %v8276_v61 = vpop.f32.mrb[120].mxu0 }
 0x499   : > { %v8278_v62 = vpop.f32.mrb[121].mxu0 }
 0x4a0   : > { %v8280_v7 = vpop.f32.mrb[122].mxu0 }
 0x4a1   : > { %v8282_v8 = vpop.f32.mrb[123].mxu0 }
 0x4b8   : > { %v8392_v56 = vpop.f32.mrb[124].mxu0 }
 0x4b9   : > { %v8403_v16 = vpop.f32.mrb[125].mxu0 }
 0x4c0   : > { %v8444_v63 = vpop.f32.mrb[126].mxu0 }
 0x4c1   : > { %v8455_v11 = vpop.f32.mrb[127].mxu0 }
 0x4d8   : > { %v6372_v24 = vpop.f32.mrb[128].mxu0 }
 0x4d9   : > { %v3686_v1 = vpop.f32.mrb[129].mxu0 }
 0x4dc   : > { %v6375_v12 = vpop.f32.mrb[130].mxu0 }
 0x4dd   : > { %v3696_v0 = vpop.f32.mrb[131].mxu0 }
 0x4e0   : > { %v6402_v52 = vpop.f32.mrb[132].mxu0 }
 0x4e1   : > { %v3880_v13 = vrot.slane %v6402_v52, 1  ;;  %v3784_v43 = vpop.f32.mrb[133].mxu0 }
 0x4e2   : > { %v3879_v14 = vrot.slane %v3784_v43, 1 }
 0x4e3   : > { %v3912_v15 = vadd.f32 %v8268_v5, %v3880_v13 }
 0x4e4   : > { %v3911_v10 = vadd.f32 %v3879_v14, %v8270_v20  ;;  %v6405_v17 = vpop.f32.mrb[134].mxu0  ;;  %v4339_v14 = vld [vmem:[%s9314_s7 + $0x2c8] sm:$0xff] }
 0x4e5   : > { %v3882_v9 = vrot.slane %v6405_v17, 1  ;;  %v3794_v53 = vpop.f32.mrb[135].mxu0 }
 0x4e6   : > { %v3881_v55 = vrot.slane %v3794_v53, 1 }
 0x4e7   : > { %v3914_v31 = vadd.f32 %v8272_v58, %v3882_v9 }
 0x4e8   : > { %v3913_v57 = vadd.f32 %v3881_v55, %v8274_v28  ;;  %v6408_v23 = vpop.f32.mrb[136].mxu0 }
 0x4e9   : > { %v3884_v18 = vrot.slane %v6408_v23, 1  ;;  %v3804_v49 = vpop.f32.mrb[137].mxu0  ;;  %v4342_v23 = vld [vmem:[%s9314_s7 + $0x2e0] sm:$0xff] }
 0x4ea   : > { %v3883_v6 = vrot.slane %v3804_v49, 1 }
 0x4eb   : > { %v3916_v30 = vadd.f32 %v8276_v61, %v3884_v18 }
 0x4ec   : > { %v3915_v19 = vadd.f32 %v3883_v6, %v8278_v62  ;;  %v6411_v54 = vpop.f32.mrb[138].mxu0 }
 0x4ed   : > { %v3886_v5 = vrot.slane %v6411_v54, 1  ;;  %v3814_v21 = vpop.f32.mrb[139].mxu0  ;;  %v4344_v54 = vld [vmem:[%s9314_s7 + $0x2f0] sm:$0xff] }
 0x4ee   : > { %v3885_v20 = vrot.slane %v3814_v21, 1 }
 0x4ef   : > { %v8563_v26 = vadd.f32 %v8280_v7, %v3886_v5 }
 0x4f0   : > { %v8566_v32 = vadd.f32 %v3885_v20, %v8282_v8  ;;  %v6414_v58 = vpop.f32.mrb[140].mxu0 }
 0x4f1   : > { %v3888_v28 = vrot.slane %v6414_v58, 1  ;;  %v3824_v34 = vpop.f32.mrb[141].mxu0 }
 0x4f2   : > { %v3887_v3 = vrot.slane %v3824_v34, 1 }
 0x4f3   : > { %v8569_v27 = vadd.f32 %v8392_v56, %v3888_v28 }
 0x4f4   : > { %v8572_v61 = vadd.f32 %v3887_v3, %v8403_v16  ;;  %v6417_v62 = vpop.f32.mrb[142].mxu0  ;;  %v4347_v3 = vld [vmem:[%s9314_s7 + $0x308] sm:$0xff] }
 0x4f5   : > { %v3890_v29 = vrot.slane %v6417_v62, 1  ;;  %v3834_v33 = vpop.f32.mrb[143].mxu0  ;;  %v4351_v62 = vld [vmem:[%s9314_s7 + $0x328] sm:$0xff] }
 0x4f6   : > { %v3889_v35 = vrot.slane %v3834_v33, 1 }
 0x4f7   : > { %v8575_v7 = vadd.f32 %v8444_v63, %v3890_v29 }
 0x4f8   : > { %v8578_v8 = vadd.f32 %v3889_v35, %v8455_v11  ;;  %v6420_v22 = vpop.f32.mrb[144].mxu0 }
 0x4f9   : > { %v3892_v36 = vrot.slane %v6420_v22, 1  ;;  %v3844_v38 = vpop.f32.mrb[145].mxu0  ;;  %v6886_v22 = vpack.c.bf16 %v4351_v62, %v4347_v3  ;;  %v4368_v3 = vld [vmem:[%s9314_s7 + $0x3b0] sm:$0xff] }
 0x4fa   : > { %v3891_v39 = vrot.slane %v3844_v38, 1  ;;  %v4346_v38 = vld [vmem:[%s9314_s7 + $0x300] sm:$0xff] }
 0x4fb   : > { %v8580_v40 = vadd.f32 %v6372_v24, %v3892_v36  ;;  %v4353_v36 = vld [vmem:[%s9314_s7 + $0x338] sm:$0xff] }
 0x4fc   : > { %v8582_v56 = vadd.f32 %v3891_v39, %v3686_v1  ;;  %v6423_v16 = vpop.f32.mrb[146].mxu0  ;;  %v4350_v39 = vld [vmem:[%s9314_s7 + $0x320] sm:$0xff] }
 0x4fd   : > { %v3894_v42 = vrot.slane %v6423_v16, 1  ;;  %v3854_v44 = vpop.f32.mrb[147].mxu0 }
 0x4fe   : > { %v3893_v45 = vrot.slane %v3854_v44, 1 }
 0x4ff   : > { %v8584_v46 = vadd.f32 %v6375_v12, %v3894_v42 }
 0x500   : > { %v8586_v47 = vadd.f32 %v3893_v45, %v3696_v0  ;;  %v6450_v63 = vpop.f32.mrb[148].mxu0 }
 0x501   : > { %v4102_v48 = vrot.slane %v6450_v63, 2  ;;  %v4006_v11 = vpop.f32.mrb[149].mxu0  ;;  %v4348_v63 = vld [vmem:[%s9314_s7 + $0x310] sm:$0xff] }
 0x502   : > { %v4101_v50 = vrot.slane %v4006_v11, 2 }
 0x503   : > { %v4134_v51 = vadd.f32 %v4102_v48, %v3912_v15  ;;  %v4343_v15 = vld [vmem:[%s9314_s7 + $0x2e8] sm:$0xff]  ;;  %v4352_v48 = vld [vmem:[%s9314_s7 + $0x330] sm:$0xff] }
 0x504   : > { %v4133_v59 = vadd.f32 %v4101_v50, %v3911_v10  ;;  %v6453_v60 = vpop.f32.mrb[150].mxu0  ;;  %v4341_v10 = vld [vmem:[%s9314_s7 + $0x2d8] sm:$0xff]  ;;  %v6882_v55 = vpack.c.bf16 %v4343_v15, %v4339_v14  ;;  %v4358_v14 = vld [vmem:[%s9314_s7 + $0x360] sm:$0xff]  ;;  %v4356_v15 = vld [vmem:[%s9314_s7 + $0x350] sm:$0xff] }
 0x505   : > { %v4104_v41 = vrot.slane %v6453_v60, 2  ;;  %v4016_v25 = vpop.f32.mrb[151].mxu0  ;;  %v4355_v60 = vld [vmem:[%s9314_s7 + $0x348] sm:$0xff] }
 0x506   : > { %v4103_v2 = vrot.slane %v4016_v25, 2  ;;  %6883 = vmatprep.subr.bf16.mxu1 %v6882_v55 }
 0x507   : > { %v4136_v4 = vadd.f32 %v4104_v41, %v3914_v31  ;;  %v4345_v31 = vld [vmem:[%s9314_s7 + $0x2f8] sm:$0xff]  ;;  %v4359_v41 = vld [vmem:[%s9314_s7 + $0x368] sm:$0xff] }
 0x508   : > { %v4135_v37 = vadd.f32 %v4103_v2, %v3913_v57  ;;  %v6456_v24 = vpop.f32.mrb[152].mxu0  ;;  %v4338_v57 = vld [vmem:[%s9314_s7 + $0x2c0] sm:$0xff]  ;;  %v6946_v6 = vpack.c.bf16 %v4345_v31, %v4341_v10  ;;  %v4360_v10 = vld [vmem:[%s9314_s7 + $0x370] sm:$0xff]  ;;  %v6890_v55 = vpack.c.bf16 %v4359_v41, %v4355_v60  ;;  %v4363_v31 = vld [vmem:[%s9314_s7 + $0x388] sm:$0xff] }
 0x509   : > { %v4106_v1 = vrot.slane %v6456_v24, 2  ;;  %v4026_v52 = vpop.f32.mrb[153].mxu0  ;;  %v6888_v24 = vpack.c.bf16 %v4350_v39, %v4346_v38  ;;  %v4370_v60 = vld [vmem:[%s9314_s7 + $0x3c0] sm:$0xff] }
 0x50a   : > { %v4105_v13 = vrot.slane %v4026_v52, 2  ;;  %6947 = vmatprep.subr.bf16.mxu0 %v6946_v6  ;;  %v4354_v52 = vld [vmem:[%s9314_s7 + $0x340] sm:$0xff] }
 0x50b   : > { %v4138_v12 = vadd.f32 %v4106_v1, %v3916_v30  ;;  %v6884_v30 = vpack.c.bf16 %v4342_v23, %v4338_v57  ;;  %v4361_v1 = vld [vmem:[%s9314_s7 + $0x378] sm:$0xff]  ;;  %v4367_v57 = vld [vmem:[%s9314_s7 + $0x3a8] sm:$0xff]  ;;  %v4374_v41 = vld [vmem:[%s9314_s7 + $0x3e0] sm:$0xff] }
 0x50c   : > { %v4137_v43 = vadd.f32 %v4105_v13, %v3915_v19  ;;  %v6459_v0 = vpop.f32.mrb[154].mxu0  ;;  %v4340_v19 = vld [vmem:[%s9314_s7 + $0x2d0] sm:$0xff]  ;;  %v4365_v23 = vld [vmem:[%s9314_s7 + $0x398] sm:$0xff] }
 0x50d   : > { %v4150_v17 = vmax.f32 %v4134_v51, %v4138_v12  ;;  %v4108_v9 = vrot.slane %v6459_v0, 2  ;;  %v4036_v53 = vpop.f32.mrb[155].mxu0  ;;  %v6948_v20 = vpack.c.bf16 %v4344_v54, %v4340_v19  ;;  %6885 = vmatpush1.bf16.msra.mxu1 %v6884_v30  ;;  %v6952_v0 = vpack.c.bf16 %v4352_v48, %v4348_v63  ;;  %v4369_v19 = vld [vmem:[%s9314_s7 + $0x3b8] sm:$0xff]  ;;  %v4362_v54 = vld [vmem:[%s9314_s7 + $0x380] sm:$0xff]  ;;  %v4375_v63 = vld [vmem:[%s9314_s7 + $0x3e8] sm:$0xff] }
 0x50e   : > { %v4149_v18 = vmax.f32 %v4133_v59, %v4137_v43  ;;  %v4107_v49 = vrot.slane %v4036_v53, 2  ;;  %6887 = vmatprep.subr.bf16.mxu1 %v6886_v22  ;;  %v6958_v22 = vpack.c.bf16 %v4369_v19, %v4365_v23 }
 0x50f   : > { %v4158_v5 = vrot.slane %v4150_v17, 1  ;;  %v4140_v21 = vadd.f32 %v4108_v9, %v8563_v26  ;;  %v4349_v26 = vld [vmem:[%s9314_s7 + $0x318] sm:$0xff]  ;;  %6949 = vmatpush1.bf16.msra.mxu0 %v6948_v20 }
 0x510   : > { %v4157_v58 = vrot.slane %v4149_v18, 1  ;;  %v4139_v28 = vadd.f32 %v4107_v49, %v8566_v32  ;;  %v6462_v34 = vpop.f32.mrb[156].mxu0  ;;  %v6950_v45 = vpack.c.bf16 %v4353_v36, %v4349_v26 }
 0x511   : > { %v4166_v29 = vmax.f32 %v4150_v17, %v4158_v5  ;;  %v4152_v33 = vmax.f32 %v4136_v4, %v4140_v21  ;;  %v4110_v35 = vrot.slane %v6462_v34, 2  ;;  %v4046_v32 = vpop.f32.mrb[157].mxu0  ;;  %6889 = vmatpush1.bf16.msra.mxu1 %v6888_v24  ;;  %v4366_v5 = vld [vmem:[%s9314_s7 + $0x3a0] sm:$0xff]  ;;  %v4364_v34 = vld [vmem:[%s9314_s7 + $0x390] sm:$0xff] }
 0x512   : > { %v4165_v16 = vmax.f32 %v4149_v18, %v4157_v58  ;;  %v4151_v42 = vmax.f32 %v4135_v37, %v4139_v28  ;;  %v4109_v44 = vrot.slane %v4046_v32, 2  ;;  %6951 = vmatprep.subr.bf16.mxu0 %v6950_v45  ;;  %6891 = vmatprep.subr.bf16.mxu1 %v6890_v55  ;;  %v6892_v28 = vpack.c.bf16 %v4358_v14, %v4354_v52  ;;  %v4371_v45 = vld [vmem:[%s9314_s7 + $0x3c8] sm:$0xff]  ;;  %v4372_v24 = vld [vmem:[%s9314_s7 + $0x3d0] sm:$0xff] }
 0x513   : > { %v4193_v11 = vrot.slane %v4166_v29, 7  ;;  %v4204_v50 = vrot.slane %v4166_v29, 1  ;;  %v4160_v51 = vrot.slane %v4152_v33, 1  ;;  %v8639_v59 = vadd.f32 %v4110_v35, %v8569_v27  ;;  %v4357_v27 = vld [vmem:[%s9314_s7 + $0x358] sm:$0xff]  ;;  %6953 = vmatpush1.bf16.msra.mxu0 %v6952_v0 }
 0x514   : > { %v4203_v25 = vrot.slane %v4165_v16, 2  ;;  %v4159_v2 = vrot.slane %v4151_v42, 1  ;;  %v8648_v4 = vadd.f32 %v4109_v44, %v8572_v61  ;;  %v6465_v37 = vpop.f32.mrb[158].mxu0  ;;  %v6954_v30 = vpack.c.bf16 %v4361_v1, %v4357_v27  ;;  %v4376_v27 = vld [vmem:[%s9314_s7 + $0x3f0] sm:$0xff] }
 0x515   : > { %v4168_v13 = vmax.f32 %v4152_v33, %v4160_v51  ;;  %v4112_v12 = vrot.slane %v6465_v37, 2  ;;  %v4056_v43 = vpop.f32.mrb[159].mxu0  ;;  %v4195_v61 = vsel %vm4194_vm7, %v4193_v11, %v4165_v16  ;;  %v6956_v33 = vpack.c.bf16 %v4360_v10, %v4356_v15  ;;  %6893 = vmatpush1.bf16.msra.mxu1 %v6892_v28 }
 0x516   : > { %v4167_v17 = vmax.f32 %v4151_v42, %v4159_v2  ;;  %v4111_v9 = vrot.slane %v4056_v43, 2  ;;  %v4205_v53 = vsel %vm4194_vm7, %v4204_v50, %v4203_v25  ;;  %6955 = vmatprep.subr.bf16.mxu0 %v6954_v30  ;;  %v6896_v36 = vpack.c.bf16 %v4366_v5, %v4362_v54 }
 0x517   : > { %v4144_v18 = vadd.f32 %v4112_v12, %v8575_v7  ;;  %v4207_v49 = vrot.slane %v4168_v13, 7  ;;  %v4199_v6 = vrot.slane %v4168_v13, 5  ;;  %6957 = vmatpush1.bf16.msra.mxu0 %v6956_v33  ;;  %v6960_v16 = vpack.c.bf16 %v4368_v3, %v4364_v34 }
 0x518   : > { %v4196_v21 = vrot.slane %v4167_v17, 6  ;;  %v4143_v20 = vadd.f32 %v4111_v9, %v8578_v8  ;;  %v6468_v7 = vpop.f32.mrb[160].mxu0  ;;  %v4206_v58 = vsel %vm4197_vm8, %v4167_v17, %v4205_v53  ;;  %v6894_v8 = vpack.c.bf16 %v4367_v57, %v4363_v31  ;;  %6959 = vmatprep.subr.bf16.mxu0 %v6958_v22  ;;  %v6302_v9 = vpop.f32.mrb[44].mxu1  ;;  %v4549_v53 = vld [vmem:[%s9316_s9 + $0x18] sm:$0xff] }
 0x519   : > { %v4114_v62 = vrot.slane %v6468_v7, 2  ;;  %v4066_v26 = vpop.f32.mrb[161].mxu0  ;;  %v4208_v29 = vsel %vm4200_vm9, %v4207_v49, %v4206_v58  ;;  %v6898_v51 = vpack.c.bf16 %v4375_v63, %v4371_v45  ;;  %v6900_v37 = vpack.c.bf16 %v4374_v41, %v4370_v60  ;;  %v3206_v31 = vpop.f32.mrb[45].mxu1  ;;  %v4546_v63 = vld [vmem:[%s9316_s9] sm:$0xff]  ;;  %v4564_v9 = vld [vmem:[%s9316_s9 + $0x90] sm:$0xff] }
 0x51a   : > { %v4113_v35 = vrot.slane %v4066_v26, 2  ;;  %4209 = vrot.lane.b32.xlu1 %v4208_v29, %s9334_s17  ;;  %v4198_v32 = vsel %vm4197_vm8, %v4196_v21, %v4195_v61  ;;  %6895 = vmatprep.subr.bf16.mxu1 %v6894_v8  ;;  %v6964_v13 = vpack.c.bf16 %v4376_v27, %v4372_v24  ;;  %v6305_v49 = vpop.f32.mrb[46].mxu1  ;;  %v4236_v29 = vlaneseq  ;;  %v4550_v41 = vld [vmem:[%s9316_s9 + $0x20] sm:$0xff] }
 0x51b   : > { %v4146_v38 = vadd.f32 %v4114_v62, %v8580_v40  ;;  %v8702_v39 = vsel %vm4200_vm9, %v4199_v6, %v4198_v32  ;;  %v4373_v40 = vld [vmem:[%s9314_s7 + $0x3d8] sm:$0xff]  ;;  %6897 = vmatpush1.bf16.msra.mxu1 %v6896_v36  ;;  %6961 = vmatpush1.bf16.msra.mxu0 %v6960_v16  ;;  %v3216_v19 = vpop.f32.mrb[47].mxu1  ;;  %v4554_v27 = vld [vmem:[%s9316_s9 + $0x40] sm:$0xff] }
 0x51c   : > { %v4145_v42 = vadd.f32 %v4113_v35, %v8582_v56  ;;  %v6471_v44 = vpop.f32.mrb[162].mxu0  ;;  %v4377_v56 = vld [vmem:[%s9314_s7 + $0x3f8] sm:$0xff]  ;;  %6899 = vmatprep.subr.bf16.mxu1 %v6898_v51  ;;  %v6324_v5 = vpop.f32.mrb[48].mxu1  ;;  %v8746_v33 = vshrl.u32 %v4236_v29, 7  ;;  %v4234_v35 = vld [vmem:[%s9311_s4] sm:$0x3] }
 0x51d   : > { %v4170_v48 = vmax.f32 %v8639_v59, %v4146_v38  ;;  %v4116_v11 = vrot.slane %v6471_v44, 2  ;;  %v4076_v50 = vpop.f32.mrb[163].mxu0  ;;  %v6962_v59 = vpack.c.bf16 %v4377_v56, %v4373_v40  ;;  %v3291_v7 = vpop.f32.mrb[49].mxu1  ;;  %v4548_v40 = vld [vmem:[%s9316_s9 + $0x10] sm:$0xff]  ;;  %v4566_v31 = vld [vmem:[%s9316_s9 + $0xa0] sm:$0xff]  ;;  %v4577_v5 = vld [vmem:[%s9316_s9 + $0xf8] sm:$0xff] }
 0x51e   : > { %v4169_v25 = vmax.f32 %v8648_v4, %v4145_v42  ;;  %v4115_v2 = vrot.slane %v4076_v50, 2  ;;  %v6327_v34 = vpop.f32.mrb[50].mxu1  ;;  %v8749_v8 = vsub.s32 0, %v8746_v33  ;;  %v8755_v32 = vsub.s32 1, %v8746_v33  ;;  %v4572_v19 = vld [vmem:[%s9316_s9 + $0xd0] sm:$0xff]  ;;  %v4574_v7 = vld [vmem:[%s9316_s9 + $0xe0] sm:$0xff] }
 0x51f   : > { %v4178_v1 = vrot.slane %v4170_v48, 1  ;;  %v4148_v52 = vadd.f32 %v4116_v11, %v8584_v46  ;;  %6963 = vmatprep.subr.bf16.mxu0 %v6962_v59  ;;  %6901 = vmatpush1.bf16.msra.mxu1 %v6900_v37  ;;  %v4547_v46 = vld [vmem:[%s9316_s9 + $0x8] sm:$0xff]  ;;  %v3301_v62 = vpop.f32.mrb[51].mxu1  ;;  %v6968_v51 = vpack.c.bf16 %v4548_v40, %v4546_v63  ;;  %v4557_v59 = vld [vmem:[%s9316_s9 + $0x58] sm:$0xff]  ;;  %v4580_v29 = vld [vmem:[%s9316_s9 + $0x110] sm:$0xff] }
 0x520   : > { %v4177_v12 = vrot.slane %v4169_v25, 1  ;;  %v4147_v4 = vadd.f32 %v4115_v2, %v8586_v47  ;;  %6965 = vmatpush1.bf16.msra.mxu0 %v6964_v13  ;;  %v6966_v57 = vpack.c.bf16 %v4549_v53, %v4547_v46  ;;  %v4239_v36 = vrot.slane %v4234_v35, %v8749_v8  ;;  %v4551_v11 = vld [vmem:[%s9316_s9 + $0x28] sm:$0xff]  ;;  %v4561_v13 = vld [vmem:[%s9316_s9 + $0x78] sm:$0xff] }
 0x521   : > { %v4186_v43 = vmax.f32 %v4170_v48, %v4178_v1  ;;  %v4172_v61 = vmax.f32 %v4144_v18, %v4148_v52  ;;  %v4243_v16 = vrot.slane %v4234_v35, %v8755_v32  ;;  %v4555_v2 = vld [vmem:[%s9316_s9 + $0x48] sm:$0xff]  ;;  %v4556_v1 = vld [vmem:[%s9316_s9 + $0x50] sm:$0xff]  ;;  %v4569_v53 = vld [vmem:[%s9316_s9 + $0xb8] sm:$0xff] }
 0x522   : > { %v4185_v0 = vmax.f32 %v4169_v25, %v4177_v12  ;;  %v4171_v14 = vmax.f32 %v4143_v20, %v4147_v4  ;;  %6967 = vmatprep.subr.bf16.mxu1 %v6966_v57  ;;  %v4552_v25 = vld [vmem:[%s9316_s9 + $0x30] sm:$0xff]  ;;  %v6974_v24 = vpack.c.bf16 %v4557_v59, %v4555_v2  ;;  %v4559_v52 = vld [vmem:[%s9316_s9 + $0x68] sm:$0xff]  ;;  %v6976_v12 = vpack.c.bf16 %v4556_v1, %v4554_v27  ;;  %v4581_v34 = vld [vmem:[%s9316_s9 + $0x118] sm:$0xff] }
 0x523   : > { %v4216_v15 = vrot.slane %v4186_v43, 7  ;;  %v4224_v10 = vrot.slane %v4186_v43, 1  ;;  %v4180_v17 = vrot.slane %v4172_v61, 1  ;;  %v6972_v37 = vpack.c.bf16 %v4552_v25, %v4550_v41  ;;  %v4558_v43 = vld [vmem:[%s9316_s9 + $0x60] sm:$0xff]  ;;  %v4567_v46 = vld [vmem:[%s9316_s9 + $0xa8] sm:$0xff]  ;;  %v4568_v57 = vld [vmem:[%s9316_s9 + $0xb0] sm:$0xff] }
 0x524   : > { %v4223_v47 = vrot.slane %v4185_v0, 2  ;;  %v4179_v55 = vrot.slane %v4171_v14, 1  ;;  %v6978_v4 = vpack.c.bf16 %v4561_v13, %v4559_v52  ;;  %v6988_v49 = vpack.c.bf16 %v4568_v57, %v4566_v31  ;;  %v4583_v35 = vld [vmem:[%s9316_s9 + $0x128] sm:$0xff]  ;;  %v4592_v41 = vld [vmem:[%s9316_s9 + $0x170] sm:$0xff]  ;;  %v4597_v2 = vld [vmem:[%s9316_s9 + $0x198] sm:$0xff] }
 0x525   : > { %v4188_v23 = vmax.f32 %v4172_v61, %v4180_v17  ;;  %v4217_v18 = vsel %vm4194_vm7, %v4216_v15, %v4185_v0  ;;  %v4560_v61 = vld [vmem:[%s9316_s9 + $0x70] sm:$0xff]  ;;  %v4563_v0 = vld [vmem:[%s9316_s9 + $0x88] sm:$0xff]  ;;  %v4562_v17 = vld [vmem:[%s9316_s9 + $0x80] sm:$0xff] }
 0x526   : > { %v4187_v6 = vmax.f32 %v4171_v14, %v4179_v55  ;;  %v4225_v30 = vsel %vm4194_vm7, %v4224_v10, %v4223_v47  ;;  %v4565_v14 = vld [vmem:[%s9316_s9 + $0x98] sm:$0xff]  ;;  %v6980_v15 = vpack.c.bf16 %v4560_v61, %v4558_v43  ;;  %v6984_v47 = vpack.c.bf16 %v4564_v9, %v4562_v17  ;;  %v4595_v25 = vld [vmem:[%s9316_s9 + $0x188] sm:$0xff]  ;;  %v4596_v27 = vld [vmem:[%s9316_s9 + $0x190] sm:$0xff] }
 0x527   : > { %v4227_v54 = vrot.slane %v4188_v23, 7  ;;  %v4220_v28 = vrot.slane %v4188_v23, 5  ;;  %v6982_v10 = vpack.c.bf16 %v4565_v14, %v4563_v0  ;;  %v6986_v55 = vpack.c.bf16 %v4569_v53, %v4567_v46  ;;  %v4571_v23 = vld [vmem:[%s9316_s9 + $0xc8] sm:$0xff]  ;;  %v4601_v52 = vld [vmem:[%s9316_s9 + $0x1b8] sm:$0xff]  ;;  %v4600_v43 = vld [vmem:[%s9316_s9 + $0x1b0] sm:$0xff] }
 0x528   : > { %v4218_v21 = vrot.slane %v4187_v6, 6  ;;  %v4226_v20 = vsel %vm4197_vm8, %v4187_v6, %v4225_v30  ;;  %v4570_v30 = vld [vmem:[%s9316_s9 + $0xc0] sm:$0xff]  ;;  %v4599_v1 = vld [vmem:[%s9316_s9 + $0x1a8] sm:$0xff]  ;;  %v4605_v0 = vld [vmem:[%s9316_s9 + $0x1d8] sm:$0xff] }
 0x529   : > { %v4228_v58 = vsel %vm4200_vm9, %v4227_v54, %v4226_v20  ;;  %v4575_v54 = vld [vmem:[%s9316_s9 + $0xe8] sm:$0xff]  ;;  %v4604_v17 = vld [vmem:[%s9316_s9 + $0x1d0] sm:$0xff]  ;;  %v4609_v53 = vld [vmem:[%s9316_s9 + $0x1f8] sm:$0xff] }
 0x52a   : > { %4229 = vrot.lane.b32.xlu0 %v4228_v58, %s9334_s17  ;;  %v4219_v3 = vsel %vm4197_vm8, %v4218_v21, %v4217_v18  ;;  %v4573_v18 = vld [vmem:[%s9316_s9 + $0xd8] sm:$0xff]  ;;  %v6992_v21 = vpack.c.bf16 %v4572_v19, %v4570_v30  ;;  %v6994_v20 = vpack.c.bf16 %v4577_v5, %v4575_v54  ;;  %v4576_v58 = vld [vmem:[%s9316_s9 + $0xf0] sm:$0xff]  ;;  %v4603_v61 = vld [vmem:[%s9316_s9 + $0x1c8] sm:$0xff]  ;;  %s5366_s17 = sshll.u32 %s7342_s29, 6  ;;  %s7250_s29 = smov [#allocation3]  }
 0x52b   : > { %v4221_v26 = vsel %vm4200_vm9, %v4220_v28, %v4219_v3  ;;  %v6990_v6 = vpack.c.bf16 %v4573_v18, %v4571_v23  ;;  %v4579_v28 = vld [vmem:[%s9316_s9 + $0x108] sm:$0xff]  ;;  %v6996_v3 = vpack.c.bf16 %v4576_v58, %v4574_v7  ;;  %v4608_v31 = vld [vmem:[%s9316_s9 + $0x1f0] sm:$0xff]  ;;  %v4613_v18 = vld [vmem:[%s9316_s9 + $0x218] sm:$0xff]  ;;  %s9265_s20 = scalar_lea.hbm %s9320_s13, %s5366_s17  ;;  %s7187_s23 = sshll.u32 %s7250_s29, 4  ;;  %s7188_s23 = int_to_ptr.vmem [resolvable:$false] %s7187_s23 }
 0x52c   : > { %v6998_v62 = vpack.c.bf16 %v4581_v34, %v4579_v28  ;;  %v4607_v46 = vld [vmem:[%s9316_s9 + $0x1e8] sm:$0xff]  ;;  %v4830_v19 = vld [vmem:[%s9318_s11] sm:$0xff]  ;;  %v4832_v28 = vld [vmem:[%s9318_s11 + $0x10] sm:$0xff]  ;;  %s7189_s24 = scalar_lea.vmem %s7188_s23, 128  ;;  %p7190_p0 = scmp.lt.s32.totalorder %s9267_s22, %s7188_s23 }
 0x52d   : > { %v4611_v23 = vld [vmem:[%s9316_s9 + $0x208] sm:$0xff]  ;;  %v4833_v34 = vld [vmem:[%s9318_s11 + $0x18] sm:$0xff]  ;;  %p7191_p1 = scmp.lt.s32.totalorder %s7189_s24, %s7183_s21 }
 0x52e   : > { %v4847_v30 = vld [vmem:[%s9318_s11 + $0x88] sm:$0xff] }
 0x52f   : > { %v4831_v5 = vld [vmem:[%s9318_s11 + $0x8] sm:$0xff]  ;;  %p7192_p2 = por %p7191_p1, %p7190_p0 }
 0x530   : > { %v7096_v7 = vpack.c.bf16 %v4831_v5, %v4830_v19  ;;  %v4621_v19 = vld [vmem:[%s9316_s9 + $0x258] sm:$0xff] }
 0x531   : > { %p7193_p3 = pnand %p7192_p2, %p7186_p13 }
 0x58c   : > { %v4210_v22 = vpop.permute.xlu1 %4209 }
 0x58d   : > { %v4232_v38 = vsel %vm679_vm4, %v8702_v39, %v4210_v22  ;;  %v4553_v39 = vld [vmem:[%s9316_s9 + $0x38] sm:$0xff] }
 0x58e   : > { %v4246_v44 = vadd.f32 %v4239_v36, %v4232_v38  ;;  %v6970_v60 = vpack.c.bf16 %v4553_v39, %v4551_v11  ;;  %v4585_v22 = vld [vmem:[%s9316_s9 + $0x138] sm:$0xff]  ;;  %v4588_v11 = vld [vmem:[%s9316_s9 + $0x150] sm:$0xff]  ;;  %v4591_v39 = vld [vmem:[%s9316_s9 + $0x168] sm:$0xff] }
 0x58f   : > { %v7002_v38 = vpack.c.bf16 %v4585_v22, %v4583_v35  ;;  %v4834_v35 = vld [vmem:[%s9318_s11 + $0x20] sm:$0xff]  ;;  %v4835_v22 = vld [vmem:[%s9318_s11 + $0x28] sm:$0xff] }
 0x590   : > { %v4248_v56 = vmax.f32 %v4246_v44, 0.0  ;;  %v4587_v44 = vld [vmem:[%s9316_s9 + $0x148] sm:$0xff] }
 0x59c   : > { %v4230_v42 = vpop.permute.xlu0 %4229 }
 0x59d   : > { %v4233_v45 = vsel %vm679_vm4, %v4221_v26, %v4230_v42  ;;  %v4578_v26 = vld [vmem:[%s9316_s9 + $0x100] sm:$0xff]  ;;  %v4584_v42 = vld [vmem:[%s9316_s9 + $0x130] sm:$0xff] }
 0x59e   : > { %v4247_v48 = vadd.f32 %v4243_v16, %v4233_v45  ;;  %v7000_v36 = vpack.c.bf16 %v4580_v29, %v4578_v26  ;;  %v4582_v16 = vld [vmem:[%s9316_s9 + $0x120] sm:$0xff]  ;;  %v4589_v45 = vld [vmem:[%s9316_s9 + $0x158] sm:$0xff]  ;;  %v7100_v26 = vpack.c.bf16 %v4833_v34, %v4832_v28 }
 0x59f   : > { %v7004_v63 = vpack.c.bf16 %v4584_v42, %v4582_v16  ;;  %v7006_v40 = vpack.c.bf16 %v4589_v45, %v4587_v44  ;;  %v7104_v16 = vpack.c.bf16 %v4835_v22, %v4834_v35  ;;  %v4836_v44 = vld [vmem:[%s9318_s11 + $0x30] sm:$0xff]  ;;  %v4837_v45 = vld [vmem:[%s9318_s11 + $0x38] sm:$0xff] }
 0x5a0   : > { %v4249_v50 = vmax.f32 %v4247_v48, 0.0  ;;  %v4586_v48 = vld [vmem:[%s9316_s9 + $0x140] sm:$0xff] }
 0x5a2   : > { %4464 = vmatprep.mubr.f32.mxu1 %v4249_v50  ;;  %4535 = vmatprep.mubr.f32.mxu0 %v4249_v50  ;;  %v4593_v50 = vld [vmem:[%s9316_s9 + $0x178] sm:$0xff] }
 0x5a3   : > { %4465 = vmatmul.mubr.f32.vlgmr.msra.gmra.mrb[52].mxu1 %v4248_v56  ;;  %4536 = vmatmul.mubr.f32.vlgmr.msra.gmra.mrb[164].mxu0 %v4248_v56  ;;  %v7010_v56 = vpack.c.bf16 %v4593_v50, %v4591_v39  ;;  %v4838_v39 = vld [vmem:[%s9318_s11 + $0x40] sm:$0xff]  ;;  %v4839_v50 = vld [vmem:[%s9318_s11 + $0x48] sm:$0xff] }
 0x5a4   : > { %6969 = vmatpush1.bf16.msra.mxu1 %v6968_v51  ;;  %v7008_v51 = vpack.c.bf16 %v4588_v11, %v4586_v48  ;;  %v7108_v48 = vpack.c.bf16 %v4837_v45, %v4836_v44 }
 0x5a5   : > { %6971 = vmatprep.subr.bf16.mxu1 %v6970_v60  ;;  %v4590_v60 = vld [vmem:[%s9316_s9 + $0x160] sm:$0xff] }
 0x5a6   : > { %v7012_v59 = vpack.c.bf16 %v4592_v41, %v4590_v60  ;;  %v7112_v60 = vpack.c.bf16 %v4839_v50, %v4838_v39 }
 0x5a8   : > { %6973 = vmatpush1.bf16.msra.mxu1 %v6972_v37  ;;  %v7014_v37 = vpack.c.bf16 %v4597_v2, %v4595_v25  ;;  %v4840_v25 = vld [vmem:[%s9318_s11 + $0x50] sm:$0xff]  ;;  %v4841_v2 = vld [vmem:[%s9318_s11 + $0x58] sm:$0xff] }
 0x5a9   : > { %6975 = vmatprep.subr.bf16.mxu1 %v6974_v24  ;;  %v4594_v24 = vld [vmem:[%s9316_s9 + $0x180] sm:$0xff] }
 0x5aa   : > { %v7016_v13 = vpack.c.bf16 %v4596_v27, %v4594_v24  ;;  %v7116_v24 = vpack.c.bf16 %v4841_v2, %v4840_v25 }
 0x5ac   : > { %6977 = vmatpush1.bf16.msra.mxu1 %v6976_v12  ;;  %v7018_v12 = vpack.c.bf16 %v4601_v52, %v4599_v1  ;;  %v9035_v1 = vld [vmem:[%s9315_s8] sm:$0xf]  ;;  %v4394_v52 = vsub.s32 3, %v8746_v33 }
 0x5ad   : > { %6979 = vmatprep.subr.bf16.mxu1 %v6978_v4  ;;  %v4598_v4 = vld [vmem:[%s9316_s9 + $0x1a0] sm:$0xff] }
 0x5ae   : > { %v7020_v14 = vpack.c.bf16 %v4600_v43, %v4598_v4  ;;  %v4395_v4 = vrot.slane %v9035_v1, %v4394_v52 }
 0x5b0   : > { %6981 = vmatpush1.bf16.msra.mxu1 %v6980_v15  ;;  %v7022_v15 = vpack.c.bf16 %v4605_v0, %v4603_v61 }
 0x5b1   : > { %6983 = vmatprep.subr.bf16.mxu1 %v6982_v10  ;;  %v4602_v10 = vld [vmem:[%s9316_s9 + $0x1c0] sm:$0xff] }
 0x5b2   : > { %v7024_v9 = vpack.c.bf16 %v4604_v17, %v4602_v10  ;;  %v4610_v10 = vld [vmem:[%s9316_s9 + $0x200] sm:$0xff]  ;;  %v4612_v17 = vld [vmem:[%s9316_s9 + $0x210] sm:$0xff] }
 0x5b4   : > { %6985 = vmatpush1.bf16.msra.mxu1 %v6984_v47  ;;  %v7026_v47 = vpack.c.bf16 %v4609_v53, %v4607_v46  ;;  %v4615_v53 = vld [vmem:[%s9316_s9 + $0x228] sm:$0xff] }
 0x5b5   : > { %6987 = vmatprep.subr.bf16.mxu1 %v6986_v55  ;;  %v4606_v55 = vld [vmem:[%s9316_s9 + $0x1e0] sm:$0xff] }
 0x5b6   : > { %v7028_v57 = vpack.c.bf16 %v4608_v31, %v4606_v55  ;;  %v7032_v31 = vpack.c.bf16 %v4612_v17, %v4610_v10  ;;  %v4646_v10 = vld [vmem:[%s9316_s9 + $0x320] sm:$0xff]  ;;  %v4648_v17 = vld [vmem:[%s9316_s9 + $0x330] sm:$0xff] }
 0x5b8   : > { %6989 = vmatpush1.bf16.msra.mxu1 %v6988_v49  ;;  %v7030_v49 = vpack.c.bf16 %v4613_v18, %v4611_v23  ;;  %v4614_v18 = vld [vmem:[%s9316_s9 + $0x220] sm:$0xff] }
 0x5b9   : > { %6991 = vmatprep.subr.bf16.mxu1 %v6990_v6  ;;  %v4846_v6 = vld [vmem:[%s9318_s11 + $0x80] sm:$0xff] }
 0x5ba   : > { %v7094_v54 = vpack.c.bf16 %v4847_v30, %v4846_v6  ;;  %v4619_v30 = vld [vmem:[%s9316_s9 + $0x248] sm:$0xff] }
 0x5bb   : > { %v7038_v5 = vpack.c.bf16 %v4621_v19, %v4619_v30  ;;  %v4656_v30 = vld [vmem:[%s9316_s9 + $0x370] sm:$0xff]  ;;  %v4659_v19 = vld [vmem:[%s9316_s9 + $0x388] sm:$0xff] }
 0x5bc   : > { %6993 = vmatpush1.bf16.msra.mxu1 %v6992_v21  ;;  %v4848_v21 = vld [vmem:[%s9318_s11 + $0x90] sm:$0xff]  ;;  %7095 = vmatprep.subr.bf16.mxu0 %v7094_v54 }
 0x5bd   : > { %6995 = vmatprep.subr.bf16.mxu1 %v6994_v20  ;;  %v4849_v20 = vld [vmem:[%s9318_s11 + $0x98] sm:$0xff]  ;;  %7097 = vmatpush3.bf16.msra.mxu0 %v7096_v7  ;;  %v4623_v7 = vld [vmem:[%s9316_s9 + $0x268] sm:$0xff] }
 0x5be   : > { %v7098_v58 = vpack.c.bf16 %v4849_v20, %v4848_v21  ;;  %v4618_v21 = vld [vmem:[%s9316_s9 + $0x240] sm:$0xff]  ;;  %v4620_v20 = vld [vmem:[%s9316_s9 + $0x250] sm:$0xff] }
 0x5bf   : > { %v7040_v28 = vpack.c.bf16 %v4620_v20, %v4618_v21  ;;  %v4658_v20 = vld [vmem:[%s9316_s9 + $0x380] sm:$0xff] }
 0x5c0   : > { %6997 = vmatpush1.bf16.msra.mxu1 %v6996_v3  ;;  %v4850_v3 = vld [vmem:[%s9318_s11 + $0xa0] sm:$0xff]  ;;  %7099 = vmatprep.subr.bf16.mxu0 %v7098_v58  ;;  %v4625_v58 = vld [vmem:[%s9316_s9 + $0x278] sm:$0xff] }
 0x5c1   : > { %6999 = vmatprep.subr.bf16.mxu1 %v6998_v62  ;;  %v4851_v62 = vld [vmem:[%s9318_s11 + $0xa8] sm:$0xff]  ;;  %7101 = vmatpush3.bf16.msra.mxu0 %v7100_v26  ;;  %v7042_v34 = vpack.c.bf16 %v4625_v58, %v4623_v7  ;;  %v4660_v7 = vld [vmem:[%s9316_s9 + $0x390] sm:$0xff] }
 0x5c2   : > { %v7102_v29 = vpack.c.bf16 %v4851_v62, %v4850_v3  ;;  %v4622_v3 = vld [vmem:[%s9316_s9 + $0x260] sm:$0xff]  ;;  %v4624_v62 = vld [vmem:[%s9316_s9 + $0x270] sm:$0xff]  ;;  %v4627_v26 = vld [vmem:[%s9316_s9 + $0x288] sm:$0xff] }
 0x5c3   : > { %v7044_v35 = vpack.c.bf16 %v4624_v62, %v4622_v3  ;;  %v4663_v58 = vld [vmem:[%s9316_s9 + $0x3a8] sm:$0xff]  ;;  %v4662_v62 = vld [vmem:[%s9316_s9 + $0x3a0] sm:$0xff] }
 0x5c4   : > { %7001 = vmatpush1.bf16.msra.mxu1 %v7000_v36  ;;  %v4852_v36 = vld [vmem:[%s9318_s11 + $0xb0] sm:$0xff]  ;;  %7103 = vmatprep.subr.bf16.mxu0 %v7102_v29  ;;  %v4629_v29 = vld [vmem:[%s9316_s9 + $0x298] sm:$0xff] }
 0x5c5   : > { %7003 = vmatprep.subr.bf16.mxu1 %v7002_v38  ;;  %v4853_v38 = vld [vmem:[%s9318_s11 + $0xb8] sm:$0xff]  ;;  %7105 = vmatpush3.bf16.msra.mxu0 %v7104_v16  ;;  %v7046_v22 = vpack.c.bf16 %v4629_v29, %v4627_v26  ;;  %v4631_v16 = vld [vmem:[%s9316_s9 + $0x2a8] sm:$0xff]  ;;  %v4664_v26 = vld [vmem:[%s9316_s9 + $0x3b0] sm:$0xff] }
 0x5c6   : > { %v7106_v42 = vpack.c.bf16 %v4853_v38, %v4852_v36  ;;  %v4626_v36 = vld [vmem:[%s9316_s9 + $0x280] sm:$0xff]  ;;  %v4628_v38 = vld [vmem:[%s9316_s9 + $0x290] sm:$0xff]  ;;  %v4667_v29 = vld [vmem:[%s9316_s9 + $0x3c8] sm:$0xff] }
 0x5c7   : > { %v7048_v44 = vpack.c.bf16 %v4628_v38, %v4626_v36  ;;  %v4390_v36 = vsub.s32 2, %v8746_v33 }
 0x5c8   : > { %7005 = vmatpush1.bf16.msra.mxu1 %v7004_v63  ;;  %v4854_v63 = vld [vmem:[%s9318_s11 + $0xc0] sm:$0xff]  ;;  %7107 = vmatprep.subr.bf16.mxu0 %v7106_v42  ;;  %v4633_v42 = vld [vmem:[%s9316_s9 + $0x2b8] sm:$0xff] }
 0x5c9   : > { %7007 = vmatprep.subr.bf16.mxu1 %v7006_v40  ;;  %v4855_v40 = vld [vmem:[%s9318_s11 + $0xc8] sm:$0xff]  ;;  %7109 = vmatpush3.bf16.msra.mxu0 %v7108_v48  ;;  %v7050_v45 = vpack.c.bf16 %v4633_v42, %v4631_v16  ;;  %v4666_v16 = vld [vmem:[%s9316_s9 + $0x3c0] sm:$0xff]  ;;  %v4668_v42 = vld [vmem:[%s9316_s9 + $0x3d0] sm:$0xff] }
 0x5ca   : > { %v7110_v11 = vpack.c.bf16 %v4855_v40, %v4854_v63  ;;  %v4630_v63 = vld [vmem:[%s9316_s9 + $0x2a0] sm:$0xff]  ;;  %v4632_v40 = vld [vmem:[%s9316_s9 + $0x2b0] sm:$0xff]  ;;  %v4635_v48 = vld [vmem:[%s9316_s9 + $0x2c8] sm:$0xff]  ;;  %v7088_v33 = vpack.c.bf16 %v4668_v42, %v4666_v16 }
 0x5cb   : > { %v7052_v39 = vpack.c.bf16 %v4632_v40, %v4630_v63  ;;  %v4391_v63 = vrot.slane %v9035_v1, %v4390_v36 }
 0x5cc   : > { %7009 = vmatpush1.bf16.msra.mxu1 %v7008_v51  ;;  %v4856_v51 = vld [vmem:[%s9318_s11 + $0xd0] sm:$0xff]  ;;  %7111 = vmatprep.subr.bf16.mxu0 %v7110_v11  ;;  %v4637_v11 = vld [vmem:[%s9316_s9 + $0x2d8] sm:$0xff] }
 0x5cd   : > { %7011 = vmatprep.subr.bf16.mxu1 %v7010_v56  ;;  %v4857_v56 = vld [vmem:[%s9318_s11 + $0xd8] sm:$0xff]  ;;  %7113 = vmatpush3.bf16.msra.mxu0 %v7112_v60  ;;  %v7054_v50 = vpack.c.bf16 %v4637_v11, %v4635_v48  ;;  %v4639_v60 = vld [vmem:[%s9316_s9 + $0x2e8] sm:$0xff]  ;;  %v4670_v48 = vld [vmem:[%s9316_s9 + $0x3e0] sm:$0xff] }
 0x5ce   : > { %v7114_v41 = vpack.c.bf16 %v4857_v56, %v4856_v51  ;;  %v4634_v51 = vld [vmem:[%s9316_s9 + $0x2c0] sm:$0xff]  ;;  %v4636_v56 = vld [vmem:[%s9316_s9 + $0x2d0] sm:$0xff] }
 0x5cf   : > { %v7056_v25 = vpack.c.bf16 %v4636_v56, %v4634_v51  ;;  %v4672_v11 = vld [vmem:[%s9316_s9 + $0x3f0] sm:$0xff]  ;;  %v4843_v56 = vld [vmem:[%s9318_s11 + $0x68] sm:$0xff] }
 0x5d0   : > { %7013 = vmatpush1.bf16.msra.mxu1 %v7012_v59  ;;  %v4858_v59 = vld [vmem:[%s9318_s11 + $0xe0] sm:$0xff]  ;;  %7115 = vmatprep.subr.bf16.mxu0 %v7114_v41  ;;  %v4641_v41 = vld [vmem:[%s9316_s9 + $0x2f8] sm:$0xff] }
 0x5d1   : > { %7015 = vmatprep.subr.bf16.mxu1 %v7014_v37  ;;  %v4859_v37 = vld [vmem:[%s9318_s11 + $0xe8] sm:$0xff]  ;;  %7117 = vmatpush3.bf16.msra.mxu0 %v7116_v24  ;;  %v7058_v2 = vpack.c.bf16 %v4641_v41, %v4639_v60  ;;  %v4860_v41 = vld [vmem:[%s9318_s11 + $0xf0] sm:$0xff] }
 0x5d2   : > { %v7118_v27 = vpack.c.bf16 %v4859_v37, %v4858_v59  ;;  %v4638_v59 = vld [vmem:[%s9316_s9 + $0x2e0] sm:$0xff]  ;;  %v4640_v37 = vld [vmem:[%s9316_s9 + $0x2f0] sm:$0xff]  ;;  %v4643_v24 = vld [vmem:[%s9316_s9 + $0x308] sm:$0xff] }
 0x5d3   : > { %v7060_v52 = vpack.c.bf16 %v4640_v37, %v4638_v59  ;;  %v4845_v59 = vld [vmem:[%s9318_s11 + $0x78] sm:$0xff] }
 0x5d4   : > { %7017 = vmatpush1.bf16.msra.mxu1 %v7016_v13  ;;  %7119 = vmatprep.subr.bf16.mxu0 %v7118_v27  ;;  %v4383_v13 = vrot.slane %v9035_v1, %v8749_v8  ;;  %v4645_v27 = vld [vmem:[%s9316_s9 + $0x318] sm:$0xff] }
 0x5d5   : > { %7019 = vmatprep.subr.bf16.mxu1 %v7018_v12  ;;  %v4387_v12 = vrot.slane %v9035_v1, %v8755_v32  ;;  %v4842_v1 = vld [vmem:[%s9318_s11 + $0x60] sm:$0xff] }
 0x5d6   : > { %v7120_v60 = vpack.c.bf16 %v4843_v56, %v4842_v1 }
 0x5d8   : > { %7021 = vmatpush1.bf16.msra.mxu1 %v7020_v14  ;;  %7121 = vmatpush3.bf16.msra.mxu0 %v7120_v60 }
 0x5d9   : > { %7023 = vmatprep.subr.bf16.mxu1 %v7022_v15 }
 0x5dc   : > { %7025 = vmatpush1.bf16.msra.mxu1 %v7024_v9 }
 0x5dd   : > { %7027 = vmatprep.subr.bf16.mxu1 %v7026_v47  ;;  %v4617_v47 = vld [vmem:[%s9316_s9 + $0x238] sm:$0xff] }
 0x5de   : > { %v7034_v23 = vpack.c.bf16 %v4617_v47, %v4615_v53  ;;  %v7068_v53 = vpack.c.bf16 %v4648_v17, %v4646_v10  ;;  %v5364_v10 = vld [vmem:[%s9319_s12] ss:$0 sm:$0xff] }
 0x5e0   : > { %7029 = vmatpush1.bf16.msra.mxu1 %v7028_v57 }
 0x5e1   : > { %7031 = vmatprep.subr.bf16.mxu1 %v7030_v49  ;;  %v4616_v49 = vld [vmem:[%s9316_s9 + $0x230] sm:$0xff] }
 0x5e2   : > { %v7036_v54 = vpack.c.bf16 %v4616_v49, %v4614_v18 }
 0x676   : > { %v4466_v43 = vpop.f32.mrb[52].mxu1  ;;  %v9043_v61 = vpop.f32.mrb[164].mxu0 }
 0x677   : > { %v4467_v0 = vadd.f32 %v4466_v43, %v4383_v13  ;;  %v4468_v14 = vpop.f32.mrb[53].mxu1  ;;  %v4539_v15 = vpop.f32.mrb[165].mxu0  ;;  %v7062_v13 = vpack.c.bf16 %v4645_v27, %v4643_v24  ;;  %v4647_v43 = vld [vmem:[%s9316_s9 + $0x328] sm:$0xff]  ;;  %v4674_v24 = vld [vmem:[%s9317_s10] sm:$0x3] }
 0x678   : > { %v4469_v9 = vadd.f32 %v4468_v14, %v4387_v12  ;;  %v4540_v46 = vadd.f32 %v4539_v15, %v4395_v4  ;;  %v4642_v12 = vld [vmem:[%s9316_s9 + $0x300] sm:$0xff]  ;;  %v4644_v4 = vld [vmem:[%s9316_s9 + $0x310] sm:$0xff]  ;;  %v4679_v27 = vrot.slane %v4674_v24, %v8749_v8 }
 0x679   : > { %v4542_v57 = vmax.f32 %v4467_v0, 0.0  ;;  %v4649_v0 = vld [vmem:[%s9316_s9 + $0x338] sm:$0xff]  ;;  %v7064_v14 = vpack.c.bf16 %v4644_v4, %v4642_v12 }
 0x67a   : > { %v4543_v55 = vmax.f32 %v4469_v9, 0.0  ;;  %v4545_v6 = vmax.f32 %v4540_v46, 0.0  ;;  %v7066_v15 = vpack.c.bf16 %v4649_v0, %v4647_v43  ;;  %v4651_v9 = vld [vmem:[%s9316_s9 + $0x348] sm:$0xff]  ;;  %v4653_v46 = vld [vmem:[%s9316_s9 + $0x358] sm:$0xff] }
 0x67b   : > { %v7070_v47 = vpack.c.bf16 %v4653_v46, %v4651_v9 }
 0x67c   : > { %4750 = vmatprep.mubr.f32.mxu1 %v4543_v55  ;;  %v4650_v55 = vld [vmem:[%s9316_s9 + $0x340] sm:$0xff] }
 0x67d   : > { %4751 = vmatmul.mubr.f32.vlgmr.msra.gmra.mrb[54].mxu1 %v4542_v57  ;;  %v4655_v57 = vld [vmem:[%s9316_s9 + $0x368] sm:$0xff] }
 0x67e   : > { %7033 = vmatpush1.bf16.msra.mxu1 %v7032_v31  ;;  %4821 = vmatprep.mubr.f32.mxu1 %v4545_v6  ;;  %v4652_v31 = vld [vmem:[%s9316_s9 + $0x350] sm:$0xff]  ;;  %v4654_v6 = vld [vmem:[%s9316_s9 + $0x360] sm:$0xff] }
 0x67f   : > { %7035 = vmatprep.subr.bf16.mxu1 %v7034_v23  ;;  %v4657_v23 = vld [vmem:[%s9316_s9 + $0x378] sm:$0xff]  ;;  %v7072_v18 = vpack.c.bf16 %v4652_v31, %v4650_v55 }
 0x680   : > { %v7074_v49 = vpack.c.bf16 %v4657_v23, %v4655_v57 }
 0x682   : > { %7037 = vmatpush1.bf16.msra.mxu1 %v7036_v54  ;;  %v4661_v54 = vld [vmem:[%s9316_s9 + $0x398] sm:$0xff] }
 0x683   : > { %7039 = vmatprep.subr.bf16.mxu1 %v7038_v5  ;;  %v7076_v5 = vpack.c.bf16 %v4656_v30, %v4654_v6  ;;  %v7078_v21 = vpack.c.bf16 %v4661_v54, %v4659_v19 }
 0x686   : > { %7041 = vmatpush1.bf16.msra.mxu1 %v7040_v28  ;;  %v4665_v28 = vld [vmem:[%s9316_s9 + $0x3b8] sm:$0xff] }
 0x687   : > { %7043 = vmatprep.subr.bf16.mxu1 %v7042_v34  ;;  %v7080_v34 = vpack.c.bf16 %v4660_v7, %v4658_v20  ;;  %v7082_v3 = vpack.c.bf16 %v4665_v28, %v4663_v58 }
 0x68a   : > { %7045 = vmatpush1.bf16.msra.mxu1 %v7044_v35  ;;  %v4669_v35 = vld [vmem:[%s9316_s9 + $0x3d8] sm:$0xff] }
 0x68b   : > { %7047 = vmatprep.subr.bf16.mxu1 %v7046_v22  ;;  %v7084_v22 = vpack.c.bf16 %v4664_v26, %v4662_v62  ;;  %v7086_v38 = vpack.c.bf16 %v4669_v35, %v4667_v29 }
 0x68e   : > { %7049 = vmatpush1.bf16.msra.mxu1 %v7048_v44  ;;  %v4671_v44 = vld [vmem:[%s9316_s9 + $0x3e8] sm:$0xff] }
 0x68f   : > { %7051 = vmatprep.subr.bf16.mxu1 %v7050_v45  ;;  %v4673_v45 = vld [vmem:[%s9316_s9 + $0x3f8] sm:$0xff] }
 0x690   : > { %v7090_v40 = vpack.c.bf16 %v4673_v45, %v4671_v44 }
 0x692   : > { %7053 = vmatpush1.bf16.msra.mxu1 %v7052_v39  ;;  %v7092_v39 = vpack.c.bf16 %v4672_v11, %v4670_v48 }
 0x693   : > { %7055 = vmatprep.subr.bf16.mxu1 %v7054_v50  ;;  %v4538_v50 = vadd.f32 %v9043_v61, %v4391_v63  ;;  %v4861_v61 = vld [vmem:[%s9318_s11 + $0xf8] sm:$0xff] }
 0x695   : > { %v4544_v51 = vmax.f32 %v4538_v50, 0.0 }
 0x696   : > { %7057 = vmatpush1.bf16.msra.mxu1 %v7056_v25  ;;  %v7122_v25 = vpack.c.bf16 %v4861_v61, %v4860_v41 }
 0x697   : > { %7059 = vmatprep.subr.bf16.mxu1 %v7058_v2  ;;  %v4844_v2 = vld [vmem:[%s9318_s11 + $0x70] sm:$0xff] }
 0x698   : > { %v7124_v37 = vpack.c.bf16 %v4845_v59, %v4844_v2  ;;  %7123 = vmatprep.subr.bf16.mxu0 %v7122_v25 }
 0x69a   : > { %7061 = vmatpush1.bf16.msra.mxu1 %v7060_v52  ;;  %7125 = vmatpush3.bf16.msra.mxu0 %v7124_v37  ;;  %v4683_v52 = vrot.slane %v4674_v24, %v8755_v32 }
 0x69b   : > { %7063 = vmatprep.subr.bf16.mxu1 %v7062_v13 }
 0x69e   : > { %7065 = vmatpush1.bf16.msra.mxu1 %v7064_v14 }
 0x69f   : > { %7067 = vmatprep.subr.bf16.mxu1 %v7066_v15 }
 0x6a2   : > { %7069 = vmatpush1.bf16.msra.mxu1 %v7068_v53 }
 0x6a3   : > { %7071 = vmatprep.subr.bf16.mxu1 %v7070_v47 }
 0x6a6   : > { %7073 = vmatpush1.bf16.msra.mxu1 %v7072_v18 }
 0x6a7   : > { %7075 = vmatprep.subr.bf16.mxu1 %v7074_v49 }
 0x6aa   : > { %7077 = vmatpush1.bf16.msra.mxu1 %v7076_v5 }
 0x6ab   : > { %7079 = vmatprep.subr.bf16.mxu1 %v7078_v21 }
 0x6ae   : > { %7081 = vmatpush1.bf16.msra.mxu1 %v7080_v34 }
 0x6af   : > { %7083 = vmatprep.subr.bf16.mxu1 %v7082_v3 }
 0x6b2   : > { %7085 = vmatpush1.bf16.msra.mxu1 %v7084_v22 }
 0x6b3   : > { %7087 = vmatprep.subr.bf16.mxu1 %v7086_v38 }
 0x6b6   : > { %7089 = vmatpush1.bf16.msra.mxu1 %v7088_v33 }
 0x6b7   : > { %7091 = vmatprep.subr.bf16.mxu1 %v7090_v40 }
 0x6ba   : > { %7093 = vmatpush1.bf16.msra.mxu1 %v7092_v39 }
 0x6bd   : > { %4822 = vmatmul.mubr.f32.vlgmr.msra.gmra.mrb[54].mxu1 %v4544_v51 }
 0x790   : > { %v4823_v13 = vpop.f32.mrb[54].mxu1 }
 0x791   : > { %v7126_v12 = vadd.f32 %v4823_v13, %v4679_v27  ;;  %v4825_v4 = vpop.f32.mrb[55].mxu1 }
 0x792   : > { %v7127_v43 = vadd.f32 %v4825_v4, %v4683_v52 }
 0x793   : > { %v4828_v14 = vmax.f32 %v7126_v12, 0.0 }
 0x794   : > { %v4829_v0 = vmax.f32 %v7127_v43, 0.0 }
 0x796   : > { %4933 = vmatprep.mubr.f32.mxu0 %v4829_v0 }
 0x797   : > { %4934 = vmatmul.mubr.f32.vlgmr.msra.gmra.mrb[166].mxu0 %v4828_v14 }
 0x86a   : > { %v5793_v15 = vpop.f32.mrb[166].mxu0 }
 0x86b   : > { %v5794_v17 = vpop.f32.mrb[167].mxu0 }
 0x86c   : > { %v5795_v8 = vadd.f32 %v5794_v17, %v5793_v15 }
 0x86e   : > { %v4936_v32 = vadd.f32 %v5795_v8, %v5364_v10 }
 0x870   : > { %4939 = vst [vmem:[%s436_s15] sm:$0xf] %v4936_v32 }
 0x871   : > { %7196 = shalt.err (!%p7193_p3)
}
 0x872   : > { %s7197_s0 = scalar_lea.hbm %s9265_s20, 64  ;;  %s7201_s15 = scalar_lea.hbm %s9320_s13, 128 }
 0x873   : > { %p7198_p4 = scmp.ne.s32.totalorder %s9265_s20, %s7197_s0  ;;  %p7202_p9 = scmp.lt.u32.totalorder %s9265_s20, %s9320_s13 }
 0x874   : > { %p7203_p10 = scmp.lt.u32.totalorder %s7201_s15, %s7197_s0  ;;  %p7205_p12 = scmp.lt.u32.totalorder %s7197_s0, %s9265_s20 }
 0x875   : > { %p7199_p7 = pnand %p7198_p4, %p7359_p5 }
 0x876   : > { %p7204_p11 = por %p7203_p10, %p7202_p9 }
 0x877   : > { %p7200_p8 = pneg %p7199_p7 }
 0x878   : > { %p7206_p13 = por %p7205_p12, %p7204_p11 }
 0x87a   : > { %p7207_p0 = pnand %p7206_p13, %p7200_p8 }
 0x87c   : > { %7210 = shalt.err (!%p7207_p0)
}
 0x87d   : > { %7131 = dma.vmem_to_hbm [thread:$0]  (%p7359_p5), %s9267_s22, 64, %s9265_s20, %s4941_s2  }
 0x87e PF: > { %p7137_p1 = scmp.ge.s32.totalorder %s7245_s28, 2  ;;  %s4966_s21 = sand.u32 1, %s7233_s25  }
 0x87f   : > { %s4967_s29 = scalar_lea.sflag [#allocation4], %s4966_s21 }
 0x880   : > { %p7134_p2 = pnand %p7137_p1, %p7363_p6 }
 0x882   : > { %7228 = dma.done.wait (!%p7134_p2), %s4967_s29, 64  }
 0x883   : > { %7230 = vsyncadd (!%p7134_p2), %s4967_s29, 4294967232  ;;  %s9335_s23 = sld [smem:[#allocation6_spill]]  ;;  %p23_p3 = scmp.ge.s32.totalorder %s7346_s14, 4  }
 0x884   : > { %s9336_s25 = smov %s7237_s26  ;;  %s9337_s26 = smov %s7241_s27 }
 0x885   : > { %s9339_s28 = smov %s7346_s14  ;;  %25 = sbr.rel (!%p23_p3) target bundleno = 7 (0x7), region = 121 }
 0x889   : > { %s9338_s27 = smov %s9335_s23 }
 0x88c   :  { %4972 = vsyncpa [#allocation4], 1 }
 0x88d   :  { %4974 = vsyncpa [#allocation4 + $0x1], 1 }

</bundles_post_ra>
